<compile_context>
chip_gen: v5e
topology: v5e:2x2
jax: 0.10.0
libtpu: 0.0.40
codegen_flags: <defaults>
</compile_context>

<pallas_src>
import math

import jax
import jax.numpy as jnp
from jax.experimental import pallas as pl
from jax.experimental.pallas import tpu as pltpu

EMBED_DIM = 64
NUM_HEADS = 4
HEAD_DIM = EMBED_DIM // NUM_HEADS
FFN_DIM = 4 * EMBED_DIM
NUM_LAYERS = 2
EXPAND_RATIO = 3
LN_EPS = 1e-5
Q_TILE = 256          # query-row tile for attention (bounds (TQ,S) live set)


def _pick_exp_dtype():
    """bf16 exp on chips with a bf16 EUP (v6e/v7x); f32 everywhere else."""
    try:
        kind = jax.devices()[0].device_kind.lower()
    except Exception:
        return jnp.float32
    if "v6" in kind or "v7" in kind:
        return jnp.bfloat16
    return jnp.float32


EXP_DTYPE = _pick_exp_dtype()


def _layer_norm(h, w_row, b_row):
    mean = jnp.mean(h, axis=-1, keepdims=True)
    var = jnp.mean((h - mean) ** 2, axis=-1, keepdims=True)
    return (h - mean) * jax.lax.rsqrt(var + LN_EPS) * w_row + b_row


def pct_kernel(x_ref, gvec_ref, wqkv_ref, bqkv_ref, wobd_ref, lvec_ref,
               w1_ref, b1_ref, w2_ref, weT_ref, be_ref, out_ref):
    nb_count = x_ref.shape[0]                        # batch elements this step
    S = x_ref.shape[1]
    wf = gvec_ref[0:1, :]                            # (1, D)
    bf = gvec_ref[1:2, :]                            # (1, D)

    # flatten_fc: nn.Linear(1, D) == outer-product broadcast, stacked over NB.
    h_list = [x_ref[nb] * wf + bf for nb in range(nb_count)]     # each (S, D)
    h = h_list[0] if nb_count == 1 else jnp.concatenate(h_list, axis=0)

    for l in range(NUM_LAYERS):                      # unrolled (2 layers)
        wqkv = wqkv_ref[l]                           # (D, 3D)  bf16
        bqkv = bqkv_ref[l:l + 1, :]                  # (1, 3D)  f32
        wo_bd = wobd_ref[l]                          # (D, H*D) bf16 (block-diag)
        lv = lvec_ref[l]                             # (6, D)   f32
        bo, ln1w, ln1b = lv[0:1, :], lv[1:2, :], lv[2:3, :]
        b2, ln2w, ln2b = lv[3:4, :], lv[4:5, :], lv[5:6, :]
        w1 = w1_ref[l]                               # (D, 4D)  bf16
        b1 = b1_ref[l:l + 1, :]                      # (1, 4D)  f32
        w2 = w2_ref[l]                               # (4D, D)  bf16

        # ---- multi-head self-attention (post-norm encoder layer) ----
        # fused QKV projection over all stacked rows (softmax scale is already
        # folded into the Q weights/bias at pack time).
        qkv = jnp.dot(h.astype(jnp.bfloat16), wqkv,
                      preferred_element_type=jnp.float32) + bqkv   # (rows, 3D)

        attn_rows = []
        for nb in range(nb_count):                   # attention is per element
            r0 = nb * S
            qkv_e = qkv[r0:r0 + S, :]                                # (S, 3D)
            k_all = qkv_e[:, EMBED_DIM:2 * EMBED_DIM].astype(jnp.bfloat16)
            v_all = qkv_e[:, 2 * EMBED_DIM:3 * EMBED_DIM].astype(jnp.bfloat16)
            # output projection folded into V via block-diagonal Wo:
            # one (S,64)@(64,256) matmul; per-head slices are 64-lane aligned.
            vwo = jnp.dot(v_all, wo_bd,
                          preferred_element_type=jnp.float32
                          ).astype(jnp.bfloat16)                    # (S, H*D)

            tq = min(S, Q_TILE)
            tiles = []
            for t0 in range(0, S, tq):               # query-row tiling
                t1 = min(S, t0 + tq)
                q_tile = qkv_e[t0:t1, 0:EMBED_DIM].astype(jnp.bfloat16)
                acc = jnp.zeros((t1 - t0, EMBED_DIM), jnp.float32)
                for hh in range(NUM_HEADS):          # unrolled (4 heads)
                    s0 = hh * HEAD_DIM
                    qh = q_tile[:, s0:s0 + HEAD_DIM]
                    kh = k_all[:, s0:s0 + HEAD_DIM]
                    scores = jax.lax.dot_general(
                        qh, kh, (((1,), (1,)), ((), ())),
                        preferred_element_type=jnp.float32)          # (TQ, S)
                    m = jnp.max(scores, axis=-1, keepdims=True)
                    e = jnp.exp((scores - m).astype(EXP_DTYPE))      # (TQ, S)
                    row_sum = jnp.sum(e, axis=-1, keepdims=True,
                                      dtype=jnp.float32)             # (TQ, 1)
                    # unnormalized P @ (V Wo_h); normalize after on the EUP
                    oh = jnp.dot(e.astype(jnp.bfloat16),
                                 vwo[:, hh * EMBED_DIM:(hh + 1) * EMBED_DIM],
                                 preferred_element_type=jnp.float32)  # (TQ, D)
                    acc = acc + oh * pl.reciprocal(row_sum, approx=True)
                tiles.append(acc)
            attn_e = tiles[0] if len(tiles) == 1 else jnp.concatenate(tiles, 0)
            attn_rows.append(attn_e)
        attn = (attn_rows[0] if nb_count == 1
                else jnp.concatenate(attn_rows, axis=0)) + bo        # (rows, D)

        h = _layer_norm(h + attn, ln1w, ln1b)

        # ---- feed-forward block (stacked rows) ----
        ff = jnp.maximum(
            jnp.dot(h.astype(jnp.bfloat16), w1,
                    preferred_element_type=jnp.float32) + b1, 0.0)
        ff = jnp.dot(ff.astype(jnp.bfloat16), w2,
                     preferred_element_type=jnp.float32) + b2
        h = _layer_norm(h + ff, ln2w, ln2b)

    # ---- expansion head: Linear(D, 3) + ReLU, stored transposed (3, S) per
    # element so the output store is lane-dense ----
    for nb in range(nb_count):
        h_e = h[nb * S:(nb + 1) * S, :].astype(jnp.bfloat16)
        out_t = jax.lax.dot_general(
            weT_ref[...], h_e, (((1,), (1,)), ((), ())),
            preferred_element_type=jnp.float32)                      # (3, S)
        out_ref[nb] = jnp.maximum(out_t + be_ref[...], 0.0)


def init_params(key):
    """Deterministic synthetic parameters (shapes match the nn.Module)."""
    def nrm(k, shape, scale=0.05):
        return scale * jax.random.normal(k, shape, dtype=jnp.float32)

    keys = iter(jax.random.split(key, 32))
    p = {}
    # flatten_fc: nn.Linear(1, D) -> stored transposed: (1, D)
    p["wf"] = nrm(next(keys), (1, EMBED_DIM))
    p["bf"] = nrm(next(keys), (1, EMBED_DIM))
    # per-layer attention projections (q/k/v split of in_proj), transposed (D, D)
    p["wq"] = nrm(next(keys), (NUM_LAYERS, EMBED_DIM, EMBED_DIM))
    p["bq"] = nrm(next(keys), (NUM_LAYERS, EMBED_DIM))
    p["wk"] = nrm(next(keys), (NUM_LAYERS, EMBED_DIM, EMBED_DIM))
    p["bk"] = nrm(next(keys), (NUM_LAYERS, EMBED_DIM))
    p["wv"] = nrm(next(keys), (NUM_LAYERS, EMBED_DIM, EMBED_DIM))
    p["bv"] = nrm(next(keys), (NUM_LAYERS, EMBED_DIM))
    p["wo"] = nrm(next(keys), (NUM_LAYERS, EMBED_DIM, EMBED_DIM))
    p["bo"] = nrm(next(keys), (NUM_LAYERS, EMBED_DIM))
    p["ln1w"] = jnp.ones((NUM_LAYERS, EMBED_DIM), jnp.float32)
    p["ln1b"] = jnp.zeros((NUM_LAYERS, EMBED_DIM), jnp.float32)
    # FFN: linear1 (D->4D), linear2 (4D->D), transposed
    p["w1"] = nrm(next(keys), (NUM_LAYERS, EMBED_DIM, FFN_DIM))
    p["b1"] = nrm(next(keys), (NUM_LAYERS, FFN_DIM))
    p["w2"] = nrm(next(keys), (NUM_LAYERS, FFN_DIM, EMBED_DIM))
    p["b2"] = nrm(next(keys), (NUM_LAYERS, EMBED_DIM))
    p["ln2w"] = jnp.ones((NUM_LAYERS, EMBED_DIM), jnp.float32)
    p["ln2b"] = jnp.zeros((NUM_LAYERS, EMBED_DIM), jnp.float32)
    # expansion: Linear(D, expand_ratio), transposed (D, E)
    p["we"] = nrm(next(keys), (EMBED_DIM, EXPAND_RATIO))
    p["be"] = nrm(next(keys), (1, EXPAND_RATIO))
    return p


PACKED_ORDER = ["gvec", "wqkv", "bqkv", "wo_bd", "lvec",
                "w1", "b1", "w2", "weT", "be"]


def pack_params(p):
    """Fuse QKV (with softmax scale folded into Q), build head-block-diagonal
    Wo, pack small per-layer vectors, cast matmul weights to bf16."""
    scale = 1.0 / math.sqrt(HEAD_DIM)
    wq = p["wq"] * scale                                             # fold 1/sqrt(dh)
    bq = p["bq"] * scale
    wqkv = jnp.concatenate([wq, p["wk"], p["wv"]], axis=-1)          # (L, D, 3D)
    bqkv = jnp.concatenate([bq, p["bk"], p["bv"]], axis=-1)          # (L, 3D)
    # head-block-diagonal output projection: (L, D, H*D)
    wo_bd = jnp.zeros((NUM_LAYERS, EMBED_DIM, NUM_HEADS * EMBED_DIM),
                      jnp.float32)
    for hh in range(NUM_HEADS):
        r0 = hh * HEAD_DIM
        wo_bd = wo_bd.at[:, r0:r0 + HEAD_DIM,
                         hh * EMBED_DIM:(hh + 1) * EMBED_DIM].set(
            p["wo"][:, r0:r0 + HEAD_DIM, :])
    lvec = jnp.stack([p["bo"], p["ln1w"], p["ln1b"],
                      p["b2"], p["ln2w"], p["ln2b"]], axis=1)        # (L, 6, D)
    gvec = jnp.concatenate([p["wf"], p["bf"]], axis=0)               # (2, D)
    return {
        "gvec": gvec.astype(jnp.float32),
        "wqkv": wqkv.astype(jnp.bfloat16),
        "bqkv": bqkv.astype(jnp.float32),
        "wo_bd": wo_bd.astype(jnp.bfloat16),
        "lvec": lvec.astype(jnp.float32),
        "w1": p["w1"].astype(jnp.bfloat16),
        "b1": p["b1"].astype(jnp.float32),
        "w2": p["w2"].astype(jnp.bfloat16),
        "weT": p["we"].T.astype(jnp.bfloat16),                       # (E, D)
        "be": p["be"].reshape(EXPAND_RATIO, 1).astype(jnp.float32),  # (E, 1)
    }


def _batch_block(B, S):
    """Batch elements per grid step: tall stacked-M matmuls while keeping
    >=2 grid steps (v7x has 2 TensorCores) and a bounded activation height."""
    if B <= 1:
        return 1
    nb = (B + 1) // 2
    max_rows = max(1, 4096 // max(S, 1))
    return max(1, min(nb, max_rows))


def _physical_vmem_bytes():
    try:
        return int(pltpu.get_tpu_info().vmem_capacity_bytes)
    except Exception:
        return 64 << 20                      # conservative (v7x-sized) fallback


def _vmem_limit_bytes(NB, S):
    D, F, H = EMBED_DIM, FFN_DIM, NUM_HEADS
    rows = NB * S
    tq = min(S, Q_TILE)
    lane = lambda n: ((n + 127) // 128) * 128
    # stacked f32 activations: h, residual, qkv(3D), attn, ffn hidden
    acts = 4 * rows * (6 * D + 3 * D + F)
    # per-head score working set: f32 scores + exp + bf16 matmul copy, 2x slack
    scores = 2 * tq * lane(S) * (4 + 4 + 2)
    # V @ Wo_bd result (f32 acc + bf16 copy) per element
    vwo = S * H * D * (4 + 2)
    # weights (bf16, double-buffered) + small f32 vectors
    weights = 2 * 2 * (NUM_LAYERS * (3 * D * D + H * D * D + 2 * D * F) + 3 * D)
    vects = 2 * 4 * (2 * D + NUM_LAYERS * (3 * D + F + 6 * D) + EXPAND_RATIO)
    # double-buffered IO blocks: (NB,S,1) input is lane-padded to 128 in VMEM
    io = 2 * 4 * NB * (S * 128 + 8 * lane(S))
    need = acts + scores + vwo + weights + vects + io + (6 << 20)
    cap = max(int(0.82 * _physical_vmem_bytes()), 32 << 20)
    return int(min(max(need, 32 << 20), cap))


def _cost_estimate(B, S):
    D, F, E, H, L = EMBED_DIM, FFN_DIM, EXPAND_RATIO, NUM_HEADS, NUM_LAYERS
    per_layer = (2 * S * D * 3 * D                     # fused QKV projection
                 + 2 * S * D * (H * D)                 # V @ Wo_bd fold
                 + H * (2 * S * S * HEAD_DIM           # Q K^T
                        + 2 * S * S * D)               # P @ (V Wo)
                 + 2 * S * D * F + 2 * S * F * D       # FFN
                 + 16 * S * D)                         # LN / residual / bias
    flops = B * (2 * S * D + L * per_layer + 2 * S * D * E)
    transcendentals = B * L * (H * S * S + 2 * S)
    w_bytes = 2 * (L * (3 * D * D + H * D * D + 2 * D * F) + E * D)
    b_bytes = 4 * (2 * D + L * (3 * D + F + 6 * D) + E)
    bytes_accessed = B * S * 4 + B * E * S * 4 + w_bytes + b_bytes
    return pl.CostEstimate(flops=int(flops),
                           transcendentals=int(transcendentals),
                           bytes_accessed=int(bytes_accessed))


@jax.jit
def point_cloud_transformer(x, packed):
    B, C, N = x.shape
    S = C * N
    NB = _batch_block(B, S)
    grid_b = -(-B // NB)
    Bpad = grid_b * NB

    # x.view(B, 1, -1).permute(0, 2, 1)  ->  (B, S, 1), row-major over (C, N)
    x_seq = x.reshape(B, S, 1).astype(jnp.float32)
    if Bpad != B:
        x_seq = jnp.pad(x_seq, ((0, Bpad - B), (0, 0), (0, 0)))

    plist = [packed[k] for k in PACKED_ORDER]
    param_specs = [
        pl.BlockSpec(p.shape, (lambda nd: (lambda b: (0,) * nd))(p.ndim))
        for p in plist
    ]

    out_t = pl.pallas_call(
        pct_kernel,
        out_shape=jax.ShapeDtypeStruct((Bpad, EXPAND_RATIO, S), jnp.float32),
        grid=(grid_b,),
        in_specs=[pl.BlockSpec((NB, S, 1), lambda b: (b, 0, 0))] + param_specs,
        out_specs=pl.BlockSpec((NB, EXPAND_RATIO, S), lambda b: (b, 0, 0)),
        compiler_params=pltpu.CompilerParams(
            dimension_semantics=("parallel",),
            vmem_limit_bytes=_vmem_limit_bytes(NB, S)),
        cost_estimate=_cost_estimate(B, S),
    )(x_seq, *plist)

    # (Bpad, 3, S) -> (B, S, 3) -> x.view(B, C, -1)
    out_t = out_t[:B]
    return jnp.transpose(out_t, (0, 2, 1)).reshape(B, C, N * EXPAND_RATIO)


if __name__ == "__main__":
    key = jax.random.PRNGKey(0)
    kx, kp = jax.random.split(key)

    B, C, N = 2, 4, 16          # S = C*N = 64
    x = jax.random.normal(kx, (B, C, N), dtype=jnp.float32)
    params = init_params(kp)
    packed = pack_params(params)

    y = point_cloud_transformer(x, packed)
    jax.block_until_ready(y)

    assert y.shape == (B, C, N * EXPAND_RATIO), y.shape
    assert y.dtype == jnp.float32
    print("KERNEL_OK")
</pallas_src>

<mosaic_0001>
module attributes {stable_mosaic.version = 11 : i64} {
  func.func @pct_kernel(%arg0: i32, %arg1: memref<1x64x1xf32, #tpu.memory_space<vmem>>, %arg2: memref<2x64xf32, #tpu.memory_space<vmem>>, %arg3: memref<2x64x192xbf16, #tpu.memory_space<vmem>>, %arg4: memref<2x192xf32, #tpu.memory_space<vmem>>, %arg5: memref<2x64x256xbf16, #tpu.memory_space<vmem>>, %arg6: memref<2x6x64xf32, #tpu.memory_space<vmem>>, %arg7: memref<2x64x256xbf16, #tpu.memory_space<vmem>>, %arg8: memref<2x256xf32, #tpu.memory_space<vmem>>, %arg9: memref<2x256x64xbf16, #tpu.memory_space<vmem>>, %arg10: memref<3x64xbf16, #tpu.memory_space<vmem>>, %arg11: memref<3x1xf32, #tpu.memory_space<vmem>>, %arg12: memref<1x3x64xf32, #tpu.memory_space<vmem>>) attributes {dimension_semantics = [#tpu.dimension_semantics<parallel>], iteration_bounds = array<i64: 2>, scalar_prefetch = 0 : i64, scratch_operands = 0 : i64, tpu.core_type = #tpu.core_type<tc>, window_params = [{transform_indices = @transform_0, window_bounds = array<i64: 1, 64, 1>}, {pipeline_mode = #tpu.pipeline_mode<synchronous>, transform_indices = @transform_1, window_bounds = array<i64: 2, 64>}, {pipeline_mode = #tpu.pipeline_mode<synchronous>, transform_indices = @transform_2, window_bounds = array<i64: 2, 64, 192>}, {pipeline_mode = #tpu.pipeline_mode<synchronous>, transform_indices = @transform_3, window_bounds = array<i64: 2, 192>}, {pipeline_mode = #tpu.pipeline_mode<synchronous>, transform_indices = @transform_4, window_bounds = array<i64: 2, 64, 256>}, {pipeline_mode = #tpu.pipeline_mode<synchronous>, transform_indices = @transform_5, window_bounds = array<i64: 2, 6, 64>}, {pipeline_mode = #tpu.pipeline_mode<synchronous>, transform_indices = @transform_6, window_bounds = array<i64: 2, 64, 256>}, {pipeline_mode = #tpu.pipeline_mode<synchronous>, transform_indices = @transform_7, window_bounds = array<i64: 2, 256>}, {pipeline_mode = #tpu.pipeline_mode<synchronous>, transform_indices = @transform_8, window_bounds = array<i64: 2, 256, 64>}, {pipeline_mode = #tpu.pipeline_mode<synchronous>, transform_indices = @transform_9, window_bounds = array<i64: 3, 64>}, {pipeline_mode = #tpu.pipeline_mode<synchronous>, transform_indices = @transform_10, window_bounds = array<i64: 3, 1>}, {transform_indices = @transform_11, window_bounds = array<i64: 1, 3, 64>}]} {
    %c0 = arith.constant 0 : index
    %c0_0 = arith.constant 0 : index
    %0 = vector.load %arg2[%c0, %c0_0] : memref<2x64xf32, #tpu.memory_space<vmem>>, vector<1x64xf32>
    %c1 = arith.constant 1 : index
    %c0_1 = arith.constant 0 : index
    %1 = vector.load %arg2[%c1, %c0_1] : memref<2x64xf32, #tpu.memory_space<vmem>>, vector<1x64xf32>
    %c0_2 = arith.constant 0 : index
    %c0_3 = arith.constant 0 : index
    %c0_4 = arith.constant 0 : index
    %2 = vector.load %arg1[%c0_2, %c0_3, %c0_4] : memref<1x64x1xf32, #tpu.memory_space<vmem>>, vector<1x64x1xf32>
    %3 = vector.shape_cast %2 : vector<1x64x1xf32> to vector<64x1xf32>
    %4 = vector.broadcast %3 : vector<64x1xf32> to vector<64x64xf32>
    %5 = vector.broadcast %0 : vector<1x64xf32> to vector<64x64xf32>
    %6 = arith.mulf %4, %5 : vector<64x64xf32>
    %7 = vector.broadcast %1 : vector<1x64xf32> to vector<64x64xf32>
    %8 = arith.addf %6, %7 : vector<64x64xf32>
    %c0_5 = arith.constant 0 : index
    %c0_6 = arith.constant 0 : index
    %c0_7 = arith.constant 0 : index
    %9 = vector.load %arg3[%c0_5, %c0_6, %c0_7] : memref<2x64x192xbf16, #tpu.memory_space<vmem>>, vector<1x64x192xbf16>
    %10 = vector.shape_cast %9 : vector<1x64x192xbf16> to vector<64x192xbf16>
    %c0_8 = arith.constant 0 : index
    %c0_9 = arith.constant 0 : index
    %11 = vector.load %arg4[%c0_8, %c0_9] : memref<2x192xf32, #tpu.memory_space<vmem>>, vector<1x192xf32>
    %c0_10 = arith.constant 0 : index
    %c0_11 = arith.constant 0 : index
    %c0_12 = arith.constant 0 : index
    %12 = vector.load %arg5[%c0_10, %c0_11, %c0_12] : memref<2x64x256xbf16, #tpu.memory_space<vmem>>, vector<1x64x256xbf16>
    %13 = vector.shape_cast %12 : vector<1x64x256xbf16> to vector<64x256xbf16>
    %c0_13 = arith.constant 0 : index
    %c0_14 = arith.constant 0 : index
    %c0_15 = arith.constant 0 : index
    %14 = vector.load %arg6[%c0_13, %c0_14, %c0_15] : memref<2x6x64xf32, #tpu.memory_space<vmem>>, vector<1x6x64xf32>
    %15 = vector.shape_cast %14 : vector<1x6x64xf32> to vector<6x64xf32>
    %16 = vector.extract_strided_slice %15 {offsets = [0, 0], sizes = [1, 64], strides = [1, 1]} : vector<6x64xf32> to vector<1x64xf32>
    %17 = vector.extract_strided_slice %15 {offsets = [1, 0], sizes = [1, 64], strides = [1, 1]} : vector<6x64xf32> to vector<1x64xf32>
    %18 = vector.extract_strided_slice %15 {offsets = [2, 0], sizes = [1, 64], strides = [1, 1]} : vector<6x64xf32> to vector<1x64xf32>
    %19 = vector.extract_strided_slice %15 {offsets = [3, 0], sizes = [1, 64], strides = [1, 1]} : vector<6x64xf32> to vector<1x64xf32>
    %20 = vector.extract_strided_slice %15 {offsets = [4, 0], sizes = [1, 64], strides = [1, 1]} : vector<6x64xf32> to vector<1x64xf32>
    %21 = vector.extract_strided_slice %15 {offsets = [5, 0], sizes = [1, 64], strides = [1, 1]} : vector<6x64xf32> to vector<1x64xf32>
    %c0_16 = arith.constant 0 : index
    %c0_17 = arith.constant 0 : index
    %c0_18 = arith.constant 0 : index
    %22 = vector.load %arg7[%c0_16, %c0_17, %c0_18] : memref<2x64x256xbf16, #tpu.memory_space<vmem>>, vector<1x64x256xbf16>
    %23 = vector.shape_cast %22 : vector<1x64x256xbf16> to vector<64x256xbf16>
    %c0_19 = arith.constant 0 : index
    %c0_20 = arith.constant 0 : index
    %24 = vector.load %arg8[%c0_19, %c0_20] : memref<2x256xf32, #tpu.memory_space<vmem>>, vector<1x256xf32>
    %c0_21 = arith.constant 0 : index
    %c0_22 = arith.constant 0 : index
    %c0_23 = arith.constant 0 : index
    %25 = vector.load %arg9[%c0_21, %c0_22, %c0_23] : memref<2x256x64xbf16, #tpu.memory_space<vmem>>, vector<1x256x64xbf16>
    %26 = vector.shape_cast %25 : vector<1x256x64xbf16> to vector<256x64xbf16>
    %27 = arith.truncf %8 : vector<64x64xf32> to vector<64x64xbf16>
    %cst = arith.constant dense<0.000000e+00> : vector<64x192xf32>
    %28 = tpu.matmul %27, %10, %cst {dimension_numbers = #tpu.dot_dimension_numbers<[1], [0], [0], [1], [0, 0, 1, 1], [], []>} : vector<64x64xbf16>, vector<64x192xbf16>, vector<64x192xf32> -> vector<64x192xf32>
    %29 = vector.broadcast %11 : vector<1x192xf32> to vector<64x192xf32>
    %30 = arith.addf %28, %29 : vector<64x192xf32>
    %31 = vector.extract_strided_slice %30 {offsets = [0, 64], sizes = [64, 64], strides = [1, 1]} : vector<64x192xf32> to vector<64x64xf32>
    %32 = arith.truncf %31 : vector<64x64xf32> to vector<64x64xbf16>
    %33 = vector.extract_strided_slice %30 {offsets = [0, 128], sizes = [64, 64], strides = [1, 1]} : vector<64x192xf32> to vector<64x64xf32>
    %34 = arith.truncf %33 : vector<64x64xf32> to vector<64x64xbf16>
    %cst_24 = arith.constant dense<0.000000e+00> : vector<64x256xf32>
    %35 = tpu.matmul %34, %13, %cst_24 {dimension_numbers = #tpu.dot_dimension_numbers<[1], [0], [0], [1], [0, 0, 1, 1], [], []>} : vector<64x64xbf16>, vector<64x256xbf16>, vector<64x256xf32> -> vector<64x256xf32>
    %36 = arith.truncf %35 : vector<64x256xf32> to vector<64x256xbf16>
    %37 = vector.extract_strided_slice %30 {offsets = [0, 0], sizes = [64, 64], strides = [1, 1]} : vector<64x192xf32> to vector<64x64xf32>
    %38 = arith.truncf %37 : vector<64x64xf32> to vector<64x64xbf16>
    %cst_25 = arith.constant 0.000000e+00 : f32
    %39 = vector.broadcast %cst_25 : f32 to vector<64x64xf32>
    %40 = vector.extract_strided_slice %38 {offsets = [0, 0], sizes = [64, 16], strides = [1, 1]} : vector<64x64xbf16> to vector<64x16xbf16>
    %41 = vector.extract_strided_slice %32 {offsets = [0, 0], sizes = [64, 16], strides = [1, 1]} : vector<64x64xbf16> to vector<64x16xbf16>
    %cst_26 = arith.constant dense<0.000000e+00> : vector<64x64xf32>
    %42 = tpu.matmul %40, %41, %cst_26 {dimension_numbers = #tpu.dot_dimension_numbers<[1], [1], [0], [0], [0, 0, 1, 0], [], []>} : vector<64x16xbf16>, vector<64x16xbf16>, vector<64x64xf32> -> vector<64x64xf32>
    %cst_27 = arith.constant dense<0xFF800000> : vector<64xf32>
    %43 = vector.multi_reduction <maximumf>, %42, %cst_27 [1] : vector<64x64xf32> to vector<64xf32>
    %44 = vector.shape_cast %43 : vector<64xf32> to vector<64x1xf32>
    %45 = vector.broadcast %44 : vector<64x1xf32> to vector<64x64xf32>
    %46 = arith.subf %42, %45 : vector<64x64xf32>
    %47 = math.exp %46 : vector<64x64xf32>
    %cst_28 = arith.constant dense<0.000000e+00> : vector<64xf32>
    %48 = vector.multi_reduction <add>, %47, %cst_28 [1] : vector<64x64xf32> to vector<64xf32>
    %49 = vector.shape_cast %48 : vector<64xf32> to vector<64x1xf32>
    %50 = arith.truncf %47 : vector<64x64xf32> to vector<64x64xbf16>
    %51 = vector.extract_strided_slice %36 {offsets = [0, 0], sizes = [64, 64], strides = [1, 1]} : vector<64x256xbf16> to vector<64x64xbf16>
    %cst_29 = arith.constant dense<0.000000e+00> : vector<64x64xf32>
    %52 = tpu.matmul %50, %51, %cst_29 {dimension_numbers = #tpu.dot_dimension_numbers<[1], [0], [0], [1], [0, 0, 1, 1], [], []>} : vector<64x64xbf16>, vector<64x64xbf16>, vector<64x64xf32> -> vector<64x64xf32>
    %53 = tpu.reciprocal %49 {approx = true} : vector<64x1xf32> -> vector<64x1xf32>
    %54 = vector.broadcast %53 : vector<64x1xf32> to vector<64x64xf32>
    %55 = arith.mulf %52, %54 : vector<64x64xf32>
    %56 = arith.addf %39, %55 : vector<64x64xf32>
    %57 = vector.extract_strided_slice %38 {offsets = [0, 16], sizes = [64, 16], strides = [1, 1]} : vector<64x64xbf16> to vector<64x16xbf16>
    %58 = vector.extract_strided_slice %32 {offsets = [0, 16], sizes = [64, 16], strides = [1, 1]} : vector<64x64xbf16> to vector<64x16xbf16>
    %cst_30 = arith.constant dense<0.000000e+00> : vector<64x64xf32>
    %59 = tpu.matmul %57, %58, %cst_30 {dimension_numbers = #tpu.dot_dimension_numbers<[1], [1], [0], [0], [0, 0, 1, 0], [], []>} : vector<64x16xbf16>, vector<64x16xbf16>, vector<64x64xf32> -> vector<64x64xf32>
    %cst_31 = arith.constant dense<0xFF800000> : vector<64xf32>
    %60 = vector.multi_reduction <maximumf>, %59, %cst_31 [1] : vector<64x64xf32> to vector<64xf32>
    %61 = vector.shape_cast %60 : vector<64xf32> to vector<64x1xf32>
    %62 = vector.broadcast %61 : vector<64x1xf32> to vector<64x64xf32>
    %63 = arith.subf %59, %62 : vector<64x64xf32>
    %64 = math.exp %63 : vector<64x64xf32>
    %cst_32 = arith.constant dense<0.000000e+00> : vector<64xf32>
    %65 = vector.multi_reduction <add>, %64, %cst_32 [1] : vector<64x64xf32> to vector<64xf32>
    %66 = vector.shape_cast %65 : vector<64xf32> to vector<64x1xf32>
    %67 = arith.truncf %64 : vector<64x64xf32> to vector<64x64xbf16>
    %68 = vector.extract_strided_slice %36 {offsets = [0, 64], sizes = [64, 64], strides = [1, 1]} : vector<64x256xbf16> to vector<64x64xbf16>
    %cst_33 = arith.constant dense<0.000000e+00> : vector<64x64xf32>
    %69 = tpu.matmul %67, %68, %cst_33 {dimension_numbers = #tpu.dot_dimension_numbers<[1], [0], [0], [1], [0, 0, 1, 1], [], []>} : vector<64x64xbf16>, vector<64x64xbf16>, vector<64x64xf32> -> vector<64x64xf32>
    %70 = tpu.reciprocal %66 {approx = true} : vector<64x1xf32> -> vector<64x1xf32>
    %71 = vector.broadcast %70 : vector<64x1xf32> to vector<64x64xf32>
    %72 = arith.mulf %69, %71 : vector<64x64xf32>
    %73 = arith.addf %56, %72 : vector<64x64xf32>
    %74 = vector.extract_strided_slice %38 {offsets = [0, 32], sizes = [64, 16], strides = [1, 1]} : vector<64x64xbf16> to vector<64x16xbf16>
    %75 = vector.extract_strided_slice %32 {offsets = [0, 32], sizes = [64, 16], strides = [1, 1]} : vector<64x64xbf16> to vector<64x16xbf16>
    %cst_34 = arith.constant dense<0.000000e+00> : vector<64x64xf32>
    %76 = tpu.matmul %74, %75, %cst_34 {dimension_numbers = #tpu.dot_dimension_numbers<[1], [1], [0], [0], [0, 0, 1, 0], [], []>} : vector<64x16xbf16>, vector<64x16xbf16>, vector<64x64xf32> -> vector<64x64xf32>
    %cst_35 = arith.constant dense<0xFF800000> : vector<64xf32>
    %77 = vector.multi_reduction <maximumf>, %76, %cst_35 [1] : vector<64x64xf32> to vector<64xf32>
    %78 = vector.shape_cast %77 : vector<64xf32> to vector<64x1xf32>
    %79 = vector.broadcast %78 : vector<64x1xf32> to vector<64x64xf32>
    %80 = arith.subf %76, %79 : vector<64x64xf32>
    %81 = math.exp %80 : vector<64x64xf32>
    %cst_36 = arith.constant dense<0.000000e+00> : vector<64xf32>
    %82 = vector.multi_reduction <add>, %81, %cst_36 [1] : vector<64x64xf32> to vector<64xf32>
    %83 = vector.shape_cast %82 : vector<64xf32> to vector<64x1xf32>
    %84 = arith.truncf %81 : vector<64x64xf32> to vector<64x64xbf16>
    %85 = vector.extract_strided_slice %36 {offsets = [0, 128], sizes = [64, 64], strides = [1, 1]} : vector<64x256xbf16> to vector<64x64xbf16>
    %cst_37 = arith.constant dense<0.000000e+00> : vector<64x64xf32>
    %86 = tpu.matmul %84, %85, %cst_37 {dimension_numbers = #tpu.dot_dimension_numbers<[1], [0], [0], [1], [0, 0, 1, 1], [], []>} : vector<64x64xbf16>, vector<64x64xbf16>, vector<64x64xf32> -> vector<64x64xf32>
    %87 = tpu.reciprocal %83 {approx = true} : vector<64x1xf32> -> vector<64x1xf32>
    %88 = vector.broadcast %87 : vector<64x1xf32> to vector<64x64xf32>
    %89 = arith.mulf %86, %88 : vector<64x64xf32>
    %90 = arith.addf %73, %89 : vector<64x64xf32>
    %91 = vector.extract_strided_slice %38 {offsets = [0, 48], sizes = [64, 16], strides = [1, 1]} : vector<64x64xbf16> to vector<64x16xbf16>
    %92 = vector.extract_strided_slice %32 {offsets = [0, 48], sizes = [64, 16], strides = [1, 1]} : vector<64x64xbf16> to vector<64x16xbf16>
    %cst_38 = arith.constant dense<0.000000e+00> : vector<64x64xf32>
    %93 = tpu.matmul %91, %92, %cst_38 {dimension_numbers = #tpu.dot_dimension_numbers<[1], [1], [0], [0], [0, 0, 1, 0], [], []>} : vector<64x16xbf16>, vector<64x16xbf16>, vector<64x64xf32> -> vector<64x64xf32>
    %cst_39 = arith.constant dense<0xFF800000> : vector<64xf32>
    %94 = vector.multi_reduction <maximumf>, %93, %cst_39 [1] : vector<64x64xf32> to vector<64xf32>
    %95 = vector.shape_cast %94 : vector<64xf32> to vector<64x1xf32>
    %96 = vector.broadcast %95 : vector<64x1xf32> to vector<64x64xf32>
    %97 = arith.subf %93, %96 : vector<64x64xf32>
    %98 = math.exp %97 : vector<64x64xf32>
    %cst_40 = arith.constant dense<0.000000e+00> : vector<64xf32>
    %99 = vector.multi_reduction <add>, %98, %cst_40 [1] : vector<64x64xf32> to vector<64xf32>
    %100 = vector.shape_cast %99 : vector<64xf32> to vector<64x1xf32>
    %101 = arith.truncf %98 : vector<64x64xf32> to vector<64x64xbf16>
    %102 = vector.extract_strided_slice %36 {offsets = [0, 192], sizes = [64, 64], strides = [1, 1]} : vector<64x256xbf16> to vector<64x64xbf16>
    %cst_41 = arith.constant dense<0.000000e+00> : vector<64x64xf32>
    %103 = tpu.matmul %101, %102, %cst_41 {dimension_numbers = #tpu.dot_dimension_numbers<[1], [0], [0], [1], [0, 0, 1, 1], [], []>} : vector<64x64xbf16>, vector<64x64xbf16>, vector<64x64xf32> -> vector<64x64xf32>
    %104 = tpu.reciprocal %100 {approx = true} : vector<64x1xf32> -> vector<64x1xf32>
    %105 = vector.broadcast %104 : vector<64x1xf32> to vector<64x64xf32>
    %106 = arith.mulf %103, %105 : vector<64x64xf32>
    %107 = arith.addf %90, %106 : vector<64x64xf32>
    %108 = vector.broadcast %16 : vector<1x64xf32> to vector<64x64xf32>
    %109 = arith.addf %107, %108 : vector<64x64xf32>
    %110 = arith.addf %8, %109 : vector<64x64xf32>
    %cst_42 = arith.constant dense<0.000000e+00> : vector<64xf32>
    %111 = vector.multi_reduction <add>, %110, %cst_42 [1] : vector<64x64xf32> to vector<64xf32>
    %112 = vector.shape_cast %111 : vector<64xf32> to vector<64x1xf32>
    %cst_43 = arith.constant 6.400000e+01 : f32
    %113 = vector.broadcast %cst_43 : f32 to vector<64x1xf32>
    %114 = arith.divf %112, %113 : vector<64x1xf32>
    %115 = vector.broadcast %114 : vector<64x1xf32> to vector<64x64xf32>
    %116 = arith.subf %110, %115 : vector<64x64xf32>
    %117 = arith.mulf %116, %116 : vector<64x64xf32>
    %cst_44 = arith.constant dense<0.000000e+00> : vector<64xf32>
    %118 = vector.multi_reduction <add>, %117, %cst_44 [1] : vector<64x64xf32> to vector<64xf32>
    %119 = vector.shape_cast %118 : vector<64xf32> to vector<64x1xf32>
    %cst_45 = arith.constant 6.400000e+01 : f32
    %120 = vector.broadcast %cst_45 : f32 to vector<64x1xf32>
    %121 = arith.divf %119, %120 : vector<64x1xf32>
    %122 = vector.broadcast %114 : vector<64x1xf32> to vector<64x64xf32>
    %123 = arith.subf %110, %122 : vector<64x64xf32>
    %cst_46 = arith.constant 9.99999974E-6 : f32
    %124 = vector.broadcast %cst_46 : f32 to vector<64x1xf32>
    %125 = arith.addf %121, %124 : vector<64x1xf32>
    %126 = math.rsqrt %125 : vector<64x1xf32>
    %127 = vector.broadcast %126 : vector<64x1xf32> to vector<64x64xf32>
    %128 = arith.mulf %123, %127 : vector<64x64xf32>
    %129 = vector.broadcast %17 : vector<1x64xf32> to vector<64x64xf32>
    %130 = arith.mulf %128, %129 : vector<64x64xf32>
    %131 = vector.broadcast %18 : vector<1x64xf32> to vector<64x64xf32>
    %132 = arith.addf %130, %131 : vector<64x64xf32>
    %133 = arith.truncf %132 : vector<64x64xf32> to vector<64x64xbf16>
    %cst_47 = arith.constant dense<0.000000e+00> : vector<64x256xf32>
    %134 = tpu.matmul %133, %23, %cst_47 {dimension_numbers = #tpu.dot_dimension_numbers<[1], [0], [0], [1], [0, 0, 1, 1], [], []>} : vector<64x64xbf16>, vector<64x256xbf16>, vector<64x256xf32> -> vector<64x256xf32>
    %135 = vector.broadcast %24 : vector<1x256xf32> to vector<64x256xf32>
    %136 = arith.addf %134, %135 : vector<64x256xf32>
    %cst_48 = arith.constant 0.000000e+00 : f32
    %137 = vector.broadcast %cst_48 : f32 to vector<64x256xf32>
    %138 = arith.maximumf %136, %137 : vector<64x256xf32>
    %139 = arith.truncf %138 : vector<64x256xf32> to vector<64x256xbf16>
    %cst_49 = arith.constant dense<0.000000e+00> : vector<64x64xf32>
    %140 = tpu.matmul %139, %26, %cst_49 {dimension_numbers = #tpu.dot_dimension_numbers<[1], [0], [0], [1], [0, 0, 1, 1], [], []>} : vector<64x256xbf16>, vector<256x64xbf16>, vector<64x64xf32> -> vector<64x64xf32>
    %141 = vector.broadcast %19 : vector<1x64xf32> to vector<64x64xf32>
    %142 = arith.addf %140, %141 : vector<64x64xf32>
    %143 = arith.addf %132, %142 : vector<64x64xf32>
    %cst_50 = arith.constant dense<0.000000e+00> : vector<64xf32>
    %144 = vector.multi_reduction <add>, %143, %cst_50 [1] : vector<64x64xf32> to vector<64xf32>
    %145 = vector.shape_cast %144 : vector<64xf32> to vector<64x1xf32>
    %cst_51 = arith.constant 6.400000e+01 : f32
    %146 = vector.broadcast %cst_51 : f32 to vector<64x1xf32>
    %147 = arith.divf %145, %146 : vector<64x1xf32>
    %148 = vector.broadcast %147 : vector<64x1xf32> to vector<64x64xf32>
    %149 = arith.subf %143, %148 : vector<64x64xf32>
    %150 = arith.mulf %149, %149 : vector<64x64xf32>
    %cst_52 = arith.constant dense<0.000000e+00> : vector<64xf32>
    %151 = vector.multi_reduction <add>, %150, %cst_52 [1] : vector<64x64xf32> to vector<64xf32>
    %152 = vector.shape_cast %151 : vector<64xf32> to vector<64x1xf32>
    %cst_53 = arith.constant 6.400000e+01 : f32
    %153 = vector.broadcast %cst_53 : f32 to vector<64x1xf32>
    %154 = arith.divf %152, %153 : vector<64x1xf32>
    %155 = vector.broadcast %147 : vector<64x1xf32> to vector<64x64xf32>
    %156 = arith.subf %143, %155 : vector<64x64xf32>
    %cst_54 = arith.constant 9.99999974E-6 : f32
    %157 = vector.broadcast %cst_54 : f32 to vector<64x1xf32>
    %158 = arith.addf %154, %157 : vector<64x1xf32>
    %159 = math.rsqrt %158 : vector<64x1xf32>
    %160 = vector.broadcast %159 : vector<64x1xf32> to vector<64x64xf32>
    %161 = arith.mulf %156, %160 : vector<64x64xf32>
    %162 = vector.broadcast %20 : vector<1x64xf32> to vector<64x64xf32>
    %163 = arith.mulf %161, %162 : vector<64x64xf32>
    %164 = vector.broadcast %21 : vector<1x64xf32> to vector<64x64xf32>
    %165 = arith.addf %163, %164 : vector<64x64xf32>
    %c1_55 = arith.constant 1 : index
    %c0_56 = arith.constant 0 : index
    %c0_57 = arith.constant 0 : index
    %166 = vector.load %arg3[%c1_55, %c0_56, %c0_57] : memref<2x64x192xbf16, #tpu.memory_space<vmem>>, vector<1x64x192xbf16>
    %167 = vector.shape_cast %166 : vector<1x64x192xbf16> to vector<64x192xbf16>
    %c1_58 = arith.constant 1 : index
    %c0_59 = arith.constant 0 : index
    %168 = vector.load %arg4[%c1_58, %c0_59] : memref<2x192xf32, #tpu.memory_space<vmem>>, vector<1x192xf32>
    %c1_60 = arith.constant 1 : index
    %c0_61 = arith.constant 0 : index
    %c0_62 = arith.constant 0 : index
    %169 = vector.load %arg5[%c1_60, %c0_61, %c0_62] : memref<2x64x256xbf16, #tpu.memory_space<vmem>>, vector<1x64x256xbf16>
    %170 = vector.shape_cast %169 : vector<1x64x256xbf16> to vector<64x256xbf16>
    %c1_63 = arith.constant 1 : index
    %c0_64 = arith.constant 0 : index
    %c0_65 = arith.constant 0 : index
    %171 = vector.load %arg6[%c1_63, %c0_64, %c0_65] : memref<2x6x64xf32, #tpu.memory_space<vmem>>, vector<1x6x64xf32>
    %172 = vector.shape_cast %171 : vector<1x6x64xf32> to vector<6x64xf32>
    %173 = vector.extract_strided_slice %172 {offsets = [0, 0], sizes = [1, 64], strides = [1, 1]} : vector<6x64xf32> to vector<1x64xf32>
    %174 = vector.extract_strided_slice %172 {offsets = [1, 0], sizes = [1, 64], strides = [1, 1]} : vector<6x64xf32> to vector<1x64xf32>
    %175 = vector.extract_strided_slice %172 {offsets = [2, 0], sizes = [1, 64], strides = [1, 1]} : vector<6x64xf32> to vector<1x64xf32>
    %176 = vector.extract_strided_slice %172 {offsets = [3, 0], sizes = [1, 64], strides = [1, 1]} : vector<6x64xf32> to vector<1x64xf32>
    %177 = vector.extract_strided_slice %172 {offsets = [4, 0], sizes = [1, 64], strides = [1, 1]} : vector<6x64xf32> to vector<1x64xf32>
    %178 = vector.extract_strided_slice %172 {offsets = [5, 0], sizes = [1, 64], strides = [1, 1]} : vector<6x64xf32> to vector<1x64xf32>
    %c1_66 = arith.constant 1 : index
    %c0_67 = arith.constant 0 : index
    %c0_68 = arith.constant 0 : index
    %179 = vector.load %arg7[%c1_66, %c0_67, %c0_68] : memref<2x64x256xbf16, #tpu.memory_space<vmem>>, vector<1x64x256xbf16>
    %180 = vector.shape_cast %179 : vector<1x64x256xbf16> to vector<64x256xbf16>
    %c1_69 = arith.constant 1 : index
    %c0_70 = arith.constant 0 : index
    %181 = vector.load %arg8[%c1_69, %c0_70] : memref<2x256xf32, #tpu.memory_space<vmem>>, vector<1x256xf32>
    %c1_71 = arith.constant 1 : index
    %c0_72 = arith.constant 0 : index
    %c0_73 = arith.constant 0 : index
    %182 = vector.load %arg9[%c1_71, %c0_72, %c0_73] : memref<2x256x64xbf16, #tpu.memory_space<vmem>>, vector<1x256x64xbf16>
    %183 = vector.shape_cast %182 : vector<1x256x64xbf16> to vector<256x64xbf16>
    %184 = arith.truncf %165 : vector<64x64xf32> to vector<64x64xbf16>
    %cst_74 = arith.constant dense<0.000000e+00> : vector<64x192xf32>
    %185 = tpu.matmul %184, %167, %cst_74 {dimension_numbers = #tpu.dot_dimension_numbers<[1], [0], [0], [1], [0, 0, 1, 1], [], []>} : vector<64x64xbf16>, vector<64x192xbf16>, vector<64x192xf32> -> vector<64x192xf32>
    %186 = vector.broadcast %168 : vector<1x192xf32> to vector<64x192xf32>
    %187 = arith.addf %185, %186 : vector<64x192xf32>
    %188 = vector.extract_strided_slice %187 {offsets = [0, 64], sizes = [64, 64], strides = [1, 1]} : vector<64x192xf32> to vector<64x64xf32>
    %189 = arith.truncf %188 : vector<64x64xf32> to vector<64x64xbf16>
    %190 = vector.extract_strided_slice %187 {offsets = [0, 128], sizes = [64, 64], strides = [1, 1]} : vector<64x192xf32> to vector<64x64xf32>
    %191 = arith.truncf %190 : vector<64x64xf32> to vector<64x64xbf16>
    %cst_75 = arith.constant dense<0.000000e+00> : vector<64x256xf32>
    %192 = tpu.matmul %191, %170, %cst_75 {dimension_numbers = #tpu.dot_dimension_numbers<[1], [0], [0], [1], [0, 0, 1, 1], [], []>} : vector<64x64xbf16>, vector<64x256xbf16>, vector<64x256xf32> -> vector<64x256xf32>
    %193 = arith.truncf %192 : vector<64x256xf32> to vector<64x256xbf16>
    %194 = vector.extract_strided_slice %187 {offsets = [0, 0], sizes = [64, 64], strides = [1, 1]} : vector<64x192xf32> to vector<64x64xf32>
    %195 = arith.truncf %194 : vector<64x64xf32> to vector<64x64xbf16>
    %cst_76 = arith.constant 0.000000e+00 : f32
    %196 = vector.broadcast %cst_76 : f32 to vector<64x64xf32>
    %197 = vector.extract_strided_slice %195 {offsets = [0, 0], sizes = [64, 16], strides = [1, 1]} : vector<64x64xbf16> to vector<64x16xbf16>
    %198 = vector.extract_strided_slice %189 {offsets = [0, 0], sizes = [64, 16], strides = [1, 1]} : vector<64x64xbf16> to vector<64x16xbf16>
    %cst_77 = arith.constant dense<0.000000e+00> : vector<64x64xf32>
    %199 = tpu.matmul %197, %198, %cst_77 {dimension_numbers = #tpu.dot_dimension_numbers<[1], [1], [0], [0], [0, 0, 1, 0], [], []>} : vector<64x16xbf16>, vector<64x16xbf16>, vector<64x64xf32> -> vector<64x64xf32>
    %cst_78 = arith.constant dense<0xFF800000> : vector<64xf32>
    %200 = vector.multi_reduction <maximumf>, %199, %cst_78 [1] : vector<64x64xf32> to vector<64xf32>
    %201 = vector.shape_cast %200 : vector<64xf32> to vector<64x1xf32>
    %202 = vector.broadcast %201 : vector<64x1xf32> to vector<64x64xf32>
    %203 = arith.subf %199, %202 : vector<64x64xf32>
    %204 = math.exp %203 : vector<64x64xf32>
    %cst_79 = arith.constant dense<0.000000e+00> : vector<64xf32>
    %205 = vector.multi_reduction <add>, %204, %cst_79 [1] : vector<64x64xf32> to vector<64xf32>
    %206 = vector.shape_cast %205 : vector<64xf32> to vector<64x1xf32>
    %207 = arith.truncf %204 : vector<64x64xf32> to vector<64x64xbf16>
    %208 = vector.extract_strided_slice %193 {offsets = [0, 0], sizes = [64, 64], strides = [1, 1]} : vector<64x256xbf16> to vector<64x64xbf16>
    %cst_80 = arith.constant dense<0.000000e+00> : vector<64x64xf32>
    %209 = tpu.matmul %207, %208, %cst_80 {dimension_numbers = #tpu.dot_dimension_numbers<[1], [0], [0], [1], [0, 0, 1, 1], [], []>} : vector<64x64xbf16>, vector<64x64xbf16>, vector<64x64xf32> -> vector<64x64xf32>
    %210 = tpu.reciprocal %206 {approx = true} : vector<64x1xf32> -> vector<64x1xf32>
    %211 = vector.broadcast %210 : vector<64x1xf32> to vector<64x64xf32>
    %212 = arith.mulf %209, %211 : vector<64x64xf32>
    %213 = arith.addf %196, %212 : vector<64x64xf32>
    %214 = vector.extract_strided_slice %195 {offsets = [0, 16], sizes = [64, 16], strides = [1, 1]} : vector<64x64xbf16> to vector<64x16xbf16>
    %215 = vector.extract_strided_slice %189 {offsets = [0, 16], sizes = [64, 16], strides = [1, 1]} : vector<64x64xbf16> to vector<64x16xbf16>
    %cst_81 = arith.constant dense<0.000000e+00> : vector<64x64xf32>
    %216 = tpu.matmul %214, %215, %cst_81 {dimension_numbers = #tpu.dot_dimension_numbers<[1], [1], [0], [0], [0, 0, 1, 0], [], []>} : vector<64x16xbf16>, vector<64x16xbf16>, vector<64x64xf32> -> vector<64x64xf32>
    %cst_82 = arith.constant dense<0xFF800000> : vector<64xf32>
    %217 = vector.multi_reduction <maximumf>, %216, %cst_82 [1] : vector<64x64xf32> to vector<64xf32>
    %218 = vector.shape_cast %217 : vector<64xf32> to vector<64x1xf32>
    %219 = vector.broadcast %218 : vector<64x1xf32> to vector<64x64xf32>
    %220 = arith.subf %216, %219 : vector<64x64xf32>
    %221 = math.exp %220 : vector<64x64xf32>
    %cst_83 = arith.constant dense<0.000000e+00> : vector<64xf32>
    %222 = vector.multi_reduction <add>, %221, %cst_83 [1] : vector<64x64xf32> to vector<64xf32>
    %223 = vector.shape_cast %222 : vector<64xf32> to vector<64x1xf32>
    %224 = arith.truncf %221 : vector<64x64xf32> to vector<64x64xbf16>
    %225 = vector.extract_strided_slice %193 {offsets = [0, 64], sizes = [64, 64], strides = [1, 1]} : vector<64x256xbf16> to vector<64x64xbf16>
    %cst_84 = arith.constant dense<0.000000e+00> : vector<64x64xf32>
    %226 = tpu.matmul %224, %225, %cst_84 {dimension_numbers = #tpu.dot_dimension_numbers<[1], [0], [0], [1], [0, 0, 1, 1], [], []>} : vector<64x64xbf16>, vector<64x64xbf16>, vector<64x64xf32> -> vector<64x64xf32>
    %227 = tpu.reciprocal %223 {approx = true} : vector<64x1xf32> -> vector<64x1xf32>
    %228 = vector.broadcast %227 : vector<64x1xf32> to vector<64x64xf32>
    %229 = arith.mulf %226, %228 : vector<64x64xf32>
    %230 = arith.addf %213, %229 : vector<64x64xf32>
    %231 = vector.extract_strided_slice %195 {offsets = [0, 32], sizes = [64, 16], strides = [1, 1]} : vector<64x64xbf16> to vector<64x16xbf16>
    %232 = vector.extract_strided_slice %189 {offsets = [0, 32], sizes = [64, 16], strides = [1, 1]} : vector<64x64xbf16> to vector<64x16xbf16>
    %cst_85 = arith.constant dense<0.000000e+00> : vector<64x64xf32>
    %233 = tpu.matmul %231, %232, %cst_85 {dimension_numbers = #tpu.dot_dimension_numbers<[1], [1], [0], [0], [0, 0, 1, 0], [], []>} : vector<64x16xbf16>, vector<64x16xbf16>, vector<64x64xf32> -> vector<64x64xf32>
    %cst_86 = arith.constant dense<0xFF800000> : vector<64xf32>
    %234 = vector.multi_reduction <maximumf>, %233, %cst_86 [1] : vector<64x64xf32> to vector<64xf32>
    %235 = vector.shape_cast %234 : vector<64xf32> to vector<64x1xf32>
    %236 = vector.broadcast %235 : vector<64x1xf32> to vector<64x64xf32>
    %237 = arith.subf %233, %236 : vector<64x64xf32>
    %238 = math.exp %237 : vector<64x64xf32>
    %cst_87 = arith.constant dense<0.000000e+00> : vector<64xf32>
    %239 = vector.multi_reduction <add>, %238, %cst_87 [1] : vector<64x64xf32> to vector<64xf32>
    %240 = vector.shape_cast %239 : vector<64xf32> to vector<64x1xf32>
    %241 = arith.truncf %238 : vector<64x64xf32> to vector<64x64xbf16>
    %242 = vector.extract_strided_slice %193 {offsets = [0, 128], sizes = [64, 64], strides = [1, 1]} : vector<64x256xbf16> to vector<64x64xbf16>
    %cst_88 = arith.constant dense<0.000000e+00> : vector<64x64xf32>
    %243 = tpu.matmul %241, %242, %cst_88 {dimension_numbers = #tpu.dot_dimension_numbers<[1], [0], [0], [1], [0, 0, 1, 1], [], []>} : vector<64x64xbf16>, vector<64x64xbf16>, vector<64x64xf32> -> vector<64x64xf32>
    %244 = tpu.reciprocal %240 {approx = true} : vector<64x1xf32> -> vector<64x1xf32>
    %245 = vector.broadcast %244 : vector<64x1xf32> to vector<64x64xf32>
    %246 = arith.mulf %243, %245 : vector<64x64xf32>
    %247 = arith.addf %230, %246 : vector<64x64xf32>
    %248 = vector.extract_strided_slice %195 {offsets = [0, 48], sizes = [64, 16], strides = [1, 1]} : vector<64x64xbf16> to vector<64x16xbf16>
    %249 = vector.extract_strided_slice %189 {offsets = [0, 48], sizes = [64, 16], strides = [1, 1]} : vector<64x64xbf16> to vector<64x16xbf16>
    %cst_89 = arith.constant dense<0.000000e+00> : vector<64x64xf32>
    %250 = tpu.matmul %248, %249, %cst_89 {dimension_numbers = #tpu.dot_dimension_numbers<[1], [1], [0], [0], [0, 0, 1, 0], [], []>} : vector<64x16xbf16>, vector<64x16xbf16>, vector<64x64xf32> -> vector<64x64xf32>
    %cst_90 = arith.constant dense<0xFF800000> : vector<64xf32>
    %251 = vector.multi_reduction <maximumf>, %250, %cst_90 [1] : vector<64x64xf32> to vector<64xf32>
    %252 = vector.shape_cast %251 : vector<64xf32> to vector<64x1xf32>
    %253 = vector.broadcast %252 : vector<64x1xf32> to vector<64x64xf32>
    %254 = arith.subf %250, %253 : vector<64x64xf32>
    %255 = math.exp %254 : vector<64x64xf32>
    %cst_91 = arith.constant dense<0.000000e+00> : vector<64xf32>
    %256 = vector.multi_reduction <add>, %255, %cst_91 [1] : vector<64x64xf32> to vector<64xf32>
    %257 = vector.shape_cast %256 : vector<64xf32> to vector<64x1xf32>
    %258 = arith.truncf %255 : vector<64x64xf32> to vector<64x64xbf16>
    %259 = vector.extract_strided_slice %193 {offsets = [0, 192], sizes = [64, 64], strides = [1, 1]} : vector<64x256xbf16> to vector<64x64xbf16>
    %cst_92 = arith.constant dense<0.000000e+00> : vector<64x64xf32>
    %260 = tpu.matmul %258, %259, %cst_92 {dimension_numbers = #tpu.dot_dimension_numbers<[1], [0], [0], [1], [0, 0, 1, 1], [], []>} : vector<64x64xbf16>, vector<64x64xbf16>, vector<64x64xf32> -> vector<64x64xf32>
    %261 = tpu.reciprocal %257 {approx = true} : vector<64x1xf32> -> vector<64x1xf32>
    %262 = vector.broadcast %261 : vector<64x1xf32> to vector<64x64xf32>
    %263 = arith.mulf %260, %262 : vector<64x64xf32>
    %264 = arith.addf %247, %263 : vector<64x64xf32>
    %265 = vector.broadcast %173 : vector<1x64xf32> to vector<64x64xf32>
    %266 = arith.addf %264, %265 : vector<64x64xf32>
    %267 = arith.addf %165, %266 : vector<64x64xf32>
    %cst_93 = arith.constant dense<0.000000e+00> : vector<64xf32>
    %268 = vector.multi_reduction <add>, %267, %cst_93 [1] : vector<64x64xf32> to vector<64xf32>
    %269 = vector.shape_cast %268 : vector<64xf32> to vector<64x1xf32>
    %cst_94 = arith.constant 6.400000e+01 : f32
    %270 = vector.broadcast %cst_94 : f32 to vector<64x1xf32>
    %271 = arith.divf %269, %270 : vector<64x1xf32>
    %272 = vector.broadcast %271 : vector<64x1xf32> to vector<64x64xf32>
    %273 = arith.subf %267, %272 : vector<64x64xf32>
    %274 = arith.mulf %273, %273 : vector<64x64xf32>
    %cst_95 = arith.constant dense<0.000000e+00> : vector<64xf32>
    %275 = vector.multi_reduction <add>, %274, %cst_95 [1] : vector<64x64xf32> to vector<64xf32>
    %276 = vector.shape_cast %275 : vector<64xf32> to vector<64x1xf32>
    %cst_96 = arith.constant 6.400000e+01 : f32
    %277 = vector.broadcast %cst_96 : f32 to vector<64x1xf32>
    %278 = arith.divf %276, %277 : vector<64x1xf32>
    %279 = vector.broadcast %271 : vector<64x1xf32> to vector<64x64xf32>
    %280 = arith.subf %267, %279 : vector<64x64xf32>
    %cst_97 = arith.constant 9.99999974E-6 : f32
    %281 = vector.broadcast %cst_97 : f32 to vector<64x1xf32>
    %282 = arith.addf %278, %281 : vector<64x1xf32>
    %283 = math.rsqrt %282 : vector<64x1xf32>
    %284 = vector.broadcast %283 : vector<64x1xf32> to vector<64x64xf32>
    %285 = arith.mulf %280, %284 : vector<64x64xf32>
    %286 = vector.broadcast %174 : vector<1x64xf32> to vector<64x64xf32>
    %287 = arith.mulf %285, %286 : vector<64x64xf32>
    %288 = vector.broadcast %175 : vector<1x64xf32> to vector<64x64xf32>
    %289 = arith.addf %287, %288 : vector<64x64xf32>
    %290 = arith.truncf %289 : vector<64x64xf32> to vector<64x64xbf16>
    %cst_98 = arith.constant dense<0.000000e+00> : vector<64x256xf32>
    %291 = tpu.matmul %290, %180, %cst_98 {dimension_numbers = #tpu.dot_dimension_numbers<[1], [0], [0], [1], [0, 0, 1, 1], [], []>} : vector<64x64xbf16>, vector<64x256xbf16>, vector<64x256xf32> -> vector<64x256xf32>
    %292 = vector.broadcast %181 : vector<1x256xf32> to vector<64x256xf32>
    %293 = arith.addf %291, %292 : vector<64x256xf32>
    %cst_99 = arith.constant 0.000000e+00 : f32
    %294 = vector.broadcast %cst_99 : f32 to vector<64x256xf32>
    %295 = arith.maximumf %293, %294 : vector<64x256xf32>
    %296 = arith.truncf %295 : vector<64x256xf32> to vector<64x256xbf16>
    %cst_100 = arith.constant dense<0.000000e+00> : vector<64x64xf32>
    %297 = tpu.matmul %296, %183, %cst_100 {dimension_numbers = #tpu.dot_dimension_numbers<[1], [0], [0], [1], [0, 0, 1, 1], [], []>} : vector<64x256xbf16>, vector<256x64xbf16>, vector<64x64xf32> -> vector<64x64xf32>
    %298 = vector.broadcast %176 : vector<1x64xf32> to vector<64x64xf32>
    %299 = arith.addf %297, %298 : vector<64x64xf32>
    %300 = arith.addf %289, %299 : vector<64x64xf32>
    %cst_101 = arith.constant dense<0.000000e+00> : vector<64xf32>
    %301 = vector.multi_reduction <add>, %300, %cst_101 [1] : vector<64x64xf32> to vector<64xf32>
    %302 = vector.shape_cast %301 : vector<64xf32> to vector<64x1xf32>
    %cst_102 = arith.constant 6.400000e+01 : f32
    %303 = vector.broadcast %cst_102 : f32 to vector<64x1xf32>
    %304 = arith.divf %302, %303 : vector<64x1xf32>
    %305 = vector.broadcast %304 : vector<64x1xf32> to vector<64x64xf32>
    %306 = arith.subf %300, %305 : vector<64x64xf32>
    %307 = arith.mulf %306, %306 : vector<64x64xf32>
    %cst_103 = arith.constant dense<0.000000e+00> : vector<64xf32>
    %308 = vector.multi_reduction <add>, %307, %cst_103 [1] : vector<64x64xf32> to vector<64xf32>
    %309 = vector.shape_cast %308 : vector<64xf32> to vector<64x1xf32>
    %cst_104 = arith.constant 6.400000e+01 : f32
    %310 = vector.broadcast %cst_104 : f32 to vector<64x1xf32>
    %311 = arith.divf %309, %310 : vector<64x1xf32>
    %312 = vector.broadcast %304 : vector<64x1xf32> to vector<64x64xf32>
    %313 = arith.subf %300, %312 : vector<64x64xf32>
    %cst_105 = arith.constant 9.99999974E-6 : f32
    %314 = vector.broadcast %cst_105 : f32 to vector<64x1xf32>
    %315 = arith.addf %311, %314 : vector<64x1xf32>
    %316 = math.rsqrt %315 : vector<64x1xf32>
    %317 = vector.broadcast %316 : vector<64x1xf32> to vector<64x64xf32>
    %318 = arith.mulf %313, %317 : vector<64x64xf32>
    %319 = vector.broadcast %177 : vector<1x64xf32> to vector<64x64xf32>
    %320 = arith.mulf %318, %319 : vector<64x64xf32>
    %321 = vector.broadcast %178 : vector<1x64xf32> to vector<64x64xf32>
    %322 = arith.addf %320, %321 : vector<64x64xf32>
    %323 = arith.truncf %322 : vector<64x64xf32> to vector<64x64xbf16>
    %c0_106 = arith.constant 0 : index
    %c0_107 = arith.constant 0 : index
    %324 = vector.load %arg10[%c0_106, %c0_107] : memref<3x64xbf16, #tpu.memory_space<vmem>>, vector<3x64xbf16>
    %cst_108 = arith.constant dense<0.000000e+00> : vector<3x64xf32>
    %325 = tpu.matmul %324, %323, %cst_108 {dimension_numbers = #tpu.dot_dimension_numbers<[1], [1], [0], [0], [0, 0, 1, 0], [], []>} : vector<3x64xbf16>, vector<64x64xbf16>, vector<3x64xf32> -> vector<3x64xf32>
    %c0_109 = arith.constant 0 : index
    %c0_110 = arith.constant 0 : index
    %326 = vector.load %arg11[%c0_109, %c0_110] : memref<3x1xf32, #tpu.memory_space<vmem>>, vector<3x1xf32>
    %327 = vector.broadcast %326 : vector<3x1xf32> to vector<3x64xf32>
    %328 = arith.addf %325, %327 : vector<3x64xf32>
    %cst_111 = arith.constant 0.000000e+00 : f32
    %329 = vector.broadcast %cst_111 : f32 to vector<3x64xf32>
    %330 = arith.maximumf %328, %329 : vector<3x64xf32>
    %c0_112 = arith.constant 0 : index
    %c0_113 = arith.constant 0 : index
    %c0_114 = arith.constant 0 : index
    %331 = vector.load %arg12[%c0_112, %c0_113, %c0_114] : memref<1x3x64xf32, #tpu.memory_space<vmem>>, vector<1x3x64xf32>
    %332 = vector.shape_cast %331 : vector<1x3x64xf32> to vector<3x64xf32>
    %333 = vector.shape_cast %330 : vector<3x64xf32> to vector<1x3x64xf32>
    tpu.vector_store %arg12[%c0_112, %c0_113, %c0_114], %333 {strides = array<i32>} : memref<1x3x64xf32, #tpu.memory_space<vmem>>, vector<1x3x64xf32>,
    return
  }
  func.func @transform_0(%arg0: i32) -> (i32, i32, i32) {
    %c0_i32 = arith.constant 0 : i32
    %c0_i32_0 = arith.constant 0 : i32
    %c0_i32_1 = arith.constant 0 : i32
    return %arg0, %c0_i32, %c0_i32_0 : i32, i32, i32
  }
  func.func @transform_1(%arg0: i32) -> (i32, i32) {
    %c0_i32 = arith.constant 0 : i32
    %c0_i32_0 = arith.constant 0 : i32
    %c0_i32_1 = arith.constant 0 : i32
    return %c0_i32, %c0_i32_0 : i32, i32
  }
  func.func @transform_2(%arg0: i32) -> (i32, i32, i32) {
    %c0_i32 = arith.constant 0 : i32
    %c0_i32_0 = arith.constant 0 : i32
    %c0_i32_1 = arith.constant 0 : i32
    %c0_i32_2 = arith.constant 0 : i32
    return %c0_i32, %c0_i32_0, %c0_i32_1 : i32, i32, i32
  }
  func.func @transform_3(%arg0: i32) -> (i32, i32) {
    %c0_i32 = arith.constant 0 : i32
    %c0_i32_0 = arith.constant 0 : i32
    %c0_i32_1 = arith.constant 0 : i32
    return %c0_i32, %c0_i32_0 : i32, i32
  }
  func.func @transform_4(%arg0: i32) -> (i32, i32, i32) {
    %c0_i32 = arith.constant 0 : i32
    %c0_i32_0 = arith.constant 0 : i32
    %c0_i32_1 = arith.constant 0 : i32
    %c0_i32_2 = arith.constant 0 : i32
    return %c0_i32, %c0_i32_0, %c0_i32_1 : i32, i32, i32
  }
  func.func @transform_5(%arg0: i32) -> (i32, i32, i32) {
    %c0_i32 = arith.constant 0 : i32
    %c0_i32_0 = arith.constant 0 : i32
    %c0_i32_1 = arith.constant 0 : i32
    %c0_i32_2 = arith.constant 0 : i32
    return %c0_i32, %c0_i32_0, %c0_i32_1 : i32, i32, i32
  }
  func.func @transform_6(%arg0: i32) -> (i32, i32, i32) {
    %c0_i32 = arith.constant 0 : i32
    %c0_i32_0 = arith.constant 0 : i32
    %c0_i32_1 = arith.constant 0 : i32
    %c0_i32_2 = arith.constant 0 : i32
    return %c0_i32, %c0_i32_0, %c0_i32_1 : i32, i32, i32
  }
  func.func @transform_7(%arg0: i32) -> (i32, i32) {
    %c0_i32 = arith.constant 0 : i32
    %c0_i32_0 = arith.constant 0 : i32
    %c0_i32_1 = arith.constant 0 : i32
    return %c0_i32, %c0_i32_0 : i32, i32
  }
  func.func @transform_8(%arg0: i32) -> (i32, i32, i32) {
    %c0_i32 = arith.constant 0 : i32
    %c0_i32_0 = arith.constant 0 : i32
    %c0_i32_1 = arith.constant 0 : i32
    %c0_i32_2 = arith.constant 0 : i32
    return %c0_i32, %c0_i32_0, %c0_i32_1 : i32, i32, i32
  }
  func.func @transform_9(%arg0: i32) -> (i32, i32) {
    %c0_i32 = arith.constant 0 : i32
    %c0_i32_0 = arith.constant 0 : i32
    %c0_i32_1 = arith.constant 0 : i32
    return %c0_i32, %c0_i32_0 : i32, i32
  }
  func.func @transform_10(%arg0: i32) -> (i32, i32) {
    %c0_i32 = arith.constant 0 : i32
    %c0_i32_0 = arith.constant 0 : i32
    %c0_i32_1 = arith.constant 0 : i32
    return %c0_i32, %c0_i32_0 : i32, i32
  }
  func.func @transform_11(%arg0: i32) -> (i32, i32, i32) {
    %c0_i32 = arith.constant 0 : i32
    %c0_i32_0 = arith.constant 0 : i32
    %c0_i32_1 = arith.constant 0 : i32
    return %arg0, %c0_i32, %c0_i32_0 : i32, i32, i32
  }
}

</mosaic_0001>

<bundles_post_ra>
// kernel: point_cloud_transformer.1
= control target key start
LH: loop header
LB: loop body
LE: loop exit
PB: predicated region body
PF: predicated region fallthrough
CT: control target
= control target key end

     0   :  { %s5441_s17 = smov 0   ;;  %s7442_s0 = inlined_call_operand.vmem [shape: f32[2,64,1], index: 0, kind: input, shape index: {}]   ;;  %s7443_s1 = inlined_call_operand.vmem [shape: f32[2,64], index: 1, kind: input, shape index: {}]   ;;  %s7444_s2 = inlined_call_operand.vmem [shape: bf16[2,64,192], index: 2, kind: input, shape index: {}]   ;;  %s7445_s3 = inlined_call_operand.vmem [shape: f32[2,192], index: 3, kind: input, shape index: {}]   ;;  %s7446_s4 = inlined_call_operand.vmem [shape: bf16[2,64,256], index: 4, kind: input, shape index: {}]   ;;  %s7447_s5 = inlined_call_operand.vmem [shape: f32[2,6,64], index: 5, kind: input, shape index: {}]   ;;  %s7448_s6 = inlined_call_operand.vmem [shape: bf16[2,64,256], index: 6, kind: input, shape index: {}]   ;;  %s7449_s7 = inlined_call_operand.vmem [shape: f32[2,256], index: 7, kind: input, shape index: {}]   ;;  %s7450_s8 = inlined_call_operand.vmem [shape: bf16[2,256,64], index: 8, kind: input, shape index: {}]   ;;  %s7451_s9 = inlined_call_operand.vmem [shape: bf16[3,64], index: 9, kind: input, shape index: {}]   ;;  %s7452_s10 = inlined_call_operand.vmem [shape: f32[3,1], index: 10, kind: input, shape index: {}]   ;;  %s7453_s11 = inlined_call_operand.vmem [shape: f32[2,3,64], index: 11, kind: output, shape index: {}]  }
   0x1 LB: > { %s4435_s18 = sadd.s32 4294967295, %s5370_s17   ;;  %p4439_p0 = scmp.ge.s32.totalorder %s5370_s17, 1  ;;  %s5370_s17 = sphi %s5441_s17, %s21_s17  }
   0x2   : > { %p337_p1 = scmp.lt.s32.totalorder %s5370_s17, 3 }
   0x4   : > { %p338_p2 = pnand %p4439_p0, %p337_p1 }
   0x5   : > { %p376_p3 = scmp.lt.s32.totalorder (!%p338_p2), %s4435_s18, 1  ;;  %s5373_s25 = smov (!%p338_p2), 48  }
   0x6   : > { %341 = sbr.rel (%p338_p2) target bundleno = 3842 (0xf02), region = 64  ;;  %s5374_s26 = smov (!%p338_p2), 64  }
   0x7   : > { %s5376_s28 = smov (!%p338_p2), 32   ;;  %s5377_s29 = smov (!%p338_p2), 16  }
   0x8   : > { %s5379_s12 = smov (!%p338_p2), 96  }
   0xb   : > { %v4469_v0 = vld [vmem:[%s7444_s2 + $0x30] sm:$0xf]  ;;  %v4945_v1 = vld [vmem:[%s7444_s2 + $0x34] sm:$0xf0]  ;;  %v5372_v2 = vmov 0   ;;  %s7459_s18 = smov (!%p376_p3, %s4435_s18), 1 }
   0xc   : > { %5036 = vset.pattern.permute.xlu1 %v5372_v2  ;;  %5035 = vset.pattern.permute.xlu0 %v5372_v2  ;;  %v4470_v3 = vor.u32 %v4945_v1, %v4469_v0  ;;  %v4944_v4 = vld [vmem:[%s7444_s2 + $0x34] sm:$0xf]  ;;  %v4471_v5 = vld [vmem:[%s7444_s2 + $0x38] sm:$0xf0]  ;;  %s4937_s27 = sshll.u32 %s7459_s18, 6  ;;  %vm562_vm0 = vcmask 523264  }
   0xd   : > { %5037 = vset.pattern.permute.xlu2 %v5372_v2  ;;  %v4474_v6 = vor.u32 %v4944_v4, %v4471_v5  ;;  %s380_s30 = scalar_lea.vmem %s7442_s0, %s4937_s27  ;;  %v4461_v15 = vld [vmem:[%s7444_s2 + $0x20] sm:$0xf]  ;;  %v4943_v16 = vld [vmem:[%s7444_s2 + $0x24] sm:$0xf0]  ;;  %v4942_v17 = vld [vmem:[%s7444_s2 + $0x24] sm:$0xf] }
   0xe   : > { %579 = vmatpush.bf16.msra.mxu0 %v4470_v3  ;;  %v390_v7 = vld [vmem:[%s380_s30 + $0x10] sm:$0xff]  ;;  %v388_v8 = vld [vmem:[%s380_s30] sm:$0xff]  ;;  %v391_v10 = vld [vmem:[%s380_s30 + $0x18] sm:$0xff]  ;;  %v4462_v18 = vor.u32 %v4943_v16, %v4461_v15  ;;  %s5375_s27 = smov 112   ;;  %vm791_vm1 = vcmask 130048  }
   0xf   : > { %608 = vmatpush.bf16.msra.mxu1 %v4474_v6  ;;  %408 = vperm.xlu1 %5036, %v390_v7   ;;  %v392_v9 = vld [vmem:[%s380_s30 + $0x20] sm:$0xff]  ;;  %v389_v11 = vld [vmem:[%s380_s30 + $0x8] sm:$0xff]  ;;  %v395_v13 = vld [vmem:[%s380_s30 + $0x38] sm:$0xff] }
  0x10   : > { %398 = vperm.xlu0 %5035, %v388_v8   ;;  %418 = vperm.xlu2 %5037, %v392_v9   ;;  %v393_v12 = vld [vmem:[%s380_s30 + $0x28] sm:$0xff]  ;;  %v394_v14 = vld [vmem:[%s380_s30 + $0x30] sm:$0xff]  ;;  %v4941_v22 = vld [vmem:[%s7444_s2 + $0x14] sm:$0xf0]  ;;  %s5378_s30 = smov 80  }
  0x11   : > { %v4463_v19 = vld [vmem:[%s7444_s2 + $0x28] sm:$0xf0]  ;;  %v4453_v21 = vld [vmem:[%s7444_s2 + $0x10] sm:$0xf]  ;;  %v4940_v23 = vld [vmem:[%s7444_s2 + $0x14] sm:$0xf] }
  0x12   : > { %v4466_v20 = vor.u32 %v4942_v17, %v4463_v19  ;;  %580 = vmatpush.bf16.msra.mxu0 %v4462_v18  ;;  %v4454_v24 = vor.u32 %v4941_v22, %v4453_v21  ;;  %v4455_v25 = vld [vmem:[%s7444_s2 + $0x18] sm:$0xf0]  ;;  %v4445_v27 = vld [vmem:[%s7444_s2] sm:$0xf]  ;;  %v4939_v28 = vld [vmem:[%s7444_s2 + $0x4] sm:$0xf0] }
  0x13   : > { %v4458_v26 = vor.u32 %v4940_v23, %v4455_v25  ;;  %v4938_v29 = vld [vmem:[%s7444_s2 + $0x4] sm:$0xf]  ;;  %v4446_v30 = vor.u32 %v4939_v28, %v4445_v27  ;;  %v4447_v31 = vld [vmem:[%s7444_s2 + $0x8] sm:$0xf0]  ;;  %v5038_v34 = vld [vmem:[%s7443_s1] ss:$0 sm:$0xff] }
  0x14   : > { %609 = vmatpush.bf16.msra.mxu1 %v4466_v20  ;;  %v4450_v32 = vor.u32 %v4938_v29, %v4447_v31  ;;  %v5039_v35 = vld [vmem:[%s7443_s1 + $0x1] ss:$0 sm:$0xff]  ;;  %v4509_v50 = vld [vmem:[%s7446_s4 + $0x30] sm:$0xf]  ;;  %v4953_v51 = vld [vmem:[%s7446_s4 + $0x34] sm:$0xf0] }
  0x15   : > { %v4952_v52 = vld [vmem:[%s7446_s4 + $0x34] sm:$0xf]  ;;  %v4510_v53 = vor.u32 %v4953_v51, %v4509_v50  ;;  %v4511_v54 = vld [vmem:[%s7446_s4 + $0x38] sm:$0xf0]  ;;  %v4501_v5 = vld [vmem:[%s7446_s4 + $0x20] sm:$0xf] }
  0x16   : > { %581 = vmatpush.bf16.msra.mxu0 %v4454_v24  ;;  %v4514_v55 = vor.u32 %v4952_v52, %v4511_v54  ;;  %v4951_v6 = vld [vmem:[%s7446_s4 + $0x24] sm:$0xf0]  ;;  %v4950_v8 = vld [vmem:[%s7446_s4 + $0x24] sm:$0xf]  ;;  %v4503_v9 = vld [vmem:[%s7446_s4 + $0x28] sm:$0xf0] }
  0x17   : > { %413 = vperm.xlu1 %5036, %v391_v10   ;;  %701 = vmatpush.bf16.msra.mxu2 %v4510_v53  ;;  %v4502_v7 = vor.u32 %v4951_v6, %v4501_v5  ;;  %v4506_v10 = vor.u32 %v4950_v8, %v4503_v9  ;;  %v4495_v15 = vld [vmem:[%s7446_s4 + $0x18] sm:$0xf0]  ;;  %v4485_v17 = vld [vmem:[%s7446_s4] sm:$0xf]  ;;  %v4947_v18 = vld [vmem:[%s7446_s4 + $0x4] sm:$0xf0] }
  0x18   : > { %403 = vperm.xlu0 %5035, %v389_v11   ;;  %423 = vperm.xlu2 %5037, %v393_v12   ;;  %v4493_v11 = vld [vmem:[%s7446_s4 + $0x10] sm:$0xf]  ;;  %v4949_v12 = vld [vmem:[%s7446_s4 + $0x14] sm:$0xf0]  ;;  %v4946_v19 = vld [vmem:[%s7446_s4 + $0x4] sm:$0xf]  ;;  %v4486_v20 = vor.u32 %v4947_v18, %v4485_v17 }
  0x19   : > { %610 = vmatpush.bf16.msra.mxu1 %v4458_v26  ;;  %730 = vmatpush.bf16.msra.mxu3 %v4514_v55  ;;  %v4487_v21 = vld [vmem:[%s7446_s4 + $0x8] sm:$0xf0]  ;;  %v462_v25 = vld [vmem:[%s7445_s3] ss:$2 sm:$0x3] }
  0x1a   : > { %582 = vmatpush.bf16.msra.mxu0 %v4446_v30  ;;  %v4490_v22 = vor.u32 %v4946_v19, %v4487_v21  ;;  %v519_v26 = vperm.slane %v462_v25, 1 }
  0x1b   : > { %702 = vmatpush.bf16.msra.mxu2 %v4502_v7 }
  0x1d   : > { %611 = vmatpush.bf16.msra.mxu1 %v4450_v32  ;;  %731 = vmatpush.bf16.msra.mxu3 %v4506_v10 }
  0x1f   : > { %433 = vperm.xlu1 %5036, %v395_v13   ;;  %v4948_v13 = vld [vmem:[%s7446_s4 + $0x14] sm:$0xf] }
  0x20   : > { %428 = vperm.xlu0 %5035, %v394_v14   ;;  %v4494_v14 = vor.u32 %v4949_v12, %v4493_v11  ;;  %v4498_v16 = vor.u32 %v4948_v13, %v4495_v15 }
  0x22   : > { %703 = vmatpush.bf16.msra.mxu2 %v4494_v14  ;;  %732 = vmatpush.bf16.msra.mxu3 %v4498_v16 }
  0x26   : > { %704 = vmatpush.bf16.msra.mxu2 %v4486_v20  ;;  %733 = vmatpush.bf16.msra.mxu3 %v4490_v22 }
  0x6a   : > { %v419_v46 = vpop.permute.xlu2 %418 }
  0x6b   : > { %v441_v57 = vmul.f32 %v5038_v34, %v419_v46 }
  0x6d   : > { %v5537_v59 = vadd.f32 %v5039_v35, %v441_v57 }
  0x72   : > { %v424_v56 = vpop.permute.xlu2 %423 }
  0x73   : > { %v442_v58 = vmul.f32 %v5038_v34, %v424_v56 }
  0x75   : > { %v5539_v60 = vadd.f32 %v5039_v35, %v442_v58 }
  0x77   : > { %v515_v61 = vpack.c.bf16 %v5539_v60, %v5537_v59 }
  0x81   : > { %v409_v39 = vpop.permute.xlu1 %408 }
  0x82   : > { %v399_v33 = vpop.permute.xlu0 %398  ;;  %v439_v44 = vmul.f32 %v5038_v34, %v409_v39 }
  0x83   : > { %v437_v36 = vmul.f32 %v5038_v34, %v399_v33 }
  0x84   : > { %v5517_v47 = vadd.f32 %v5039_v35, %v439_v44 }
  0x85   : > { %v5509_v40 = vadd.f32 %v5039_v35, %v437_v36 }
  0x89   : > { %v414_v43 = vpop.permute.xlu1 %413 }
  0x8a   : > { %v404_v37 = vpop.permute.xlu0 %403  ;;  %v440_v45 = vmul.f32 %v5038_v34, %v414_v43  ;;  %v518_v43 = vperm.slane %v462_v25, 0 }
  0x8b   : > { %v438_v38 = vmul.f32 %v5038_v34, %v404_v37 }
  0x8c   : > { %v5519_v48 = vadd.f32 %v5039_v35, %v440_v45 }
  0x8d   : > { %v5511_v41 = vadd.f32 %v5039_v35, %v438_v38 }
  0x8e   : > { %v514_v49 = vpack.c.bf16 %v5519_v48, %v5517_v47 }
  0x8f   : > { %v513_v42 = vpack.c.bf16 %v5511_v41, %v5509_v40 }
  0x91   : > { %4475 = vmatmul.msk.bf16.vlgmr.msra.gmra.mxu0 %vm562_vm0, %v513_v42  ;;  %4479 = vmatmul.msk.bf16.vlgmr.msra.gmra.mxu1 %vm562_vm0, %v513_v42  ;;  %v434_v62 = vpop.permute.xlu1 %433 }
  0x92   : > { %v429_v63 = vpop.permute.xlu0 %428  ;;  %v444_v0 = vmul.f32 %v5038_v34, %v434_v62 }
  0x93   : > { %v443_v1 = vmul.f32 %v5038_v34, %v429_v63 }
  0x94   : > { %v5545_v2 = vadd.f32 %v5039_v35, %v444_v0 }
  0x95   : > { %v5547_v3 = vadd.f32 %v5039_v35, %v443_v1 }
  0x97   : > { %v516_v4 = vpack.c.bf16 %v5545_v2, %v5547_v3 }
  0xa1   : > { %4476 = vmatmul.msk.bf16.gmra.mxu0 %vm562_vm0, %v514_v49  ;;  %4480 = vmatmul.msk.bf16.gmra.mxu1 %vm562_vm0, %v514_v49 }
  0xb1   : > { %4477 = vmatmul.msk.bf16.gmra.mxu0 %vm562_vm0, %v515_v61  ;;  %4481 = vmatmul.msk.bf16.gmra.mxu1 %vm562_vm0, %v515_v61 }
  0xc1   : > { %4478 = vmatmul.msk.bf16.gmra.mxu0 %vm562_vm0, %v516_v4  ;;  %4482 = vmatmul.msk.bf16.gmra.mxu1 %vm562_vm0, %v516_v4 }
 0x10e   : > { %v584_v23 = vpop.f32.mrf.mxu0  ;;  %v613_v24 = vpop.f32.mrf.mxu1 }
 0x10f   : > { %v614_v29 = vadd.f32 %v613_v24, %v519_v26  ;;  %v585_v63 = vadd.f32 %v584_v23, %v518_v43 }
 0x111   : > { %v633_v4 = vpack.c.bf16 %v585_v63, %v585_v63 }
 0x113   : > { %v771_v15 = vunpack.c.l.b16 %v633_v4 }
 0x116   : > { %v586_v27 = vpop.f32.mrf.mxu0  ;;  %v615_v28 = vpop.f32.mrf.mxu1 }
 0x117   : > { %v616_v30 = vadd.f32 %v615_v28, %v519_v26  ;;  %v587_v62 = vadd.f32 %v586_v27, %v518_v43 }
 0x119   : > { %v641_v31 = vpack.c.bf16 %v616_v30, %v614_v29  ;;  %v634_v1 = vpack.c.bf16 %v587_v62, %v587_v62 }
 0x11b   : > { %4515 = vmatmul.msk.bf16.vlgmr.msra.gmra.mxu2 %vm562_vm0, %v641_v31  ;;  %4519 = vmatmul.msk.bf16.vlgmr.msra.gmra.mxu3 %vm562_vm0, %v641_v31  ;;  %v772_v11 = vunpack.c.l.b16 %v634_v1 }
 0x11d   : > { %v5606_v19 = vpack.c.b16 %v772_v11, %v771_v15 }
 0x11e   : > { %v589_v32 = vpop.f32.mrf.mxu0  ;;  %v618_v33 = vpop.f32.mrf.mxu1 }
 0x11f   : > { %v619_v36 = vadd.f32 %v618_v33, %v519_v26  ;;  %v590_v18 = vadd.f32 %v589_v32, %v518_v43 }
 0x121   : > { %v635_v22 = vpack.c.bf16 %v590_v18, %v590_v18 }
 0x123   : > { %v773_v24 = vunpack.c.l.b16 %v635_v22 }
 0x126   : > { %v591_v34 = vpop.f32.mrf.mxu0  ;;  %v620_v35 = vpop.f32.mrf.mxu1 }
 0x127   : > { %v621_v37 = vadd.f32 %v620_v35, %v519_v26  ;;  %v592_v14 = vadd.f32 %v591_v34, %v518_v43 }
 0x129   : > { %v642_v38 = vpack.c.bf16 %v621_v37, %v619_v36  ;;  %v636_v21 = vpack.c.bf16 %v592_v14, %v592_v14 }
 0x12b   : > { %4516 = vmatmul.msk.bf16.gmra.mxu2 %vm562_vm0, %v642_v38  ;;  %4520 = vmatmul.msk.bf16.gmra.mxu3 %vm562_vm0, %v642_v38  ;;  %v774_v23 = vunpack.c.l.b16 %v636_v21 }
 0x12d   : > { %v5616_v25 = vpack.c.b16 %v774_v23, %v773_v24 }
 0x12e   : > { %v594_v39 = vpop.f32.mrf.mxu0  ;;  %v623_v42 = vpop.f32.mrf.mxu1 }
 0x12f   : > { %v595_v44 = vadd.f32 %v594_v39, %v518_v43  ;;  %v624_v50 = vadd.f32 %v623_v42, %v519_v26 }
 0x131   : > { %v637_v49 = vpack.c.bf16 %v595_v44, %v595_v44 }
 0x133   : > { %v775_v55 = vunpack.c.l.b16 %v637_v49 }
 0x136   : > { %v596_v45 = vpop.f32.mrf.mxu0  ;;  %v625_v46 = vpop.f32.mrf.mxu1 }
 0x137   : > { %v597_v51 = vadd.f32 %v596_v45, %v518_v43  ;;  %v626_v52 = vadd.f32 %v625_v46, %v519_v26 }
 0x139   : > { %v638_v53 = vpack.c.bf16 %v597_v51, %v597_v51  ;;  %v643_v54 = vpack.c.bf16 %v626_v52, %v624_v50 }
 0x13b   : > { %v776_v56 = vunpack.c.l.b16 %v638_v53  ;;  %4517 = vmatmul.msk.bf16.gmra.mxu2 %vm562_vm0, %v643_v54  ;;  %4521 = vmatmul.msk.bf16.gmra.mxu3 %vm562_vm0, %v643_v54 }
 0x13d   : > { %v5598_v57 = vpack.c.b16 %v776_v56, %v775_v55 }
 0x13e   : > { %v599_v58 = vpop.f32.mrf.mxu0  ;;  %v628_v61 = vpop.f32.mrf.mxu1 }
 0x13f   : > { %1022 = vrot.lane.b32.xlu0 %v5598_v57, %s5373_s25  ;;  %v600_v0 = vadd.f32 %v599_v58, %v518_v43  ;;  %v629_v8 = vadd.f32 %v628_v61, %v519_v26 }
 0x141   : > { %v639_v7 = vpack.c.bf16 %v600_v0, %v600_v0 }
 0x143   : > { %v777_v16 = vunpack.c.l.b16 %v639_v7 }
 0x146   : > { %v601_v5 = vpop.f32.mrf.mxu0  ;;  %v630_v6 = vpop.f32.mrf.mxu1 }
 0x147   : > { %v602_v9 = vadd.f32 %v601_v5, %v518_v43  ;;  %v631_v10 = vadd.f32 %v630_v6, %v519_v26  ;;  %787 = vrot.lane.b32.xlu0 %v5598_v57, %s5374_s26 }
 0x149   : > { %v640_v12 = vpack.c.bf16 %v602_v9, %v602_v9  ;;  %v644_v13 = vpack.c.bf16 %v631_v10, %v629_v8 }
 0x14b   : > { %v778_v17 = vunpack.c.l.b16 %v640_v12  ;;  %4518 = vmatmul.msk.bf16.gmra.mxu2 %vm562_vm0, %v644_v13  ;;  %4522 = vmatmul.msk.bf16.gmra.mxu3 %vm562_vm0, %v644_v13 }
 0x14d   : > { %v5608_v20 = vpack.c.b16 %v778_v17, %v777_v16 }
 0x14f   : > { %1010 = vrot.lane.b32.xlu0 %v5606_v19, %s5375_s27  ;;  %789 = vrot.lane.b32.xlu1 %v5608_v20, %s5374_s26 }
 0x150   : > { %1024 = vrot.lane.b32.xlu2 %v5608_v20, %s5373_s25 }
 0x157   : > { %1014 = vrot.lane.b32.xlu0 %v5598_v57, %s5375_s27  ;;  %1018 = vrot.lane.b32.xlu1 %v5606_v19, %s5373_s25 }
 0x158   : > { %1020 = vrot.lane.b32.xlu2 %v5616_v25, %s5373_s25 }
 0x15f   : > { %1246 = vrot.lane.b32.xlu0 %v5608_v20, %s5376_s28  ;;  %783 = vrot.lane.b32.xlu1 %v5606_v19, %s5374_s26 }
 0x160   : > { %785 = vrot.lane.b32.xlu2 %v5616_v25, %s5374_s26 }
 0x167   : > { %1244 = vrot.lane.b32.xlu0 %v5598_v57, %s5376_s28  ;;  %1472 = vrot.lane.b32.xlu1 %v5608_v20, %s5377_s29 }
 0x168   : > { %1012 = vrot.lane.b32.xlu2 %v5616_v25, %s5375_s27 }
 0x16f   : > { %1458 = vrot.lane.b32.xlu0 %v5606_v19, %s5378_s30  ;;  %1016 = vrot.lane.b32.xlu1 %v5608_v20, %s5375_s27 }
 0x170   : > { %1470 = vrot.lane.b32.xlu2 %v5598_v57, %s5377_s29 }
 0x177   : > { %1460 = vrot.lane.b32.xlu0 %v5616_v25, %s5378_s30  ;;  %1466 = vrot.lane.b32.xlu1 %v5606_v19, %s5377_s29 }
 0x178   : > { %1468 = vrot.lane.b32.xlu2 %v5616_v25, %s5377_s29 }
 0x17f   : > { %1236 = vrot.lane.b32.xlu0 %v5598_v57, %s5379_s12  ;;  %1240 = vrot.lane.b32.xlu1 %v5606_v19, %s5376_s28 }
 0x180   : > { %1242 = vrot.lane.b32.xlu2 %v5616_v25, %s5376_s28 }
 0x187   : > { %1234 = vrot.lane.b32.xlu1 %v5616_v25, %s5379_s12 }
 0x188   : > { %1232 = vrot.lane.b32.xlu2 %v5606_v19, %s5379_s12 }
 0x18f   : > { %1464 = vrot.lane.b32.xlu1 %v5608_v20, %s5378_s30 }
 0x190   : > { %1462 = vrot.lane.b32.xlu2 %v5598_v57, %s5378_s30 }
 0x198   : > { %1238 = vrot.lane.b32.xlu2 %v5608_v20, %s5379_s12 }
 0x19e   : > { %v706_v26 = vpop.f32.mrf.mxu2  ;;  %v735_v27 = vpop.f32.mrf.mxu3 }
 0x19f   : > { %v755_v28 = vpack.c.bf16 %v735_v27, %v706_v26 }
 0x1a1   : > { %v929_v32 = vunpack.c.l.b16 %v755_v28  ;;  %v1377_v33 = vunpack.c.h.b16 %v755_v28 }
 0x1a6   : > { %v708_v29 = vpop.f32.mrf.mxu2  ;;  %v737_v30 = vpop.f32.mrf.mxu3 }
 0x1a7   : > { %v756_v31 = vpack.c.bf16 %v737_v30, %v708_v29 }
 0x1a9   : > { %v930_v34 = vunpack.c.l.b16 %v756_v31  ;;  %v1378_v35 = vunpack.c.h.b16 %v756_v31 }
 0x1aa   : > { %v1025_v36 = vpop.permute.xlu2 %1024 }
 0x1ab   : > { %v1048_v37 = vsel %vm791_vm1, %v1025_v36, 0  ;;  %v5665_v38 = vpack.c.b16 %v930_v34, %v929_v32  ;;  %v5667_v39 = vpack.c.b16 %v1378_v35, %v1377_v33 }
 0x1ac   : > { %1054 = vmatpush.bf16.xpose.msrb.mxu2 %v1048_v37 }
 0x1ad   : > { %1155 = vrot.lane.b32.xlu2 %v5665_v38, %s5374_s26 }
 0x1ae   : > { %v711_v42 = vpop.f32.mrf.mxu2  ;;  %v740_v43 = vpop.f32.mrf.mxu3 }
 0x1af   : > { %v5672_v46 = vpack.c.bf16 %v740_v43, %v711_v42 }
 0x1b1   : > { %v1023_v44 = vpop.permute.xlu0 %1022  ;;  %v931_v53 = vunpack.c.l.b16 %v5672_v46 }
 0x1b2   : > { %v1045_v45 = vsel %vm791_vm1, %v1023_v44, 0  ;;  %v1021_v49 = vpop.permute.xlu2 %1020 }
 0x1b3   : > { %v1042_v56 = vsel %vm791_vm1, %v1021_v49, 0 }
 0x1b4   : > { %1055 = vmatpush.bf16.xpose.msrb.mxu2 %v1045_v45 }
 0x1b6   : > { %v713_v50 = vpop.f32.mrf.mxu2  ;;  %v742_v51 = vpop.f32.mrf.mxu3 }
 0x1b7   : > { %v5674_v52 = vpack.c.bf16 %v742_v51, %v713_v50 }
 0x1b9   : > { %v932_v54 = vunpack.c.l.b16 %v5674_v52  ;;  %v788_v55 = vpop.permute.xlu0 %787 }
 0x1ba   : > { %v786_v63 = vpop.permute.xlu2 %785  ;;  %v811_v13 = vsel %vm791_vm1, %v788_v55, 0 }
 0x1bb   : > { %v938_v58 = vpack.c.b16 %v932_v54, %v931_v53  ;;  %v808_v22 = vsel %vm791_vm1, %v786_v63, 0  ;;  %v1380_v63 = vunpack.c.h.b16 %v5674_v52 }
 0x1bc   : > { %1056 = vmatpush.bf16.xpose.msrb.mxu2 %v1042_v56 }
 0x1bd   : > { %1157 = vrot.lane.b32.xlu1 %v938_v58, %s5374_s26 }
 0x1be   : > { %v716_v61 = vpop.f32.mrf.mxu2  ;;  %v745_v62 = vpop.f32.mrf.mxu3 }
 0x1bf   : > { %v5681_v5 = vpack.c.bf16 %v745_v62, %v716_v61 }
 0x1c1   : > { %v790_v0 = vpop.permute.xlu1 %789  ;;  %v1011_v1 = vpop.permute.xlu0 %1010  ;;  %v933_v9 = vunpack.c.l.b16 %v5681_v5  ;;  %v1381_v56 = vunpack.c.h.b16 %v5681_v5 }
 0x1c2   : > { %v814_v4 = vsel %vm791_vm1, %v790_v0, 0  ;;  %v1013_v12 = vpop.permute.xlu2 %1012 }
 0x1c3   : > { %820 = vmatpush.bf16.xpose.msrb.mxu0 %v814_v4 }
 0x1c6   : > { %v718_v6 = vpop.f32.mrf.mxu2  ;;  %v747_v7 = vpop.f32.mrf.mxu3 }
 0x1c7   : > { %v760_v8 = vpack.c.bf16 %v747_v7, %v718_v6 }
 0x1c9   : > { %v934_v10 = vunpack.c.l.b16 %v760_v8  ;;  %v1019_v11 = vpop.permute.xlu1 %1018  ;;  %v1015_v15 = vpop.permute.xlu0 %1014  ;;  %v1382_v53 = vunpack.c.h.b16 %v760_v8 }
 0x1ca   : > { %v1039_v14 = vsel %vm791_vm1, %v1019_v11, 0  ;;  %v1471_v23 = vpop.permute.xlu2 %1470 }
 0x1cb   : > { %821 = vmatpush.bf16.xpose.msrb.mxu0 %v811_v13  ;;  %1057 = vmatpush.bf16.xpose.msrb.mxu2 %v1039_v14  ;;  %v939_v16 = vpack.c.b16 %v934_v10, %v933_v9  ;;  %v1493_v50 = vsel %vm791_vm1, %v1471_v23, 0  ;;  %v5703_v62 = vpack.c.b16 %v1382_v53, %v1381_v56 }
 0x1cd   : > { %1159 = vrot.lane.b32.xlu0 %v939_v16, %s5374_s26 }
 0x1ce   : > { %v721_v17 = vpop.f32.mrf.mxu2  ;;  %v750_v18 = vpop.f32.mrf.mxu3 }
 0x1cf   : > { %v761_v24 = vpack.c.bf16 %v750_v18, %v721_v17 }
 0x1d1   : > { %v784_v21 = vpop.permute.xlu1 %783  ;;  %v1247_v26 = vpop.permute.xlu0 %1246  ;;  %v935_v30 = vunpack.c.l.b16 %v761_v24  ;;  %v1383_v31 = vunpack.c.h.b16 %v761_v24 }
 0x1d2   : > { %4531 = vmatmul.msk.bf16.vlgmr.msrb.gmra.mxu2 %vm791_vm1, %v1011_v1  ;;  %v805_v36 = vsel %vm791_vm1, %v784_v21, 0  ;;  %v1270_v37 = vsel %vm791_vm1, %v1247_v26, 0  ;;  %v1469_v44 = vpop.permute.xlu2 %1468 }
 0x1d3   : > { %822 = vmatpush.bf16.xpose.msrb.mxu0 %v808_v22  ;;  %v1490_v61 = vsel %vm791_vm1, %v1469_v44, 0 }
 0x1d6   : > { %v723_v27 = vpop.f32.mrf.mxu2  ;;  %v752_v28 = vpop.f32.mrf.mxu3 }
 0x1d7   : > { %v762_v29 = vpack.c.bf16 %v752_v28, %v723_v27 }
 0x1d9   : > { %v1384_v32 = vunpack.c.h.b16 %v762_v29  ;;  %v1473_v33 = vpop.permute.xlu1 %1472  ;;  %v936_v34 = vunpack.c.l.b16 %v762_v29  ;;  %v1245_v45 = vpop.permute.xlu0 %1244 }
 0x1da   : > { %v1496_v35 = vsel %vm791_vm1, %v1473_v33, 0  ;;  %v1267_v51 = vsel %vm791_vm1, %v1245_v45, 0  ;;  %v1243_v54 = vpop.permute.xlu2 %1242 }
 0x1db   : > { %823 = vmatpush.bf16.xpose.msrb.mxu0 %v805_v36  ;;  %1502 = vmatpush.bf16.xpose.msra.mxu2 %v1496_v35  ;;  %v940_v42 = vpack.c.b16 %v936_v34, %v935_v30  ;;  %v1388_v43 = vpack.c.b16 %v1384_v32, %v1383_v31 }
 0x1dd   : > { %961 = vmatpush.bf16.msrb.mxu1 %v940_v42  ;;  %1161 = vrot.lane.b32.xlu0 %v940_v42, %s5374_s26 }
 0x1de   : > { %1609 = vrot.lane.b32.xlu1 %v1388_v43, %s5374_s26 }
 0x1e1   : > { %962 = vmatpush.bf16.msrb.mxu1 %v939_v16  ;;  %v1017_v49 = vpop.permute.xlu1 %1016 }
 0x1e2   : > { %4523 = vmatmul.msk.bf16.vlgmr.msrb.gmra.mxu0 %vm791_vm1, %v5606_v19  ;;  %4532 = vmatmul.msk.bf16.gmra.mxu2 %vm791_vm1, %v1013_v12  ;;  %v1264_v19 = vsel %vm791_vm1, %v1243_v54, 0 }
 0x1e3   : > { %1276 = vmatpush.bf16.xpose.msra.mxu0 %v1270_v37  ;;  %1503 = vmatpush.bf16.xpose.msra.mxu2 %v1493_v50 }
 0x1e5   : > { %963 = vmatpush.bf16.msrb.mxu1 %v938_v58  ;;  %v1379_v58 = vunpack.c.h.b16 %v5672_v46  ;;  %v1459_v46 = vpop.permute.xlu0 %1458 }
 0x1e9   : > { %964 = vmatpush.bf16.msrb.mxu1 %v5665_v38  ;;  %v1467_v55 = vpop.permute.xlu1 %1466  ;;  %v5708_v38 = vpack.c.b16 %v1380_v63, %v1379_v58 }
 0x1ea   : > { %v1487_v1 = vsel %vm791_vm1, %v1467_v55, 0 }
 0x1eb   : > { %1277 = vmatpush.bf16.xpose.msra.mxu0 %v1267_v51  ;;  %1504 = vmatpush.bf16.xpose.msra.mxu2 %v1490_v61 }
 0x1ed   : > { %1409 = vmatpush.bf16.msra.mxu1 %v1388_v43  ;;  %v1461_v52 = vpop.permute.xlu0 %1460 }
 0x1f1   : > { %1410 = vmatpush.bf16.msra.mxu1 %v5703_v62  ;;  %v1241_v0 = vpop.permute.xlu1 %1240 }
 0x1f2   : > { %4524 = vmatmul.msk.bf16.gmra.mxu0 %vm791_vm1, %v5616_v25  ;;  %4533 = vmatmul.msk.bf16.gmra.mxu2 %vm791_vm1, %v1015_v15  ;;  %v1261_v4 = vsel %vm791_vm1, %v1241_v0, 0  ;;  %v1233_v25 = vpop.permute.xlu2 %1232 }
 0x1f3   : > { %1278 = vmatpush.bf16.xpose.msra.mxu0 %v1264_v19  ;;  %1505 = vmatpush.bf16.xpose.msra.mxu2 %v1487_v1 }
 0x1f5   : > { %1411 = vmatpush.bf16.msra.mxu1 %v5708_v38 }
 0x1f9   : > { %1412 = vmatpush.bf16.msra.mxu1 %v5667_v39  ;;  %v1235_v6 = vpop.permute.xlu1 %1234 }
 0x1fa   : > { %v1463_v5 = vpop.permute.xlu2 %1462 }
 0x1fb   : > { %1279 = vmatpush.bf16.xpose.msra.mxu0 %v1261_v4 }
 0x201   : > { %v1465_v7 = vpop.permute.xlu1 %1464 }
 0x202   : > { %4525 = vmatmul.msk.bf16.gmra.mxu0 %vm791_vm1, %v5598_v57  ;;  %4534 = vmatmul.msk.bf16.gmra.mxu2 %vm791_vm1, %v1017_v49  ;;  %v1237_v57 = vpop.permute.xlu0 %1236  ;;  %v1239_v9 = vpop.permute.xlu2 %1238 }
 0x20a   : > { %v1156_v13 = vpop.permute.xlu2 %1155 }
 0x212   : > { %4526 = vmatmul.msk.bf16.gmra.mxu0 %vm791_vm1, %v5608_v20  ;;  %4547 = vmatmul.msk.bf16.vlgmr.msra.gmra.mxu2 %vm791_vm1, %v1459_v46 }
 0x222   : > { %4539 = vmatmul.msk.bf16.vlgmr.msra.gmra.mxu0 %vm791_vm1, %v1233_v25  ;;  %4548 = vmatmul.msk.bf16.gmra.mxu2 %vm791_vm1, %v1461_v52 }
 0x22f   : > { %v1158_v10 = vpop.permute.xlu1 %1157 }
 0x232   : > { %4540 = vmatmul.msk.bf16.gmra.mxu0 %vm791_vm1, %v1235_v6  ;;  %4549 = vmatmul.msk.bf16.gmra.mxu2 %vm791_vm1, %v1463_v5 }
 0x23f   : > { %v1160_v20 = vpop.permute.xlu0 %1159 }
 0x242   : > { %4541 = vmatmul.msk.bf16.gmra.mxu0 %vm791_vm1, %v1237_v57  ;;  %4550 = vmatmul.msk.bf16.gmra.mxu2 %vm791_vm1, %v1465_v7 }
 0x24f   : > { %v1162_v8 = vpop.permute.xlu0 %1161 }
 0x250   : > { %1183 = vmatpush.bf16.msrb.mxu3 %v1162_v8  ;;  %v1610_v14 = vpop.permute.xlu1 %1609 }
 0x252   : > { %4542 = vmatmul.msk.bf16.gmra.mxu0 %vm791_vm1, %v1239_v9 }
 0x254   : > { %1184 = vmatpush.bf16.msrb.mxu3 %v1160_v20 }
 0x255   : > { %v5730_v11 = vpop.f32.mrf.mxu2 }
 0x256   : > { %v1079_v12 = vsel %vm562_vm0, %v5730_v11, -inf }
 0x257   : > { %1080 = vmax.xlane.f32.xlu1 %v1079_v12 }
 0x258   : > { %1185 = vmatpush.bf16.msrb.mxu3 %v1158_v10 }
 0x25c   : > { %1186 = vmatpush.bf16.msrb.mxu3 %v1156_v13 }
 0x25d   : > { %v5734_v15 = vpop.f32.mrf.mxu2 }
 0x25e   : > { %v1082_v28 = vsel %vm562_vm0, %v5734_v15, -inf }
 0x25f   : > { %v5736_v16 = vpop.f32.mrf.mxu0 }
 0x260   : > { %1631 = vmatpush.bf16.msra.mxu3 %v1610_v14  ;;  %v845_v17 = vsel %vm562_vm0, %v5736_v16, -inf }
 0x261   : > { %846 = vmax.xlane.f32.xlu0 %v845_v17 }
 0x265   : > { %v5740_v18 = vpop.f32.mrf.mxu2 }
 0x266   : > { %v1085_v23 = vsel %vm562_vm0, %v5740_v18, -inf }
 0x267   : > { %v5742_v21 = vpop.f32.mrf.mxu0 }
 0x268   : > { %v848_v22 = vsel %vm562_vm0, %v5742_v21, -inf }
 0x269   : > { %849 = vmax.xlane.f32.xlu2 %v848_v22  ;;  %1086 = vmax.xlane.f32.xlu0 %v1085_v23 }
 0x26d   : > { %v5748_v24 = vpop.f32.mrf.mxu2 }
 0x26e   : > { %v1088_v29 = vsel %vm562_vm0, %v5748_v24, -inf }
 0x26f   : > { %v5750_v26 = vpop.f32.mrf.mxu0 }
 0x270   : > { %v851_v27 = vsel %vm562_vm0, %v5750_v26, -inf }
 0x271   : > { %852 = vmax.xlane.f32.xlu1 %v851_v27  ;;  %1083 = vmax.xlane.f32.xlu2 %v1082_v28 }
 0x272   : > { %1089 = vmax.xlane.f32.xlu0 %v1088_v29 }
 0x275   : > { %v5758_v30 = vpop.f32.mrf.mxu2 }
 0x276   : > { %v1091_v42 = vsel %vm562_vm0, %v5758_v30, -inf }
 0x277   : > { %v5760_v31 = vpop.f32.mrf.mxu0 }
 0x278   : > { %v854_v32 = vsel %vm562_vm0, %v5760_v31, -inf }
 0x279   : > { %855 = vmax.xlane.f32.xlu2 %v854_v32 }
 0x27d   : > { %v5764_v33 = vpop.f32.mrf.mxu2 }
 0x27e   : > { %v1094_v53 = vsel %vm562_vm0, %v5764_v33, -inf }
 0x27f   : > { %v5766_v34 = vpop.f32.mrf.mxu0 }
 0x280   : > { %v857_v35 = vsel %vm562_vm0, %v5766_v34, -inf }
 0x281   : > { %858 = vmax.xlane.f32.xlu0 %v857_v35 }
 0x285   : > { %v5770_v36 = vpop.f32.mrf.mxu2 }
 0x286   : > { %v1097_v63 = vsel %vm562_vm0, %v5770_v36, -inf }
 0x287   : > { %v5772_v37 = vpop.f32.mrf.mxu0 }
 0x288   : > { %v860_v49 = vsel %vm562_vm0, %v5772_v37, -inf }
 0x289   : > { %1092 = vmax.xlane.f32.xlu0 %v1091_v42 }
 0x28d   : > { %v5776_v43 = vpop.f32.mrf.mxu2 }
 0x28e   : > { %v1100_v44 = vsel %vm562_vm0, %v5776_v43, -inf }
 0x28f   : > { %v5780_v45 = vpop.f32.mrf.mxu0  ;;  %1101 = vmax.xlane.f32.xlu1 %v1100_v44 }
 0x290   : > { %v863_v55 = vsel %vm562_vm0, %v5780_v45, -inf }
 0x291   : > { %861 = vmax.xlane.f32.xlu0 %v860_v49 }
 0x295   : > { %v5796_v61 = vpop.f32.mrf.mxu2 }
 0x296   : > { %v1527_v1 = vsel %vm562_vm0, %v5796_v61, -inf }
 0x297   : > { %v5784_v50 = vpop.f32.mrf.mxu0 }
 0x298   : > { %v866_v51 = vsel %vm562_vm0, %v5784_v50, -inf }
 0x299   : > { %867 = vmax.xlane.f32.xlu2 %v866_v51  ;;  %1095 = vmax.xlane.f32.xlu0 %v1094_v53 }
 0x29d   : > { %v5806_v0 = vpop.f32.mrf.mxu2 }
 0x29e   : > { %v1530_v4 = vsel %vm562_vm0, %v5806_v0, -inf }
 0x29f   : > { %v5790_v54 = vpop.f32.mrf.mxu0 }
 0x2a0   : > { %v1301_v56 = vsel %vm562_vm0, %v5790_v54, -inf }
 0x2a1   : > { %864 = vmax.xlane.f32.xlu0 %v863_v55  ;;  %1302 = vmax.xlane.f32.xlu2 %v1301_v56 }
 0x2a7   : > { %v5798_v19 = vpop.f32.mrf.mxu0 }
 0x2a8   : > { %1605 = vrot.lane.b32.xlu1 %v5708_v38, %s5374_s26  ;;  %v1304_v58 = vsel %vm562_vm0, %v5798_v19, -inf  ;;  %v5814_v38 = vpop.f32.mrf.mxu2 }
 0x2a9   : > { %1098 = vmax.xlane.f32.xlu0 %v1097_v63  ;;  %1305 = vmax.xlane.f32.xlu2 %v1304_v58 }
 0x2af   : > { %v5812_v46 = vpop.f32.mrf.mxu0 }
 0x2b0   : > { %v5820_v52 = vpop.f32.mrf.mxu2 }
 0x2b1   : > { %1528 = vmax.xlane.f32.xlu0 %v1527_v1  ;;  %1531 = vmax.xlane.f32.xlu2 %v1530_v4  ;;  %v1536_v6 = vsel %vm562_vm0, %v5820_v52, -inf }
 0x2b7   : > { %v5818_v25 = vpop.f32.mrf.mxu0 }
 0x2b8   : > { %v5828_v57 = vpop.f32.mrf.mxu2 }
 0x2bf   : > { %v5824_v5 = vpop.f32.mrf.mxu0 }
 0x2c0   : > { %v5835_v9 = vpop.f32.mrf.mxu2 }
 0x2c5   : > { %1607 = vrot.lane.b32.xlu0 %v5703_v62, %s5374_s26  ;;  %v1539_v62 = vsel %vm562_vm0, %v5828_v57, -inf }
 0x2c7   : > { %v5833_v8 = vpop.f32.mrf.mxu0 }
 0x2c8   : > { %v5844_v42 = vpop.f32.mrf.mxu2 }
 0x2c9   : > { %1603 = vrot.lane.b32.xlu2 %v5667_v39, %s5374_s26  ;;  %v1545_v51 = vsel %vm562_vm0, %v5844_v42, -inf }
 0x2ca   : > { %v1081_v12 = vpop.xlane.xlu1 %1080 }
 0x2cb   : > { %v1103_v17 = vsub.f32 %v5730_v11, %v1081_v12 }
 0x2cd   : > { %v1111_v28 = vmul.f32 1.442695, %v1103_v17 }
 0x2cf   : > { %v5841_v23 = vpop.f32.mrf.mxu0 }
 0x2d2   : > { %1537 = vmax.xlane.f32.xlu1 %v1536_v6 }
 0x2d4   : > { %v847_v7 = vpop.xlane.xlu0 %846 }
 0x2d5   : > { %v869_v20 = vsub.f32 %v5736_v16, %v847_v7  ;;  %v1313_v16 = vsel %vm562_vm0, %v5824_v5, -inf  ;;  %v1307_v7 = vsel %vm562_vm0, %v5812_v46, -inf }
 0x2d7   : > { %v877_v39 = vmul.f32 1.442695, %v869_v20  ;;  %v5854_v63 = vpop.f32.mrf.mxu0 }
 0x2d8   : > { %v1322_v20 = vsel %vm562_vm0, %v5854_v63, -inf }
 0x2d9   : > { %5040 = vpow2.f32 %v877_v39 }
 0x2da   : > { %1540 = vmax.xlane.f32.xlu1 %v1539_v62 }
 0x2dc   : > { %v850_v10 = vpop.xlane.xlu2 %849  ;;  %v1087_v22 = vpop.xlane.xlu0 %1086 }
 0x2dd   : > { %v870_v13 = vsub.f32 %v5742_v21, %v850_v10  ;;  %v1105_v62 = vsub.f32 %v5740_v18, %v1087_v22 }
 0x2df   : > { %v879_v14 = vmul.f32 1.442695, %v870_v13  ;;  %v5041_v35 = vpop.eup %5040  ;;  %v5865_v13 = vpop.f32.mrf.mxu2 }
 0x2e0   : > { %v1548_v18 = vsel %vm562_vm0, %v5865_v13, -inf }
 0x2e1   : > { %5042 = vpow2.f32 %v879_v14  ;;  %v1310_v14 = vsel %vm562_vm0, %v5818_v25, -inf }
 0x2e2   : > { %1314 = vmax.xlane.f32.xlu1 %v1313_v16  ;;  %5044 = vpow2.f32 %v1111_v28 }
 0x2e4   : > { %v1084_v27 = vpop.xlane.xlu2 %1083  ;;  %v853_v29 = vpop.xlane.xlu1 %852 }
 0x2e5   : > { %v1104_v32 = vsub.f32 %v5734_v15, %v1084_v27  ;;  %v871_v11 = vsub.f32 %v5750_v26, %v853_v29  ;;  %v1090_v15 = vpop.xlane.xlu0 %1089  ;;  %v1533_v26 = vsel %vm562_vm0, %v5814_v38, -inf  ;;  %v1542_v29 = vsel %vm562_vm0, %v5835_v9, -inf }
 0x2e6   : > { %v1106_v6 = vsub.f32 %v5748_v24, %v1090_v15  ;;  %v1115_v24 = vmul.f32 1.442695, %v1105_v62 }
 0x2e7   : > { %v5846_v21 = vpop.eup %5042  ;;  %v1113_v44 = vmul.f32 1.442695, %v1104_v32  ;;  %v881_v53 = vmul.f32 1.442695, %v871_v11 }
 0x2e8   : > { %v917_v49 = vpack.c.bf16 %v5846_v21, %v5041_v35  ;;  %v5045_v58 = vpop.eup %5044  ;;  %v1117_v39 = vmul.f32 1.442695, %v1106_v6 }
 0x2e9   : > { %5046 = vpow2.f32 %v1113_v44  ;;  %v1127_v22 = vsel %vm562_vm0, %v5045_v58, 0.0 }
 0x2ea   : > { %1546 = vmax.xlane.f32.xlu1 %v1545_v51  ;;  %4527 = vmatmul.msk.bf16.vlgmr.msrb.gmra.mxu1 %vm562_vm0, %v917_v49  ;;  %5048 = vpow2.f32 %v881_v53  ;;  %v893_v49 = vsel %vm562_vm0, %v5041_v35, 0.0 }
 0x2ec   : > { %v856_v55 = vpop.xlane.xlu2 %855 }
 0x2ed   : > { %v872_v56 = vsub.f32 %v5760_v31, %v856_v55 }
 0x2ef   : > { %v883_v1 = vmul.f32 1.442695, %v872_v56  ;;  %1534 = vmax.xlane.f32.xlu0 %v1533_v26  ;;  %v5047_v4 = vpop.eup %5046  ;;  %v1316_v56 = vsel %vm562_vm0, %v5833_v8, -inf }
 0x2f0   : > { %v1151_v31 = vpack.c.bf16 %v5047_v4, %v5045_v58  ;;  %v5049_v12 = vpop.eup %5048  ;;  %v1130_v35 = vsel %vm562_vm0, %v5047_v4, 0.0 }
 0x2f1   : > { %5050 = vpow2.f32 %v883_v1  ;;  %v899_v11 = vsel %vm562_vm0, %v5049_v12, 0.0 }
 0x2f2   : > { %1308 = vmax.xlane.f32.xlu2 %v1307_v7  ;;  %1323 = vmax.xlane.f32.xlu1 %v1322_v20  ;;  %5052 = vpow2.f32 %v1117_v39 }
 0x2f3   : > { %4535 = vmatmul.msk.bf16.vlgmr.msrb.gmra.mxu3 %vm562_vm0, %v1151_v31  ;;  %5054 = vpow2.f32 %v1115_v24  ;;  %v1319_v31 = vsel %vm562_vm0, %v5841_v23, -inf }
 0x2f4   : > { %v859_v10 = vpop.xlane.xlu0 %858 }
 0x2f5   : > { %v873_v44 = vsub.f32 %v5766_v34, %v859_v10 }
 0x2f7   : > { %v5051_v17 = vpop.eup %5050  ;;  %1311 = vmax.xlane.f32.xlu0 %v1310_v14  ;;  %v885_v53 = vmul.f32 1.442695, %v873_v44 }
 0x2f8   : > { %v918_v16 = vpack.c.bf16 %v5051_v17, %v5049_v12  ;;  %v5053_v28 = vpop.eup %5052  ;;  %v902_v10 = vsel %vm562_vm0, %v5051_v17, 0.0 }
 0x2f9   : > { %v5055_v32 = vpop.eup %5054  ;;  %5056 = vpow2.f32 %v885_v53  ;;  %v1136_v58 = vsel %vm562_vm0, %v5053_v28, 0.0 }
 0x2fa   : > { %1549 = vmax.xlane.f32.xlu2 %v1548_v18  ;;  %1128 = vadd.xlane.f32.xlu1 %v1127_v22  ;;  %v1152_v51 = vpack.c.bf16 %v5053_v28, %v5055_v32  ;;  %v896_v18 = vsel %vm562_vm0, %v5846_v21, 0.0 }
 0x2fb   : > { %4528 = vmatmul.msk.bf16.gmra.mxu1 %vm562_vm0, %v918_v16 }
 0x2fc   : > { %v1093_v27 = vpop.xlane.xlu0 %1092 }
 0x2fd   : > { %v1107_v34 = vsub.f32 %v5758_v30, %v1093_v27 }
 0x2ff   : > { %1543 = vmax.xlane.f32.xlu0 %v1542_v29  ;;  %v1119_v7 = vmul.f32 1.442695, %v1107_v34  ;;  %v5057_v20 = vpop.eup %5056 }
 0x302   : > { %900 = vadd.xlane.f32.xlu1 %v899_v11  ;;  %894 = vadd.xlane.f32.xlu2 %v893_v49  ;;  %v1102_v24 = vpop.xlane.xlu1 %1101 }
 0x303   : > { %4536 = vmatmul.msk.bf16.gmra.mxu3 %vm562_vm0, %v1152_v51  ;;  %v1133_v51 = vsel %vm562_vm0, %v5055_v32, 0.0 }
 0x304   : > { %v862_v15 = vpop.xlane.xlu0 %861 }
 0x305   : > { %v874_v55 = vsub.f32 %v5772_v37, %v862_v15 }
 0x307   : > { %v887_v26 = vmul.f32 1.442695, %v874_v55  ;;  %1317 = vmax.xlane.f32.xlu0 %v1316_v56 }
 0x309   : > { %5058 = vpow2.f32 %v887_v26 }
 0x30a   : > { %1131 = vadd.xlane.f32.xlu2 %v1130_v35  ;;  %1137 = vadd.xlane.f32.xlu1 %v1136_v58  ;;  %5060 = vpow2.f32 %v1119_v7  ;;  %v905_v35 = vsel %vm562_vm0, %v5057_v20, 0.0 }
 0x30c   : > { %v868_v1 = vpop.xlane.xlu2 %867  ;;  %v1096_v6 = vpop.xlane.xlu0 %1095 }
 0x30d   : > { %v1108_v37 = vsub.f32 %v5764_v33, %v1096_v6  ;;  %v876_v4 = vsub.f32 %v5784_v50, %v868_v1  ;;  %v1110_v50 = vsub.f32 %v5776_v43, %v1102_v24 }
 0x30f   : > { %v5888_v62 = vpop.eup %5058  ;;  %v1121_v39 = vmul.f32 1.442695, %v1108_v37  ;;  %1320 = vmax.xlane.f32.xlu0 %v1319_v31  ;;  %v891_v14 = vmul.f32 1.442695, %v876_v4  ;;  %v1125_v29 = vmul.f32 1.442695, %v1110_v50 }
 0x310   : > { %v919_v30 = vpack.c.bf16 %v5888_v62, %v5057_v20  ;;  %v5061_v22 = vpop.eup %5060 }
 0x311   : > { %5062 = vpow2.f32 %v1121_v39  ;;  %v908_v39 = vsel %vm562_vm0, %v5888_v62, 0.0  ;;  %v1139_v24 = vsel %vm562_vm0, %v5061_v22, 0.0 }
 0x312   : > { %903 = vadd.xlane.f32.xlu2 %v902_v10  ;;  %4529 = vmatmul.msk.bf16.gmra.mxu1 %vm562_vm0, %v919_v30  ;;  %5064 = vpow2.f32 %v891_v14 }
 0x314   : > { %v1303_v33 = vpop.xlane.xlu2 %1302  ;;  %v865_v12 = vpop.xlane.xlu0 %864 }
 0x315   : > { %v875_v16 = vsub.f32 %v5780_v45, %v865_v12  ;;  %v1325_v45 = vsub.f32 %v5790_v54, %v1303_v33 }
 0x317   : > { %v889_v27 = vmul.f32 1.442695, %v875_v16  ;;  %897 = vadd.xlane.f32.xlu0 %v896_v18  ;;  %v5897_v28 = vpop.eup %5062  ;;  %v1333_v56 = vmul.f32 1.442695, %v1325_v45 }
 0x318   : > { %v1153_v17 = vpack.c.bf16 %v5897_v28, %v5061_v22  ;;  %v5906_v53 = vpop.eup %5064 }
 0x319   : > { %5066 = vpow2.f32 %v889_v27 }
 0x31a   : > { %4537 = vmatmul.msk.bf16.gmra.mxu3 %vm562_vm0, %v1153_v17  ;;  %5068 = vpow2.f32 %v1125_v29  ;;  %v1606_v14 = vpop.permute.xlu1 %1605 }
 0x31c   : > { %v1306_v44 = vpop.xlane.xlu2 %1305  ;;  %v1099_v11 = vpop.xlane.xlu0 %1098 }
 0x31d   : > { %v1326_v21 = vsub.f32 %v5798_v19, %v1306_v44  ;;  %v1109_v49 = vsub.f32 %v5770_v36, %v1099_v11 }
 0x31f   : > { %v1335_v43 = vmul.f32 1.442695, %v1326_v21  ;;  %v1123_v15 = vmul.f32 1.442695, %v1109_v49  ;;  %1134 = vadd.xlane.f32.xlu0 %v1133_v51  ;;  %v5908_v55 = vpop.eup %5066 }
 0x320   : > { %v920_v26 = vpack.c.bf16 %v5906_v53, %v5908_v55  ;;  %v5915_v34 = vpop.eup %5068 }
 0x321   : > { %5070 = vpow2.f32 %v1335_v43 }
 0x322   : > { %5072 = vpow2.f32 %v1123_v15  ;;  %4530 = vmatmul.msk.bf16.gmra.mxu1 %vm562_vm0, %v920_v26 }
 0x323   : > { %5074 = vpow2.f32 %v1333_v56 }
 0x324   : > { %v1532_v54 = vpop.xlane.xlu2 %1531  ;;  %v1529_v36 = vpop.xlane.xlu0 %1528 }
 0x325   : > { %v1552_v19 = vsub.f32 %v5806_v0, %v1532_v54  ;;  %v1551_v32 = vsub.f32 %v5796_v61, %v1529_v36 }
 0x327   : > { %v5071_v58 = vpop.eup %5070  ;;  %v1559_v1 = vmul.f32 1.442695, %v1551_v32  ;;  %906 = vadd.xlane.f32.xlu0 %v905_v35  ;;  %v1561_v37 = vmul.f32 1.442695, %v1552_v19 }
 0x328   : > { %v5918_v6 = vpop.eup %5072  ;;  %v1352_v7 = vsel %vm562_vm0, %v5071_v58, 0.0 }
 0x329   : > { %1353 = vadd.xlane.f32.xlu1 %v1352_v7  ;;  %v1154_v31 = vpack.c.bf16 %v5915_v34, %v5918_v6  ;;  %5076 = vpow2.f32 %v1559_v1  ;;  %v5075_v0 = vpop.eup %5074 }
 0x32a   : > { %5078 = vpow2.f32 %v1561_v37  ;;  %v1349_v61 = vsel %vm562_vm0, %v5075_v0, 0.0  ;;  %v1373_v30 = vpack.c.bf16 %v5071_v58, %v5075_v0 }
 0x32b   : > { %4538 = vmatmul.msk.bf16.gmra.mxu3 %vm562_vm0, %v1154_v31 }
 0x32c   : > { %v1604_v16 = vpop.permute.xlu2 %1603 }
 0x32f   : > { %1350 = vadd.xlane.f32.xlu0 %v1349_v61  ;;  %v5077_v20 = vpop.eup %5076 }
 0x330   : > { %v1575_v4 = vsel %vm562_vm0, %v5077_v20, 0.0  ;;  %v5079_v10 = vpop.eup %5078 }
 0x331   : > { %909 = vadd.xlane.f32.xlu1 %v908_v39  ;;  %1576 = vadd.xlane.f32.xlu2 %v1575_v4  ;;  %v1578_v33 = vsel %vm562_vm0, %v5079_v10, 0.0  ;;  %v1599_v62 = vpack.c.bf16 %v5079_v10, %v5077_v20 }
 0x332   : > { %4543 = vmatmul.msk.bf16.vlgmr.msra.gmra.mxu1 %vm562_vm0, %v1373_v30 }
 0x337   : > { %1579 = vadd.xlane.f32.xlu0 %v1578_v33  ;;  %v1608_v12 = vpop.permute.xlu0 %1607 }
 0x338   : > { %1632 = vmatpush.bf16.msra.mxu3 %v1608_v12 }
 0x339   : > { %1140 = vadd.xlane.f32.xlu2 %v1139_v24 }
 0x33c   : > { %1633 = vmatpush.bf16.msra.mxu3 %v1606_v14 }
 0x340   : > { %1634 = vmatpush.bf16.msra.mxu3 %v1604_v16 }
 0x343   : > { %4551 = vmatmul.msk.bf16.vlgmr.msra.gmra.mxu3 %vm562_vm0, %v1599_v62 }
 0x345   : > { %v1538_v18 = vpop.xlane.xlu1 %1537 }
 0x346   : > { %v1554_v50 = vsub.f32 %v5820_v52, %v1538_v18  ;;  %v1142_v18 = vsel %vm562_vm0, %v5897_v28, 0.0 }
 0x348   : > { %v1565_v17 = vmul.f32 1.442695, %v1554_v50 }
 0x34a   : > { %5080 = vpow2.f32 %v1565_v17 }
 0x34d   : > { %v1541_v27 = vpop.xlane.xlu1 %1540 }
 0x350   : > { %v5081_v52 = vpop.eup %5080 }
 0x351   : > { %v1584_v4 = vsel %vm562_vm0, %v5081_v52, 0.0 }
 0x355   : > { %v1315_v29 = vpop.xlane.xlu1 %1314 }
 0x356   : > { %v1329_v45 = vsub.f32 %v5824_v5, %v1315_v29 }
 0x358   : > { %v1341_v43 = vmul.f32 1.442695, %v1329_v45 }
 0x35d   : > { %v1547_v36 = vpop.xlane.xlu1 %1546 }
 0x35e   : > { %v1557_v17 = vsub.f32 %v5844_v42, %v1547_v36  ;;  %v914_v36 = vsel %vm562_vm0, %v5906_v53, 0.0 }
 0x362   : > { %v1535_v44 = vpop.xlane.xlu0 %1534 }
 0x363   : > { %v1553_v11 = vsub.f32 %v5814_v38, %v1535_v44  ;;  %v1555_v38 = vsub.f32 %v5828_v57, %v1541_v27  ;;  %v1571_v44 = vmul.f32 1.442695, %v1557_v17 }
 0x365   : > { %v1563_v22 = vmul.f32 1.442695, %v1553_v11  ;;  %v1309_v21 = vpop.xlane.xlu2 %1308  ;;  %v1324_v20 = vpop.xlane.xlu1 %1323 }
 0x366   : > { %v1327_v49 = vsub.f32 %v5812_v46, %v1309_v21  ;;  %v1332_v24 = vsub.f32 %v5854_v63, %v1324_v20  ;;  %v1145_v21 = vsel %vm562_vm0, %v5918_v6, 0.0 }
 0x367   : > { %5082 = vpow2.f32 %v1563_v22  ;;  %v5939_v32 = vpop.f32.mrf.mxu1 }
 0x368   : > { %v1337_v51 = vmul.f32 1.442695, %v1327_v49  ;;  %v1347_v29 = vmul.f32 1.442695, %v1332_v24 }
 0x36a   : > { %5084 = vpow2.f32 %v1337_v51  ;;  %v1312_v15 = vpop.xlane.xlu0 %1311 }
 0x36b   : > { %v1328_v56 = vsub.f32 %v5818_v25, %v1312_v15  ;;  %5086 = vpow2.f32 %v1341_v43  ;;  %v1567_v25 = vmul.f32 1.442695, %v1555_v38 }
 0x36d   : > { %v5083_v26 = vpop.eup %5082  ;;  %v1339_v54 = vmul.f32 1.442695, %v1328_v56  ;;  %v1550_v39 = vpop.xlane.xlu2 %1549 }
 0x36e   : > { %v1581_v5 = vsel %vm562_vm0, %v5083_v26, 0.0  ;;  %v1600_v19 = vpack.c.bf16 %v5081_v52, %v5083_v26  ;;  %v1558_v16 = vsub.f32 %v5865_v13, %v1550_v39  ;;  %v5960_v11 = vpop.xlane.xlu1 %1128 }
 0x36f   : > { %5088 = vpow2.f32 %v1339_v54  ;;  %1582 = vadd.xlane.f32.xlu1 %v1581_v5  ;;  %v5947_v30 = vpop.f32.mrf.mxu1 }
 0x370   : > { %v5085_v46 = vpop.eup %5084  ;;  %4552 = vmatmul.msk.bf16.gmra.mxu3 %vm562_vm0, %v1600_v19  ;;  %5090 = vpow2.f32 %v1567_v25 }
 0x371   : > { %v1355_v35 = vsel %vm562_vm0, %v5085_v46, 0.0  ;;  %v5087_v1 = vpop.eup %5086 }
 0x372   : > { %1356 = vadd.xlane.f32.xlu2 %v1355_v35  ;;  %v1544_v58 = vpop.xlane.xlu0 %1543  ;;  %v1361_v31 = vsel %vm562_vm0, %v5087_v1, 0.0 }
 0x373   : > { %v1556_v7 = vsub.f32 %v5835_v9, %v1544_v58 }
 0x375   : > { %v5089_v57 = vpop.eup %5088  ;;  %v1569_v37 = vmul.f32 1.442695, %v1556_v7  ;;  %v895_v43 = vpop.xlane.xlu2 %894 }
 0x376   : > { %v1358_v0 = vsel %vm562_vm0, %v5089_v57, 0.0  ;;  %v1374_v61 = vpack.c.bf16 %v5089_v57, %v5085_v46  ;;  %v5950_v9 = vpop.f32.mrf.mxu3  ;;  %v5091_v12 = vpop.eup %5090  ;;  %v911_v46 = vsel %vm562_vm0, %v5908_v55, 0.0 }
 0x377   : > { %5092 = vpow2.f32 %v1569_v37  ;;  %1362 = vadd.xlane.f32.xlu1 %v1361_v31  ;;  %1359 = vadd.xlane.f32.xlu0 %v1358_v0  ;;  %v1587_v42 = vsel %vm562_vm0, %v5091_v12, 0.0  ;;  %v901_v54 = vpop.xlane.xlu1 %900  ;;  %v1148_v37 = vsel %vm562_vm0, %v5915_v34, 0.0 }
 0x378   : > { %4544 = vmatmul.msk.bf16.gmra.mxu1 %vm562_vm0, %v1374_v61  ;;  %v971_v13 = vpop.f32.mrf.mxu1 }
 0x37a   : > { %1585 = vadd.xlane.f32.xlu2 %v1584_v4  ;;  %v1318_v10 = vpop.xlane.xlu0 %1317 }
 0x37b   : > { %v1330_v33 = vsub.f32 %v5833_v8, %v1318_v10  ;;  %v1573_v8 = vmul.f32 1.442695, %v1558_v16 }
 0x37d   : > { %v5093_v14 = vpop.eup %5092  ;;  %v1343_v62 = vmul.f32 1.442695, %v1330_v33  ;;  %v1132_v58 = vpop.xlane.xlu2 %1131 }
 0x37e   : > { %v1590_v27 = vsel %vm562_vm0, %v5093_v14, 0.0  ;;  %v1601_v50 = vpack.c.bf16 %v5093_v14, %v5091_v12  ;;  %v5962_v45 = vpop.f32.mrf.mxu3 }
 0x37f   : > { %5094 = vpow2.f32 %v1343_v62  ;;  %1143 = vadd.xlane.f32.xlu0 %v1142_v18  ;;  %1591 = vadd.xlane.f32.xlu1 %v1590_v27 }
 0x380   : > { %4553 = vmatmul.msk.bf16.gmra.mxu3 %vm562_vm0, %v1601_v50  ;;  %5096 = vpow2.f32 %v1347_v29  ;;  %v5970_v38 = vpop.f32.mrf.mxu1 }
 0x381   : > { %5098 = vpow2.f32 %v1573_v8 }
 0x382   : > { %v1321_v63 = vpop.xlane.xlu0 %1320  ;;  %5100 = vpow2.f32 %v1571_v44  ;;  %v1138_v44 = vpop.xlane.xlu1 %1137 }
 0x383   : > { %v1331_v22 = vsub.f32 %v5841_v23, %v1321_v63 }
 0x385   : > { %v5095_v28 = vpop.eup %5094  ;;  %v1345_v15 = vmul.f32 1.442695, %v1331_v22  ;;  %v5986_v39 = vpop.xlane.xlu2 %903 }
 0x386   : > { %v1364_v49 = vsel %vm562_vm0, %v5095_v28, 0.0  ;;  %v1375_v51 = vpack.c.bf16 %v5095_v28, %v5087_v1  ;;  %v5097_v56 = vpop.eup %5096  ;;  %v1193_v6 = vpop.f32.mrf.mxu3 }
 0x387   : > { %1588 = vadd.xlane.f32.xlu0 %v1587_v42  ;;  %1146 = vadd.xlane.f32.xlu1 %v1145_v21  ;;  %v5099_v26 = vpop.eup %5098  ;;  %5102 = vpow2.f32 %v1345_v15  ;;  %v1370_v5 = vsel %vm562_vm0, %v5097_v56, 0.0 }
 0x388   : > { %1365 = vadd.xlane.f32.xlu2 %v1364_v49  ;;  %4545 = vmatmul.msk.bf16.gmra.mxu1 %vm562_vm0, %v1375_v51  ;;  %v5101_v23 = vpop.eup %5100  ;;  %5104 = vrcp.f32 %v901_v54  ;;  %v1596_v4 = vsel %vm562_vm0, %v5099_v26, 0.0 }
 0x389   : > { %v1602_v19 = vpack.c.bf16 %v5099_v26, %v5101_v23  ;;  %v1593_v10 = vsel %vm562_vm0, %v5101_v23, 0.0 }
 0x38a   : > { %v898_v52 = vpop.xlane.xlu0 %897 }
 0x38d   : > { %v5103_v25 = vpop.eup %5102 }
 0x38e   : > { %v1367_v7 = vsel %vm562_vm0, %v5103_v25, 0.0  ;;  %v1376_v53 = vpack.c.bf16 %v5097_v56, %v5103_v25  ;;  %v5105_v57 = vpop.eup %5104  ;;  %v5981_v31 = vpop.f32.mrf.mxu3 }
 0x38f   : > { %915 = vadd.xlane.f32.xlu0 %v914_v36  ;;  %1371 = vadd.xlane.f32.xlu1 %v1370_v5  ;;  %v976_v1 = vpop.f32.mrf.mxu1  ;;  %v996_v0 = vmul.f32 %v5105_v57, %v971_v13 }
 0x390   : > { %912 = vadd.xlane.f32.xlu2 %v911_v46  ;;  %4554 = vmatmul.msk.bf16.gmra.mxu3 %vm562_vm0, %v1602_v19 }
 0x392   : > { %v1135_v35 = vpop.xlane.xlu0 %1134 }
 0x393   : > { %5106 = vrcp.f32 %v1135_v35 }
 0x397   : > { %1368 = vadd.xlane.f32.xlu0 %v1367_v7  ;;  %v5990_v33 = vpop.f32.mrf.mxu1 }
 0x398   : > { %1149 = vadd.xlane.f32.xlu2 %v1148_v37  ;;  %4546 = vmatmul.msk.bf16.gmra.mxu1 %vm562_vm0, %v1376_v53 }
 0x399   : > { %v5107_v55 = vpop.eup %5106 }
 0x39a   : > { %v1218_v61 = vmul.f32 %v5107_v55, %v1193_v6  ;;  %v907_v24 = vpop.xlane.xlu0 %906 }
 0x39b   : > { %5108 = vrcp.f32 %v907_v24 }
 0x39c   : > { %v5984_v20 = vadd.f32 %v1218_v61, %v996_v0  ;;  %v1354_v49 = vpop.xlane.xlu1 %1353 }
 0x39d   : > { %v1198_v34 = vpop.f32.mrf.mxu3 }
 0x39f   : > { %1597 = vadd.xlane.f32.xlu0 %v1596_v4  ;;  %v5992_v14 = vpop.f32.mrf.mxu1 }
 0x3a0   : > { %1594 = vadd.xlane.f32.xlu2 %v1593_v10 }
 0x3a1   : > { %v5109_v18 = vpop.eup %5108 }
 0x3a2   : > { %v998_v29 = vmul.f32 %v5109_v18, %v976_v1  ;;  %v1351_v13 = vpop.xlane.xlu0 %1350 }
 0x3a4   : > { %v1577_v12 = vpop.xlane.xlu2 %1576 }
 0x3a5   : > { %v5994_v16 = vpop.f32.mrf.mxu3 }
 0x3a7   : > { %v5996_v50 = vpop.f32.mrf.mxu1 }
 0x3aa   : > { %v1580_v23 = vpop.xlane.xlu0 %1579 }
 0x3ac   : > { %v1141_v62 = vpop.xlane.xlu2 %1140 }
 0x3ad   : > { %5110 = vrcp.f32 %v1141_v62 }
 0x3ae   : > { %v5998_v17 = vpop.f32.mrf.mxu3  ;;  %5112 = vrcp.f32 %v895_v43 }
 0x3af   : > { %5114 = vrcp.f32 %v5960_v11  ;;  %v1414_v22 = vpop.f32.mrf.mxu1  ;;  %v6010_v11 = vld [vmem:[%s7447_s5] sm:$0x3f] }
 0x3b0   : > { %5116 = vrcp.f32 %v1351_v13 }
 0x3b1   : > { %5118 = vrcp.f32 %v898_v52 }
 0x3b2   : > { %5120 = vrcp.f32 %v1577_v12 }
 0x3b3   : > { %v5111_v27 = vpop.eup %5110  ;;  %5122 = vrcp.f32 %v1132_v58 }
 0x3b4   : > { %v1220_v8 = vmul.f32 %v5111_v27, %v1198_v34  ;;  %v5113_v28 = vpop.eup %5112  ;;  %5124 = vrcp.f32 %v1354_v49 }
 0x3b5   : > { %v5115_v21 = vpop.eup %5114  ;;  %v994_v51 = vmul.f32 %v5113_v28, %v5939_v32  ;;  %v6013_v32 = vperm.slane %v6010_v11, 0  ;;  %5126 = vrcp.f32 %v1580_v23 }
 0x3b6   : > { %v6000_v63 = vadd.f32 %v1220_v8, %v998_v29  ;;  %v6003_v42 = vpop.f32.mrf.mxu3  ;;  %v5117_v15 = vpop.eup %5116  ;;  %v1216_v56 = vmul.f32 %v5115_v21, %v5950_v9 }
 0x3b7   : > { %v1442_v43 = vmul.f32 %v5117_v15, %v1414_v22  ;;  %v5119_v26 = vpop.eup %5118  ;;  %v1416_v9 = vpop.f32.mrf.mxu1 }
 0x3b8   : > { %v1224_v54 = vadd.f32 %v1216_v56, %v994_v51  ;;  %v5121_v52 = vpop.eup %5120  ;;  %v995_v46 = vmul.f32 %v5119_v26, %v5947_v30 }
 0x3b9   : > { %v5123_v19 = vpop.eup %5122 }
 0x3ba   : > { %v1450_v36 = vadd.f32 %v1442_v43, %v1224_v54  ;;  %v5125_v25 = vpop.eup %5124  ;;  %v1217_v58 = vmul.f32 %v5123_v19, %v5962_v45 }
 0x3bb   : > { %v1443_v1 = vmul.f32 %v5125_v25, %v1416_v9  ;;  %v5127_v37 = vpop.eup %5126 }
 0x3bc   : > { %v1225_v53 = vadd.f32 %v1217_v58, %v995_v46 }
 0x3be   : > { %v1451_v0 = vadd.f32 %v1443_v1, %v1225_v53 }
 0x3c6   : > { %v1636_v6 = vpop.f32.mrf.mxu3 }
 0x3c7   : > { %v1664_v5 = vmul.f32 %v5121_v52, %v1636_v6 }
 0x3c9   : > { %v1672_v35 = vadd.f32 %v1664_v5, %v1450_v36 }
 0x3cb   : > { %v1681_v7 = vadd.f32 %v6013_v32, %v1672_v35 }
 0x3cd   : > { %v6019_v57 = vadd.f32 %v1681_v7, %v5509_v40  ;;  %v910_v40 = vpop.xlane.xlu1 %909 }
 0x3ce   : > { %v1638_v55 = vpop.f32.mrf.mxu3 }
 0x3cf   : > { %v1665_v61 = vmul.f32 %v5127_v37, %v1638_v55  ;;  %v1697_v4 = vsel %vm562_vm0, %v6019_v57, 0.0 }
 0x3d0   : > { %1698 = vadd.xlane.f32.xlu1 %v1697_v4 }
 0x3d1   : > { %v1673_v30 = vadd.f32 %v1665_v61, %v1451_v0 }
 0x3d3   : > { %v1682_v10 = vadd.f32 %v6013_v32, %v1673_v30 }
 0x3d5   : > { %v6025_v45 = vadd.f32 %v1682_v10, %v5511_v41 }
 0x3d7   : > { %v1700_v34 = vsel %vm562_vm0, %v6025_v45, 0.0 }
 0x3d8   : > { %1701 = vadd.xlane.f32.xlu2 %v1700_v34 }
 0x3e2   : > { %v1583_v62 = vpop.xlane.xlu1 %1582 }
 0x3e5   : > { %v1357_v12 = vpop.xlane.xlu2 %1356 }
 0x3e6   : > { %5128 = vrcp.f32 %v1357_v12 }
 0x3e7   : > { %5130 = vrcp.f32 %v5986_v39 }
 0x3e8   : > { %5132 = vrcp.f32 %v1583_v62 }
 0x3e9   : > { %5134 = vrcp.f32 %v1138_v44 }
 0x3ea   : > { %v1360_v24 = vpop.xlane.xlu0 %1359  ;;  %v1363_v21 = vpop.xlane.xlu1 %1362 }
 0x3eb   : > { %5136 = vrcp.f32 %v1360_v24 }
 0x3ec   : > { %v5129_v8 = vpop.eup %5128 }
 0x3ed   : > { %v1586_v27 = vpop.xlane.xlu2 %1585  ;;  %v5131_v41 = vpop.eup %5130 }
 0x3ee   : > { %v5133_v22 = vpop.eup %5132  ;;  %5138 = vrcp.f32 %v1586_v27  ;;  %v997_v56 = vmul.f32 %v5131_v41, %v5970_v38 }
 0x3ef   : > { %v5135_v15 = vpop.eup %5134  ;;  %5140 = vrcp.f32 %v1363_v21 }
 0x3f0   : > { %v1219_v39 = vmul.f32 %v5135_v15, %v5981_v31 }
 0x3f1   : > { %v5137_v52 = vpop.eup %5136 }
 0x3f2   : > { %v1144_v18 = vpop.xlane.xlu0 %1143  ;;  %v1227_v36 = vadd.f32 %v1219_v39, %v997_v56  ;;  %v1592_v46 = vpop.xlane.xlu1 %1591 }
 0x3f3   : > { %v1641_v29 = vpop.f32.mrf.mxu3  ;;  %5142 = vrcp.f32 %v1144_v18 }
 0x3f4   : > { %v1666_v49 = vmul.f32 %v5133_v22, %v1641_v29 }
 0x3f5   : > { %v1419_v13 = vpop.f32.mrf.mxu1 }
 0x3f6   : > { %v1444_v28 = vmul.f32 %v5129_v8, %v1419_v13 }
 0x3f8   : > { %v1452_v51 = vadd.f32 %v1444_v28, %v5984_v20  ;;  %v5139_v20 = vpop.eup %5138 }
 0x3f9   : > { %v5141_v7 = vpop.eup %5140 }
 0x3fa   : > { %v1674_v43 = vadd.f32 %v1666_v49, %v1452_v51  ;;  %v1589_v44 = vpop.xlane.xlu0 %1588  ;;  %v5143_v37 = vpop.eup %5142 }
 0x3fb   : > { %v1366_v26 = vpop.xlane.xlu2 %1365  ;;  %v1643_v23 = vpop.f32.mrf.mxu3  ;;  %5144 = vrcp.f32 %v1589_v44  ;;  %v1221_v12 = vmul.f32 %v5143_v37, %v5994_v16 }
 0x3fc   : > { %v1683_v54 = vadd.f32 %v6013_v32, %v1674_v43  ;;  %v1667_v9 = vmul.f32 %v5139_v20, %v1643_v23  ;;  %5146 = vrcp.f32 %v910_v40  ;;  %v1147_v24 = vpop.xlane.xlu1 %1146 }
 0x3fd   : > { %v1421_v6 = vpop.f32.mrf.mxu1  ;;  %5148 = vrcp.f32 %v1366_v26 }
 0x3fe   : > { %v1445_v5 = vmul.f32 %v5137_v52, %v1421_v6  ;;  %v6035_v19 = vadd.f32 %v1683_v54, %v5517_v47  ;;  %5150 = vrcp.f32 %v1592_v46 }
 0x400   : > { %v1453_v38 = vadd.f32 %v1445_v5, %v1227_v36  ;;  %v1703_v31 = vsel %vm562_vm0, %v6035_v19, 0.0 }
 0x401   : > { %1704 = vadd.xlane.f32.xlu0 %v1703_v31  ;;  %v5145_v61 = vpop.eup %5144 }
 0x402   : > { %v1675_v35 = vadd.f32 %v1667_v9, %v1453_v38  ;;  %v6039_v25 = vpop.xlane.xlu0 %915  ;;  %v5147_v34 = vpop.eup %5146 }
 0x403   : > { %v913_v58 = vpop.xlane.xlu2 %912  ;;  %v1646_v1 = vpop.f32.mrf.mxu3 }
 0x404   : > { %v1684_v47 = vadd.f32 %v6013_v32, %v1675_v35  ;;  %v1668_v4 = vmul.f32 %v5145_v61, %v1646_v1  ;;  %5152 = vrcp.f32 %v913_v58  ;;  %v5149_v29 = vpop.eup %5148  ;;  %v1372_v58 = vpop.xlane.xlu1 %1371 }
 0x405   : > { %v1424_v53 = vpop.f32.mrf.mxu1  ;;  %5154 = vrcp.f32 %v1147_v24  ;;  %v5151_v22 = vpop.eup %5150 }
 0x406   : > { %v1446_v55 = vmul.f32 %v5141_v7, %v1424_v53  ;;  %v6043_v0 = vadd.f32 %v1684_v47, %v5519_v48  ;;  %v999_v48 = vmul.f32 %v5147_v34, %v5990_v33 }
 0x408   : > { %v1454_v30 = vadd.f32 %v1446_v55, %v6000_v63  ;;  %v1706_v10 = vsel %vm562_vm0, %v6043_v0, 0.0  ;;  %v1229_v13 = vadd.f32 %v1221_v12, %v999_v48 }
 0x409   : > { %1707 = vadd.xlane.f32.xlu1 %v1706_v10 }
 0x40a   : > { %v1676_v40 = vadd.f32 %v1668_v4, %v1454_v30  ;;  %v1369_v18 = vpop.xlane.xlu0 %1368  ;;  %v5153_v33 = vpop.eup %5152 }
 0x40b   : > { %v1150_v62 = vpop.xlane.xlu2 %1149  ;;  %v1648_v8 = vpop.f32.mrf.mxu3  ;;  %5156 = vrcp.f32 %v1369_v18  ;;  %v1000_v43 = vmul.f32 %v5153_v33, %v5992_v14 }
 0x40c   : > { %v1685_v27 = vadd.f32 %v6013_v32, %v1676_v40  ;;  %v1669_v16 = vmul.f32 %v5151_v22, %v1648_v8  ;;  %v5155_v56 = vpop.eup %5154 }
 0x40d   : > { %v1426_v63 = vpop.f32.mrf.mxu1  ;;  %v1222_v23 = vmul.f32 %v5155_v56, %v5998_v17  ;;  %v5380_v17 = vmov 64.0  }
 0x40e   : > { %v1447_v41 = vmul.f32 %v5149_v29, %v1426_v63  ;;  %v6052_v28 = vadd.f32 %v1685_v27, %v5537_v59 }
 0x40f   : > { %v1230_v6 = vadd.f32 %v1222_v23, %v1000_v43 }
 0x410   : > { %v1455_v21 = vadd.f32 %v1447_v41, %v1229_v13  ;;  %v1709_v49 = vsel %vm562_vm0, %v6052_v28, 0.0 }
 0x411   : > { %1710 = vadd.xlane.f32.xlu2 %v1709_v49  ;;  %v5157_v59 = vpop.eup %5156 }
 0x412   : > { %v1677_v51 = vadd.f32 %v1669_v16, %v1455_v21  ;;  %v1598_v53 = vpop.xlane.xlu0 %1597 }
 0x413   : > { %v1595_v15 = vpop.xlane.xlu2 %1594  ;;  %v1651_v5 = vpop.f32.mrf.mxu3 }
 0x414   : > { %5158 = vrcp.f32 %v1595_v15  ;;  %v1686_v39 = vadd.f32 %v6013_v32, %v1677_v51 }
 0x415   : > { %v1429_v44 = vpop.f32.mrf.mxu1  ;;  %5160 = vrcp.f32 %v5380_v17  ;;  %v4960_v17 = vld [vmem:[%s7448_s6 + $0x34] sm:$0xf] }
 0x416   : > { %v6059_v26 = vadd.f32 %v1686_v39, %v5539_v60  ;;  %v1448_v54 = vmul.f32 %v5157_v59, %v1429_v44  ;;  %5162 = vrcp.f32 %v1150_v62 }
 0x417   : > { %5164 = vrcp.f32 %v6039_v25 }
 0x418   : > { %v1712_v52 = vsel %vm562_vm0, %v6059_v26, 0.0  ;;  %v1456_v9 = vadd.f32 %v1448_v54, %v1230_v6  ;;  %5166 = vrcp.f32 %v1372_v58  ;;  %v4573_v58 = vld [vmem:[%s7448_s6 + $0x20] sm:$0xf] }
 0x419   : > { %1713 = vadd.xlane.f32.xlu0 %v1712_v52  ;;  %5168 = vrcp.f32 %v1598_v53  ;;  %v4575_v53 = vld [vmem:[%s7448_s6 + $0x28] sm:$0xf0] }
 0x41a   : > { %v5159_v36 = vpop.eup %5158 }
 0x41b   : > { %v1670_v20 = vmul.f32 %v5159_v36, %v1651_v5  ;;  %v5161_v46 = vpop.eup %5160  ;;  %v1653_v40 = vpop.f32.mrf.mxu3 }
 0x41c   : > { %v1722_v35 = vmul.f32 64.0, %v5161_v46  ;;  %v5163_v47 = vpop.eup %5162  ;;  %vm1726_vm2 = vweird.f32 %v5161_v46 }
 0x41d   : > { %v1678_v38 = vadd.f32 %v1670_v20, %v1456_v9  ;;  %v5165_v37 = vpop.eup %5164  ;;  %v1223_v55 = vmul.f32 %v5163_v47, %v6003_v42  ;;  %v4958_v47 = vld [vmem:[%s7448_s6 + $0x24] sm:$0xf] }
 0x41e   : > { %v1723_v1 = vsub.f32 1.0, %v1722_v35  ;;  %v5167_v61 = vpop.eup %5166  ;;  %v1001_v30 = vmul.f32 %v5165_v37, %v5996_v50  ;;  %v4578_v37 = vor.u32 %v4958_v47, %v4575_v53 }
 0x41f   : > { %v1687_v14 = vadd.f32 %v6013_v32, %v1678_v38  ;;  %v5169_v24 = vpop.eup %5168 }
 0x420   : > { %v1724_v7 = vmul.f32 %v5161_v46, %v1723_v1  ;;  %v1231_v34 = vadd.f32 %v1223_v55, %v1001_v30  ;;  %v1671_v18 = vmul.f32 %v5169_v24, %v1653_v40  ;;  %v4959_v1 = vld [vmem:[%s7448_s6 + $0x24] sm:$0xf0]  ;;  %v4957_v55 = vld [vmem:[%s7448_s6 + $0x14] sm:$0xf0]  ;;  %v4557_v24 = vld [vmem:[%s7448_s6] sm:$0xf] }
 0x421   : > { %v6066_v31 = vadd.f32 %v1687_v14, %v5547_v3  ;;  %v1431_v3 = vpop.f32.mrf.mxu1 }
 0x422   : > { %v1725_v4 = vadd.f32 %v5161_v46, %v1724_v7  ;;  %v1449_v10 = vmul.f32 %v5167_v61, %v1431_v3  ;;  %v4574_v7 = vor.u32 %v4959_v1, %v4573_v58  ;;  %v4565_v3 = vld [vmem:[%s7448_s6 + $0x10] sm:$0xf]  ;;  %v4956_v61 = vld [vmem:[%s7448_s6 + $0x14] sm:$0xf] }
 0x423   : > { %v1715_v60 = vsel %vm562_vm0, %v6066_v31, 0.0  ;;  %v4566_v30 = vor.u32 %v4957_v55, %v4565_v3 }
 0x424   : > { %1716 = vadd.xlane.f32.xlu0 %v1715_v60  ;;  %v6073_v12 = vsel %vm1726_vm2, %v5161_v46, %v1725_v4  ;;  %v1457_v25 = vadd.f32 %v1449_v10, %v1231_v34  ;;  %v4961_v60 = vld [vmem:[%s7448_s6 + $0x34] sm:$0xf0]  ;;  %v4583_v46 = vld [vmem:[%s7448_s6 + $0x38] sm:$0xf0] }
 0x425   : > { %v4586_v35 = vor.u32 %v4960_v17, %v4583_v46  ;;  %v4567_v10 = vld [vmem:[%s7448_s6 + $0x18] sm:$0xf0] }
 0x426   : > { %v1679_v27 = vadd.f32 %v1671_v18, %v1457_v25  ;;  %v4570_v40 = vor.u32 %v4956_v61, %v4567_v10 }
 0x427   : > { %1992 = vmatpush.bf16.msrb.mxu1 %v4586_v35 }
 0x428   : > { %v1688_v8 = vadd.f32 %v6013_v32, %v1679_v27  ;;  %v4559_v27 = vld [vmem:[%s7448_s6 + $0x8] sm:$0xf0] }
 0x42a   : > { %v6088_v22 = vadd.f32 %v1688_v8, %v5545_v2 }
 0x42b   : > { %1993 = vmatpush.bf16.msrb.mxu1 %v4578_v37 }
 0x42c   : > { %v1718_v21 = vsel %vm562_vm0, %v6088_v22, 0.0 }
 0x42f   : > { %1994 = vmatpush.bf16.msrb.mxu1 %v4570_v40 }
 0x443   : > { %v1699_v62 = vpop.xlane.xlu1 %1698 }
 0x444   : > { %v1728_v48 = vmul.f32 %v6073_v12, %v1699_v62  ;;  %v4955_v62 = vld [vmem:[%s7448_s6 + $0x4] sm:$0xf0] }
 0x445   : > { %v4558_v18 = vor.u32 %v4955_v62, %v4557_v24 }
 0x446   : > { %v6077_v42 = vsub.f32 %v6019_v57, %v1728_v48  ;;  %v4954_v48 = vld [vmem:[%s7448_s6 + $0x4] sm:$0xf] }
 0x448   : > { %v1744_v29 = vmul.f32 %v6077_v42, %v6077_v42 }
 0x44a   : > { %v1752_v50 = vsel %vm562_vm0, %v1744_v29, 0.0  ;;  %v4562_v29 = vor.u32 %v4954_v48, %v4559_v27 }
 0x44b   : > { %v1702_v63 = vpop.xlane.xlu2 %1701  ;;  %1753 = vadd.xlane.f32.xlu1 %v1752_v50 }
 0x44c   : > { %v1729_v13 = vmul.f32 %v6073_v12, %v1702_v63  ;;  %1995 = vmatpush.bf16.msrb.mxu1 %v4562_v29 }
 0x44e   : > { %v6085_v41 = vsub.f32 %v6025_v45, %v1729_v13 }
 0x450   : > { %v1745_v57 = vmul.f32 %v6085_v41, %v6085_v41 }
 0x452   : > { %v1755_v16 = vsel %vm562_vm0, %v1745_v57, 0.0 }
 0x453   : > { %1756 = vadd.xlane.f32.xlu2 %v1755_v16  ;;  %1719 = vadd.xlane.f32.xlu1 %v1718_v21 }
 0x474   : > { %v1705_v32 = vpop.xlane.xlu0 %1704 }
 0x475   : > { %v1730_v49 = vmul.f32 %v6073_v12, %v1705_v32 }
 0x477   : > { %v6097_v33 = vsub.f32 %v6035_v19, %v1730_v49 }
 0x479   : > { %v1746_v2 = vmul.f32 %v6097_v33, %v6097_v33 }
 0x47b   : > { %v1758_v45 = vsel %vm562_vm0, %v1746_v2, 0.0 }
 0x47c   : > { %v1708_v51 = vpop.xlane.xlu1 %1707  ;;  %1759 = vadd.xlane.f32.xlu2 %v1758_v45 }
 0x47d   : > { %v1731_v15 = vmul.f32 %v6073_v12, %v1708_v51 }
 0x47f   : > { %v6104_v56 = vsub.f32 %v6043_v0, %v1731_v15 }
 0x481   : > { %v1747_v39 = vmul.f32 %v6104_v56, %v6104_v56 }
 0x483   : > { %v1761_v43 = vsel %vm562_vm0, %v1747_v39, 0.0 }
 0x484   : > { %v1711_v44 = vpop.xlane.xlu2 %1710  ;;  %1762 = vadd.xlane.f32.xlu0 %v1761_v43 }
 0x485   : > { %v1732_v19 = vmul.f32 %v6073_v12, %v1711_v44 }
 0x487   : > { %v6111_v59 = vsub.f32 %v6052_v28, %v1732_v19 }
 0x489   : > { %v1748_v23 = vmul.f32 %v6111_v59, %v6111_v59 }
 0x48b   : > { %v1764_v54 = vsel %vm562_vm0, %v1748_v23, 0.0 }
 0x48c   : > { %1765 = vadd.xlane.f32.xlu1 %v1764_v54  ;;  %v1714_v0 = vpop.xlane.xlu0 %1713 }
 0x48d   : > { %v1733_v52 = vmul.f32 %v6073_v12, %v1714_v0  ;;  %v6188_v0 = vperm.slane %v6010_v11, 1 }
 0x48f   : > { %v6118_v6 = vsub.f32 %v6059_v26, %v1733_v52  ;;  %v4581_v26 = vld [vmem:[%s7448_s6 + $0x30] sm:$0xf] }
 0x491   : > { %v1749_v36 = vmul.f32 %v6118_v6, %v6118_v6 }
 0x493   : > { %v1767_v5 = vsel %vm562_vm0, %v1749_v36, 0.0 }
 0x494   : > { %1768 = vadd.xlane.f32.xlu2 %v1767_v5 }
 0x497   : > { %v1717_v28 = vpop.xlane.xlu0 %1716 }
 0x498   : > { %v1734_v20 = vmul.f32 %v6073_v12, %v1717_v28  ;;  %v6192_v28 = vperm.slane %v6010_v11, 2 }
 0x49a   : > { %v6125_v9 = vsub.f32 %v6066_v31, %v1734_v20  ;;  %v4582_v31 = vor.u32 %v4961_v60, %v4581_v26 }
 0x49c   : > { %v1750_v38 = vmul.f32 %v6125_v9, %v6125_v9  ;;  %1963 = vmatpush.bf16.msrb.mxu0 %v4582_v31 }
 0x49e   : > { %v1770_v14 = vsel %vm562_vm0, %v1750_v38, 0.0 }
 0x49f   : > { %1771 = vadd.xlane.f32.xlu0 %v1770_v14 }
 0x4a0   : > { %1964 = vmatpush.bf16.msrb.mxu0 %v4574_v7 }
 0x4a4   : > { %1965 = vmatpush.bf16.msrb.mxu0 %v4566_v30 }
 0x4a8   : > { %1966 = vmatpush.bf16.msrb.mxu0 %v4558_v18 }
 0x4be   : > { %v1754_v4 = vpop.xlane.xlu1 %1753 }
 0x4bf   : > { %v1776_v34 = vmul.f32 %v1754_v4, %v6073_v12 }
 0x4c1   : > { %v1784_v25 = vadd.f32 1e-05, %v1776_v34 }
 0x4c3   : > { %5170 = vrsqrt.f32 %v1784_v25  ;;  %vm1798_vm4 = vweird.f32 %v1784_v25 }
 0x4c6   : > { %v1757_v50 = vpop.xlane.xlu2 %1756  ;;  %v1720_v8 = vpop.xlane.xlu1 %1719 }
 0x4c7   : > { %v1777_v63 = vmul.f32 %v1757_v50, %v6073_v12  ;;  %v1735_v13 = vmul.f32 %v6073_v12, %v1720_v8 }
 0x4c9   : > { %v5171_v57 = vpop.eup %5170  ;;  %v1785_v16 = vadd.f32 1e-05, %v1777_v63  ;;  %v6182_v21 = vsub.f32 %v6088_v22, %v1735_v13 }
 0x4ca   : > { %v1793_v32 = vmul.f32 %v5171_v57, %v1784_v25  ;;  %vm1799_vm3 = vweird.f32 %v5171_v57 }
 0x4cb   : > { %5172 = vrsqrt.f32 %v1785_v16  ;;  %v1751_v49 = vmul.f32 %v6182_v21, %v6182_v21  ;;  %vm1800_vm5 = vmor %vm1798_vm4, %vm1799_vm3  ;;  %vm1808_vm7 = vweird.f32 %v1785_v16 }
 0x4cc   : > { %v1794_v2 = vmul.f32 %v5171_v57, %v1793_v32 }
 0x4cd   : > { %v1773_v45 = vsel %vm562_vm0, %v1751_v49, 0.0 }
 0x4ce   : > { %v1795_v51 = vmul.f32 0.5, %v1794_v2  ;;  %1774 = vadd.xlane.f32.xlu1 %v1773_v45 }
 0x4d0   : > { %v1796_v15 = vsub.f32 1.5, %v1795_v51 }
 0x4d1   : > { %v5173_v39 = vpop.eup %5172 }
 0x4d2   : > { %v1797_v43 = vmul.f32 %v5171_v57, %v1796_v15  ;;  %v1803_v44 = vmul.f32 %v5173_v39, %v1785_v16  ;;  %vm1809_vm6 = vweird.f32 %v5173_v39 }
 0x4d3   : > { %vm1810_vm8 = vmor %vm1808_vm7, %vm1809_vm6 }
 0x4d4   : > { %v1804_v19 = vmul.f32 %v5173_v39, %v1803_v44  ;;  %v1801_v22 = vsel %vm1800_vm5, %v5171_v57, %v1797_v43 }
 0x4d5   : > { %v1872_v52 = vmul.f32 %v1801_v22, %v6077_v42 }
 0x4d6   : > { %v1805_v23 = vmul.f32 0.5, %v1804_v19 }
 0x4d7   : > { %v1881_v20 = vmul.f32 %v6188_v0, %v1872_v52 }
 0x4d8   : > { %v1806_v54 = vsub.f32 1.5, %v1805_v23 }
 0x4d9   : > { %v6198_v26 = vadd.f32 %v6192_v28, %v1881_v20 }
 0x4da   : > { %v1807_v36 = vmul.f32 %v5173_v39, %v1806_v54 }
 0x4dc   : > { %v1811_v5 = vsel %vm1810_vm8, %v5173_v39, %v1807_v36 }
 0x4dd   : > { %v1873_v38 = vmul.f32 %v1811_v5, %v6085_v41 }
 0x4df   : > { %v1882_v14 = vmul.f32 %v6188_v0, %v1873_v38 }
 0x4e1   : > { %v6201_v60 = vadd.f32 %v6192_v28, %v1882_v14 }
 0x4e3   : > { %v1898_v42 = vpack.c.bf16 %v6201_v60, %v6198_v26 }
 0x4e5   : > { %4587 = vmatmul.msk.bf16.vlgmr.msrb.gmra.mxu0 %vm562_vm0, %v1898_v42  ;;  %4591 = vmatmul.msk.bf16.vlgmr.msrb.gmra.mxu1 %vm562_vm0, %v1898_v42 }
 0x4ef   : > { %v1760_v17 = vpop.xlane.xlu2 %1759 }
 0x4f0   : > { %v1778_v31 = vmul.f32 %v1760_v17, %v6073_v12 }
 0x4f2   : > { %v1786_v46 = vadd.f32 1e-05, %v1778_v31  ;;  %v4969_v31 = vld [vmem:[%s7450_s8 + $0x38] sm:$0xff] }
 0x4f3   : > { %2138 = vmatpush.bf16.msrb.mxu2 %v4969_v31 }
 0x4f4   : > { %5174 = vrsqrt.f32 %v1786_v46  ;;  %vm1818_vm10 = vweird.f32 %v1786_v46 }
 0x4f7   : > { %v1763_v41 = vpop.xlane.xlu0 %1762 }
 0x4f8   : > { %v1779_v35 = vmul.f32 %v1763_v41, %v6073_v12  ;;  %v4968_v41 = vld [vmem:[%s7450_s8 + $0x30] sm:$0xff] }
 0x4f9   : > { %2139 = vmatpush.bf16.msrb.mxu2 %v4968_v41 }
 0x4fa   : > { %v5175_v58 = vpop.eup %5174  ;;  %v1787_v1 = vadd.f32 1e-05, %v1779_v35  ;;  %v4976_v35 = vld [vmem:[%s7450_s8 + $0x70] sm:$0xff] }
 0x4fb   : > { %v1813_v47 = vmul.f32 %v5175_v58, %v1786_v46  ;;  %vm1819_vm9 = vweird.f32 %v5175_v58  ;;  %v4977_v46 = vld [vmem:[%s7450_s8 + $0x78] sm:$0xff] }
 0x4fc   : > { %5176 = vrsqrt.f32 %v1787_v1  ;;  %vm1820_vm11 = vmor %vm1818_vm10, %vm1819_vm9  ;;  %vm1828_vm13 = vweird.f32 %v1787_v1  ;;  %2167 = vmatpush.bf16.msrb.mxu3 %v4977_v46 }
 0x4fd   : > { %v1814_v7 = vmul.f32 %v5175_v58, %v1813_v47 }
 0x4ff   : > { %v1815_v53 = vmul.f32 0.5, %v1814_v7  ;;  %v1766_v37 = vpop.xlane.xlu1 %1765  ;;  %v4966_v7 = vld [vmem:[%s7450_s8 + $0x20] sm:$0xff] }
 0x500   : > { %v1780_v3 = vmul.f32 %v1766_v37, %v6073_v12  ;;  %2168 = vmatpush.bf16.msrb.mxu3 %v4976_v35 }
 0x501   : > { %v1816_v55 = vsub.f32 1.5, %v1815_v53  ;;  %v4974_v53 = vld [vmem:[%s7450_s8 + $0x60] sm:$0xff] }
 0x502   : > { %v5177_v61 = vpop.eup %5176  ;;  %v1788_v4 = vadd.f32 1e-05, %v1780_v3 }
 0x503   : > { %v1817_v30 = vmul.f32 %v5175_v58, %v1816_v55  ;;  %v1823_v10 = vmul.f32 %v5177_v61, %v1787_v1  ;;  %vm1829_vm12 = vweird.f32 %v5177_v61  ;;  %v4975_v1 = vld [vmem:[%s7450_s8 + $0x68] sm:$0xff] }
 0x504   : > { %5178 = vrsqrt.f32 %v1788_v4  ;;  %vm1830_vm14 = vmor %vm1828_vm13, %vm1829_vm12  ;;  %vm1838_vm2 = vweird.f32 %v1788_v4  ;;  %2169 = vmatpush.bf16.msrb.mxu3 %v4975_v1 }
 0x505   : > { %v1824_v34 = vmul.f32 %v5177_v61, %v1823_v10  ;;  %v1821_v40 = vsel %vm1820_vm11, %v5175_v58, %v1817_v30  ;;  %v4967_v58 = vld [vmem:[%s7450_s8 + $0x28] sm:$0xff]  ;;  %v4973_v30 = vld [vmem:[%s7450_s8 + $0x58] sm:$0xff] }
 0x506   : > { %v1874_v27 = vmul.f32 %v1821_v40, %v6097_v33  ;;  %2140 = vmatpush.bf16.msrb.mxu2 %v4967_v58  ;;  %v4964_v40 = vld [vmem:[%s7450_s8 + $0x10] sm:$0xff] }
 0x507   : > { %v1825_v25 = vmul.f32 0.5, %v1824_v34  ;;  %v1769_v24 = vpop.xlane.xlu2 %1768 }
 0x508   : > { %v1781_v62 = vmul.f32 %v1769_v24, %v6073_v12  ;;  %v1883_v16 = vmul.f32 %v6188_v0, %v1874_v27  ;;  %2170 = vmatpush.bf16.msrb.mxu3 %v4974_v53 }
 0x509   : > { %v1826_v18 = vsub.f32 1.5, %v1825_v25  ;;  %v4972_v25 = vld [vmem:[%s7450_s8 + $0x50] sm:$0xff] }
 0x50a   : > { %v5179_v48 = vpop.eup %5178  ;;  %v1789_v29 = vadd.f32 1e-05, %v1781_v62  ;;  %v6216_v51 = vadd.f32 %v6192_v28, %v1883_v16  ;;  %2141 = vmatpush.bf16.msrb.mxu2 %v4966_v7  ;;  %v4963_v62 = vld [vmem:[%s7450_s8 + $0x8] sm:$0xff] }
 0x50b   : > { %v1827_v50 = vmul.f32 %v5177_v61, %v1826_v18  ;;  %v1833_v8 = vmul.f32 %v5179_v48, %v1788_v4  ;;  %vm1839_vm15 = vweird.f32 %v5179_v48  ;;  %v4965_v4 = vld [vmem:[%s7450_s8 + $0x18] sm:$0xff]  ;;  %v4971_v18 = vld [vmem:[%s7450_s8 + $0x48] sm:$0xff] }
 0x50c   : > { %5180 = vrsqrt.f32 %v1789_v29  ;;  %vm1840_vm3 = vmor %vm1838_vm2, %vm1839_vm15  ;;  %vm1848_vm5 = vweird.f32 %v1789_v29  ;;  %2171 = vmatpush.bf16.msrb.mxu3 %v4973_v30 }
 0x50d   : > { %v1831_v63 = vsel %vm1830_vm14, %v5177_v61, %v1827_v50  ;;  %v1834_v13 = vmul.f32 %v5179_v48, %v1833_v8  ;;  %v4962_v50 = vld [vmem:[%s7450_s8] sm:$0xff] }
 0x50e   : > { %v1875_v57 = vmul.f32 %v1831_v63, %v6104_v56  ;;  %2142 = vmatpush.bf16.msrb.mxu2 %v4965_v4  ;;  %v4970_v8 = vld [vmem:[%s7450_s8 + $0x40] sm:$0xff] }
 0x50f   : > { %v1835_v32 = vmul.f32 0.5, %v1834_v13 }
 0x510   : > { %v1884_v49 = vmul.f32 %v6188_v0, %v1875_v57  ;;  %2172 = vmatpush.bf16.msrb.mxu3 %v4972_v25 }
 0x511   : > { %v1836_v2 = vsub.f32 1.5, %v1835_v32 }
 0x512   : > { %v5181_v45 = vpop.eup %5180  ;;  %v6219_v33 = vadd.f32 %v6192_v28, %v1884_v49  ;;  %2143 = vmatpush.bf16.msrb.mxu2 %v4964_v40 }
 0x513   : > { %v1837_v15 = vmul.f32 %v5179_v48, %v1836_v2  ;;  %v1843_v39 = vmul.f32 %v5181_v45, %v1789_v29  ;;  %vm1849_vm4 = vweird.f32 %v5181_v45 }
 0x514   : > { %v1899_v43 = vpack.c.bf16 %v6219_v33, %v6216_v51  ;;  %vm1850_vm6 = vmor %vm1848_vm5, %vm1849_vm4  ;;  %2173 = vmatpush.bf16.msrb.mxu3 %v4971_v18 }
 0x515   : > { %v1844_v56 = vmul.f32 %v5181_v45, %v1843_v39  ;;  %v1841_v44 = vsel %vm1840_vm3, %v5179_v48, %v1837_v15 }
 0x516   : > { %4588 = vmatmul.msk.bf16.gmra.mxu0 %vm562_vm0, %v1899_v43  ;;  %4592 = vmatmul.msk.bf16.gmra.mxu1 %vm562_vm0, %v1899_v43  ;;  %v1876_v23 = vmul.f32 %v1841_v44, %v6111_v59  ;;  %v1772_v59 = vpop.xlane.xlu0 %1771 }
 0x517   : > { %v1845_v19 = vmul.f32 0.5, %v1844_v56  ;;  %2144 = vmatpush.bf16.msrb.mxu2 %v4963_v62 }
 0x518   : > { %v1885_v5 = vmul.f32 %v6188_v0, %v1876_v23  ;;  %2174 = vmatpush.bf16.msrb.mxu3 %v4970_v8 }
 0x519   : > { %v1846_v22 = vsub.f32 1.5, %v1845_v19 }
 0x51a   : > { %v6230_v38 = vadd.f32 %v6192_v28, %v1885_v5 }
 0x51b   : > { %v1847_v54 = vmul.f32 %v5181_v45, %v1846_v22  ;;  %2145 = vmatpush.bf16.msrb.mxu2 %v4962_v50 }
 0x51d   : > { %v1851_v52 = vsel %vm1850_vm6, %v5181_v45, %v1847_v54 }
 0x51e   : > { %v1877_v36 = vmul.f32 %v1851_v52, %v6118_v6  ;;  %v1782_v6 = vmul.f32 %v1772_v59, %v6073_v12 }
 0x520   : > { %v1886_v20 = vmul.f32 %v6188_v0, %v1877_v36  ;;  %v1790_v17 = vadd.f32 1e-05, %v1782_v6 }
 0x522   : > { %v6233_v14 = vadd.f32 %v6192_v28, %v1886_v20  ;;  %5182 = vrsqrt.f32 %v1790_v17  ;;  %vm1858_vm8 = vweird.f32 %v1790_v17 }
 0x524   : > { %v1900_v42 = vpack.c.bf16 %v6233_v14, %v6230_v38 }
 0x526   : > { %4589 = vmatmul.msk.bf16.gmra.mxu0 %vm562_vm0, %v1900_v42  ;;  %4593 = vmatmul.msk.bf16.gmra.mxu1 %vm562_vm0, %v1900_v42 }
 0x528   : > { %v5183_v47 = vpop.eup %5182 }
 0x529   : > { %v1853_v37 = vmul.f32 %v5183_v47, %v1790_v17  ;;  %vm1859_vm7 = vweird.f32 %v5183_v47 }
 0x52a   : > { %vm1860_vm9 = vmor %vm1858_vm8, %vm1859_vm7 }
 0x52b   : > { %v1854_v3 = vmul.f32 %v5183_v47, %v1853_v37 }
 0x52d   : > { %v1855_v34 = vmul.f32 0.5, %v1854_v3 }
 0x52f   : > { %v1856_v24 = vsub.f32 1.5, %v1855_v34 }
 0x531   : > { %v1857_v27 = vmul.f32 %v5183_v47, %v1856_v24 }
 0x533   : > { %v1861_v13 = vsel %vm1860_vm9, %v5183_v47, %v1857_v27 }
 0x534   : > { %v1878_v32 = vmul.f32 %v1861_v13, %v6125_v9  ;;  %v480_v9 = vld [vmem:[%s7449_s7] ss:$2 sm:$0x3] }
 0x535   : > { %v1904_v22 = vperm.slane %v480_v9, 1 }
 0x536   : > { %v1887_v15 = vmul.f32 %v6188_v0, %v1878_v32 }
 0x538   : > { %v6294_v43 = vadd.f32 %v6192_v28, %v1887_v15 }
 0x541   : > { %v1775_v55 = vpop.xlane.xlu1 %1774 }
 0x542   : > { %v1783_v61 = vmul.f32 %v1775_v55, %v6073_v12 }
 0x544   : > { %v1791_v10 = vadd.f32 1e-05, %v1783_v61 }
 0x546   : > { %5184 = vrsqrt.f32 %v1791_v10  ;;  %vm1868_vm11 = vweird.f32 %v1791_v10 }
 0x54c   : > { %v5185_v48 = vpop.eup %5184 }
 0x54d   : > { %v1863_v29 = vmul.f32 %v5185_v48, %v1791_v10  ;;  %vm1869_vm10 = vweird.f32 %v5185_v48 }
 0x54e   : > { %vm1870_vm12 = vmor %vm1868_vm11, %vm1869_vm10 }
 0x54f   : > { %v1864_v63 = vmul.f32 %v5185_v48, %v1863_v29 }
 0x551   : > { %v1865_v57 = vmul.f32 0.5, %v1864_v63 }
 0x553   : > { %v1866_v16 = vsub.f32 1.5, %v1865_v57 }
 0x555   : > { %v1867_v49 = vmul.f32 %v5185_v48, %v1866_v16 }
 0x557   : > { %v1871_v2 = vsel %vm1870_vm12, %v5185_v48, %v1867_v49 }
 0x558   : > { %v1879_v45 = vmul.f32 %v1871_v2, %v6182_v21 }
 0x55a   : > { %v1888_v39 = vmul.f32 %v6188_v0, %v1879_v45  ;;  %v1903_v0 = vperm.slane %v480_v9, 0 }
 0x55c   : > { %v6297_v56 = vadd.f32 %v6192_v28, %v1888_v39 }
 0x55e   : > { %v1901_v44 = vpack.c.bf16 %v6297_v56, %v6294_v43 }
 0x560   : > { %4590 = vmatmul.msk.bf16.gmra.mxu0 %vm562_vm0, %v1901_v44  ;;  %4594 = vmatmul.msk.bf16.gmra.mxu1 %vm562_vm0, %v1901_v44 }
 0x562   : > { %v1968_v21 = vpop.f32.mrf.mxu0  ;;  %v1997_v19 = vpop.f32.mrf.mxu1 }
 0x563   : > { %v1969_v23 = vadd.f32 %v1968_v21, %v1903_v0  ;;  %v1998_v54 = vadd.f32 %v1997_v19, %v1904_v22 }
 0x565   : > { %v2017_v20 = vmax.f32 %v1969_v23, 0.0  ;;  %v2018_v42 = vmax.f32 %v1998_v54, 0.0 }
 0x56a   : > { %v1970_v52 = vpop.f32.mrf.mxu0  ;;  %v1999_v28 = vpop.f32.mrf.mxu1 }
 0x56b   : > { %v1971_v36 = vadd.f32 %v1970_v52, %v1903_v0  ;;  %v2000_v5 = vadd.f32 %v1999_v28, %v1904_v22  ;;  %v2041_v52 = vperm.slane %v6010_v11, 3 }
 0x56d   : > { %v2019_v59 = vmax.f32 %v1971_v36, 0.0  ;;  %v2020_v6 = vmax.f32 %v2000_v5, 0.0 }
 0x56f   : > { %v2033_v17 = vpack.c.bf16 %v2019_v59, %v2017_v20  ;;  %v2034_v31 = vpack.c.bf16 %v2020_v6, %v2018_v42 }
 0x571   : > { %2146 = vmatmul.bf16.vlgmr.msrb.gmra.mxu2 %v2033_v17  ;;  %2175 = vmatmul.bf16.vlgmr.msrb.gmra.mxu3 %v2034_v31 }
 0x593   : > { %v1973_v46 = vpop.f32.mrf.mxu0  ;;  %v2002_v41 = vpop.f32.mrf.mxu1 }
 0x594   : > { %v1974_v35 = vadd.f32 %v1973_v46, %v1903_v0  ;;  %v2003_v58 = vadd.f32 %v2002_v41, %v1904_v22 }
 0x596   : > { %v2021_v37 = vmax.f32 %v1974_v35, 0.0  ;;  %v2022_v3 = vmax.f32 %v2003_v58, 0.0 }
 0x59b   : > { %v1975_v1 = vpop.f32.mrf.mxu0  ;;  %v2004_v47 = vpop.f32.mrf.mxu1 }
 0x59c   : > { %v1976_v7 = vadd.f32 %v1975_v1, %v1903_v0  ;;  %v2005_v53 = vadd.f32 %v2004_v47, %v1904_v22 }
 0x59e   : > { %v2023_v55 = vmax.f32 %v1976_v7, 0.0  ;;  %v2024_v61 = vmax.f32 %v2005_v53, 0.0 }
 0x5a0   : > { %v2035_v4 = vpack.c.bf16 %v2023_v55, %v2021_v37  ;;  %v2036_v30 = vpack.c.bf16 %v2024_v61, %v2022_v3 }
 0x5a2   : > { %2151 = vmatmul.bf16.gmra.mxu2 %v2035_v4  ;;  %2180 = vmatmul.bf16.gmra.mxu3 %v2036_v30 }
 0x5a3   : > { %v1978_v10 = vpop.f32.mrf.mxu0  ;;  %v2007_v34 = vpop.f32.mrf.mxu1 }
 0x5a4   : > { %v1979_v40 = vadd.f32 %v1978_v10, %v1903_v0  ;;  %v2008_v25 = vadd.f32 %v2007_v34, %v1904_v22 }
 0x5a6   : > { %v2025_v27 = vmax.f32 %v1979_v40, 0.0  ;;  %v2026_v29 = vmax.f32 %v2008_v25, 0.0 }
 0x5ab   : > { %v1980_v24 = vpop.f32.mrf.mxu0  ;;  %v2009_v62 = vpop.f32.mrf.mxu1 }
 0x5ac   : > { %v1981_v18 = vadd.f32 %v1980_v24, %v1903_v0  ;;  %v2010_v48 = vadd.f32 %v2009_v62, %v1904_v22 }
 0x5ae   : > { %v2027_v50 = vmax.f32 %v1981_v18, 0.0  ;;  %v2028_v8 = vmax.f32 %v2010_v48, 0.0 }
 0x5b0   : > { %v2037_v63 = vpack.c.bf16 %v2027_v50, %v2025_v27  ;;  %v2038_v13 = vpack.c.bf16 %v2028_v8, %v2026_v29 }
 0x5b2   : > { %2156 = vmatmul.bf16.gmra.mxu2 %v2037_v63  ;;  %2185 = vmatmul.bf16.gmra.mxu3 %v2038_v13 }
 0x5dd   : > { %v1983_v57 = vpop.f32.mrf.mxu0  ;;  %v2012_v16 = vpop.f32.mrf.mxu1 }
 0x5de   : > { %v1984_v32 = vadd.f32 %v1983_v57, %v1903_v0  ;;  %v2013_v49 = vadd.f32 %v2012_v16, %v1904_v22 }
 0x5e0   : > { %v2029_v44 = vmax.f32 %v1984_v32, 0.0  ;;  %v2030_v9 = vmax.f32 %v2013_v49, 0.0 }
 0x5e5   : > { %v1985_v2 = vpop.f32.mrf.mxu0  ;;  %v2014_v45 = vpop.f32.mrf.mxu1 }
 0x5e6   : > { %v1986_v15 = vadd.f32 %v1985_v2, %v1903_v0  ;;  %v2015_v39 = vadd.f32 %v2014_v45, %v1904_v22 }
 0x5e8   : > { %v2031_v21 = vmax.f32 %v1986_v15, 0.0  ;;  %v2032_v19 = vmax.f32 %v2015_v39, 0.0 }
 0x5ea   : > { %v2039_v23 = vpack.c.bf16 %v2031_v21, %v2029_v44  ;;  %v2040_v54 = vpack.c.bf16 %v2032_v19, %v2030_v9 }
 0x5ec   : > { %2161 = vmatmul.bf16.gmra.mxu2 %v2039_v23  ;;  %2190 = vmatmul.bf16.gmra.mxu3 %v2040_v54 }
 0x5f4   : > { %v2147_v28 = vpop.f32.mrf.mxu2  ;;  %v2176_v36 = vpop.f32.mrf.mxu3 }
 0x5f5   : > { %v2148_v5 = vadd.f32 %v2147_v28, %v2041_v52 }
 0x5f7   : > { %v2177_v20 = vadd.f32 %v2176_v36, %v2148_v5 }
 0x5f9   : > { %v2196_v42 = vadd.f32 %v2177_v20, %v6198_v26 }
 0x5fb   : > { %v2204_v59 = vsel %vm562_vm0, %v2196_v42, 0.0 }
 0x5fc   : > { %v2149_v0 = vpop.f32.mrf.mxu2  ;;  %2205 = vadd.xlane.f32.xlu2 %v2204_v59  ;;  %v2178_v6 = vpop.f32.mrf.mxu3 }
 0x5fd   : > { %v2150_v22 = vadd.f32 %v2149_v0, %v2041_v52 }
 0x5ff   : > { %v2179_v17 = vadd.f32 %v2178_v6, %v2150_v22 }
 0x601   : > { %v2197_v31 = vadd.f32 %v2179_v17, %v6201_v60 }
 0x603   : > { %v2207_v46 = vsel %vm562_vm0, %v2197_v31, 0.0 }
 0x604   : > { %2208 = vadd.xlane.f32.xlu0 %v2207_v46 }
 0x625   : > { %v2152_v41 = vpop.f32.mrf.mxu2  ;;  %v2181_v11 = vpop.f32.mrf.mxu3 }
 0x626   : > { %v2153_v35 = vadd.f32 %v2152_v41, %v2041_v52 }
 0x628   : > { %v2182_v58 = vadd.f32 %v2181_v11, %v2153_v35 }
 0x62a   : > { %v2198_v1 = vadd.f32 %v2182_v58, %v6216_v51  ;;  %v4744_v58 = vld [vmem:[%s7444_s2 + $0x70] sm:$0xf] }
 0x62c   : > { %v2210_v26 = vsel %vm562_vm0, %v2198_v1, 0.0 }
 0x62d   : > { %v2154_v47 = vpop.f32.mrf.mxu2  ;;  %v2183_v7 = vpop.f32.mrf.mxu3  ;;  %2211 = vadd.xlane.f32.xlu1 %v2210_v26  ;;  %v4984_v26 = vld [vmem:[%s7444_s2 + $0x74] sm:$0xf] }
 0x62e   : > { %v2155_v53 = vadd.f32 %v2154_v47, %v2041_v52 }
 0x630   : > { %v2184_v37 = vadd.f32 %v2183_v7, %v2155_v53  ;;  %v4746_v7 = vld [vmem:[%s7444_s2 + $0x78] sm:$0xf0] }
 0x631   : > { %v4749_v53 = vor.u32 %v4984_v26, %v4746_v7 }
 0x632   : > { %v2199_v3 = vadd.f32 %v2184_v37, %v6219_v33  ;;  %v4736_v37 = vld [vmem:[%s7444_s2 + $0x60] sm:$0xf] }
 0x633   : > { %2558 = vmatpush.bf16.msra.mxu1 %v4749_v53 }
 0x634   : > { %v2213_v60 = vsel %vm562_vm0, %v2199_v3, 0.0 }
 0x635   : > { %v2157_v55 = vpop.f32.mrf.mxu2  ;;  %v2186_v61 = vpop.f32.mrf.mxu3  ;;  %2214 = vadd.xlane.f32.xlu2 %v2213_v60  ;;  %v4982_v60 = vld [vmem:[%s7444_s2 + $0x64] sm:$0xf] }
 0x636   : > { %v2158_v4 = vadd.f32 %v2157_v55, %v2041_v52 }
 0x638   : > { %v2187_v30 = vadd.f32 %v2186_v61, %v2158_v4  ;;  %v4738_v61 = vld [vmem:[%s7444_s2 + $0x68] sm:$0xf0] }
 0x639   : > { %v4741_v4 = vor.u32 %v4982_v60, %v4738_v61 }
 0x63a   : > { %v2200_v10 = vadd.f32 %v2187_v30, %v6230_v38  ;;  %v4728_v30 = vld [vmem:[%s7444_s2 + $0x50] sm:$0xf] }
 0x63b   : > { %2559 = vmatpush.bf16.msra.mxu1 %v4741_v4 }
 0x63c   : > { %v2216_v51 = vsel %vm562_vm0, %v2200_v10, 0.0 }
 0x63d   : > { %v2159_v34 = vpop.f32.mrf.mxu2  ;;  %2217 = vadd.xlane.f32.xlu0 %v2216_v51  ;;  %v2188_v25 = vpop.f32.mrf.mxu3  ;;  %v4980_v51 = vld [vmem:[%s7444_s2 + $0x54] sm:$0xf] }
 0x63e   : > { %v2160_v40 = vadd.f32 %v2159_v34, %v2041_v52 }
 0x640   : > { %v2189_v24 = vadd.f32 %v2188_v25, %v2160_v40 }
 0x642   : > { %v2201_v62 = vadd.f32 %v2189_v24, %v6233_v14  ;;  %v4730_v24 = vld [vmem:[%s7444_s2 + $0x58] sm:$0xf0] }
 0x644   : > { %v2219_v33 = vsel %vm562_vm0, %v2201_v62, 0.0 }
 0x645   : > { %2220 = vadd.xlane.f32.xlu1 %v2219_v33 }
 0x66f   : > { %v2206_v18 = vpop.xlane.xlu2 %2205  ;;  %v2162_v48 = vpop.f32.mrf.mxu2 }
 0x670   : > { %v2228_v27 = vmul.f32 %v2206_v18, %v6073_v12  ;;  %v2163_v29 = vadd.f32 %v2162_v48, %v2041_v52  ;;  %v2191_v50 = vpop.f32.mrf.mxu3  ;;  %v4733_v18 = vor.u32 %v4980_v51, %v4730_v24 }
 0x672   : > { %v6320_v8 = vsub.f32 %v2196_v42, %v2228_v27  ;;  %v2192_v38 = vadd.f32 %v2191_v50, %v2163_v29  ;;  %2560 = vmatpush.bf16.msra.mxu1 %v4733_v18  ;;  %v4720_v29 = vld [vmem:[%s7444_s2 + $0x40] sm:$0xf]  ;;  %v4979_v50 = vld [vmem:[%s7444_s2 + $0x44] sm:$0xf0] }
 0x674   : > { %v2244_v63 = vmul.f32 %v6320_v8, %v6320_v8  ;;  %v6325_v13 = vadd.f32 %v2192_v38, %v6294_v43  ;;  %v4721_v38 = vor.u32 %v4979_v50, %v4720_v29 }
 0x676   : > { %v2252_v14 = vsel %vm562_vm0, %v2244_v63, 0.0  ;;  %v2222_v57 = vsel %vm562_vm0, %v6325_v13, 0.0  ;;  %v4978_v63 = vld [vmem:[%s7444_s2 + $0x44] sm:$0xf] }
 0x677   : > { %2253 = vadd.xlane.f32.xlu2 %v2252_v14  ;;  %v2164_v16 = vpop.f32.mrf.mxu2  ;;  %2223 = vadd.xlane.f32.xlu1 %v2222_v57  ;;  %v2209_v32 = vpop.xlane.xlu0 %2208  ;;  %v4722_v14 = vld [vmem:[%s7444_s2 + $0x48] sm:$0xf0] }
 0x678   : > { %v2165_v49 = vadd.f32 %v2164_v16, %v2041_v52  ;;  %v2229_v2 = vmul.f32 %v2209_v32, %v6073_v12  ;;  %v2193_v45 = vpop.f32.mrf.mxu3  ;;  %v4725_v57 = vor.u32 %v4978_v63, %v4722_v14 }
 0x67a   : > { %v2194_v15 = vadd.f32 %v2193_v45, %v2165_v49  ;;  %v6331_v39 = vsub.f32 %v2197_v31, %v2229_v2  ;;  %2561 = vmatpush.bf16.msra.mxu1 %v4725_v57 }
 0x67c   : > { %v6334_v44 = vadd.f32 %v2194_v15, %v6297_v56  ;;  %v2245_v43 = vmul.f32 %v6331_v39, %v6331_v39 }
 0x67e   : > { %v2225_v9 = vsel %vm562_vm0, %v6334_v44, 0.0  ;;  %v2255_v21 = vsel %vm562_vm0, %v2245_v43, 0.0 }
 0x67f   : > { %2226 = vadd.xlane.f32.xlu2 %v2225_v9  ;;  %2256 = vadd.xlane.f32.xlu0 %v2255_v21 }
 0x6a0   : > { %v2212_v19 = vpop.xlane.xlu1 %2211 }
 0x6a1   : > { %v2230_v23 = vmul.f32 %v2212_v19, %v6073_v12 }
 0x6a3   : > { %v6342_v54 = vsub.f32 %v2198_v1, %v2230_v23  ;;  %v4985_v1 = vld [vmem:[%s7444_s2 + $0x74] sm:$0xf0] }
 0x6a4   : > { %v4745_v47 = vor.u32 %v4985_v1, %v4744_v58 }
 0x6a5   : > { %v2246_v52 = vmul.f32 %v6342_v54, %v6342_v54 }
 0x6a6   : > { %2529 = vmatpush.bf16.msra.mxu0 %v4745_v47 }
 0x6a7   : > { %v2258_v56 = vsel %vm562_vm0, %v2246_v52, 0.0 }
 0x6a8   : > { %v2215_v28 = vpop.xlane.xlu2 %2214  ;;  %2259 = vadd.xlane.f32.xlu0 %v2258_v56 }
 0x6a9   : > { %v2231_v36 = vmul.f32 %v2215_v28, %v6073_v12 }
 0x6ab   : > { %v6348_v5 = vsub.f32 %v2199_v3, %v2231_v36  ;;  %v4983_v3 = vld [vmem:[%s7444_s2 + $0x64] sm:$0xf0] }
 0x6ac   : > { %v4737_v55 = vor.u32 %v4983_v3, %v4736_v37 }
 0x6ad   : > { %v2247_v20 = vmul.f32 %v6348_v5, %v6348_v5 }
 0x6ae   : > { %2530 = vmatpush.bf16.msra.mxu0 %v4737_v55 }
 0x6af   : > { %v2261_v42 = vsel %vm562_vm0, %v2247_v20, 0.0 }
 0x6b0   : > { %2262 = vadd.xlane.f32.xlu1 %v2261_v42  ;;  %v2218_v59 = vpop.xlane.xlu0 %2217 }
 0x6b1   : > { %v2232_v0 = vmul.f32 %v2218_v59, %v6073_v12 }
 0x6b3   : > { %v6354_v22 = vsub.f32 %v2200_v10, %v2232_v0  ;;  %v4981_v10 = vld [vmem:[%s7444_s2 + $0x54] sm:$0xf0] }
 0x6b4   : > { %v4729_v25 = vor.u32 %v4981_v10, %v4728_v30 }
 0x6b5   : > { %v2248_v6 = vmul.f32 %v6354_v22, %v6354_v22 }
 0x6b6   : > { %2531 = vmatpush.bf16.msra.mxu0 %v4729_v25 }
 0x6b7   : > { %v2264_v17 = vsel %vm562_vm0, %v2248_v6, 0.0 }
 0x6b8   : > { %v2221_v31 = vpop.xlane.xlu1 %2220  ;;  %2265 = vadd.xlane.f32.xlu2 %v2264_v17  ;;  %v5362_v17 = vld [vmem:[%s7447_s5] sm:$0x3f] }
 0x6b9   : > { %v2233_v46 = vmul.f32 %v2221_v31, %v6073_v12  ;;  %v6432_v31 = vperm.slane %v5362_v17, 4  ;;  %v6435_v58 = vperm.slane %v5362_v17, 5 }
 0x6ba   : > { %2532 = vmatpush.bf16.msra.mxu0 %v4721_v38 }
 0x6bb   : > { %v6360_v41 = vsub.f32 %v2201_v62, %v2233_v46 }
 0x6bd   : > { %v2249_v11 = vmul.f32 %v6360_v41, %v6360_v41 }
 0x6bf   : > { %v2267_v35 = vsel %vm562_vm0, %v2249_v11, 0.0 }
 0x6c0   : > { %2268 = vadd.xlane.f32.xlu0 %v2267_v35 }
 0x6ea   : > { %v2254_v34 = vpop.xlane.xlu2 %2253  ;;  %v2224_v40 = vpop.xlane.xlu1 %2223 }
 0x6eb   : > { %v2276_v62 = vmul.f32 %v2254_v34, %v6073_v12  ;;  %v2234_v33 = vmul.f32 %v2224_v40, %v6073_v12 }
 0x6ed   : > { %v2284_v48 = vadd.f32 1e-05, %v2276_v62  ;;  %v6404_v27 = vsub.f32 %v6325_v13, %v2234_v33 }
 0x6ef   : > { %5186 = vrsqrt.f32 %v2284_v48  ;;  %v2250_v13 = vmul.f32 %v6404_v27, %v6404_v27  ;;  %vm2298_vm14 = vweird.f32 %v2284_v48 }
 0x6f1   : > { %v2270_v16 = vsel %vm562_vm0, %v2250_v13, 0.0 }
 0x6f2   : > { %v2227_v32 = vpop.xlane.xlu2 %2226  ;;  %2271 = vadd.xlane.f32.xlu1 %v2270_v16  ;;  %v2257_v49 = vpop.xlane.xlu0 %2256 }
 0x6f3   : > { %v2235_v2 = vmul.f32 %v2227_v32, %v6073_v12  ;;  %v2277_v45 = vmul.f32 %v2257_v49, %v6073_v12 }
 0x6f5   : > { %v5187_v15 = vpop.eup %5186  ;;  %v6424_v43 = vsub.f32 %v6334_v44, %v2235_v2  ;;  %v2285_v9 = vadd.f32 1e-05, %v2277_v45 }
 0x6f6   : > { %v2293_v21 = vmul.f32 %v5187_v15, %v2284_v48  ;;  %vm2299_vm13 = vweird.f32 %v5187_v15 }
 0x6f7   : > { %5188 = vrsqrt.f32 %v2285_v9  ;;  %v2251_v19 = vmul.f32 %v6424_v43, %v6424_v43  ;;  %vm2300_vm15 = vmor %vm2298_vm14, %vm2299_vm13  ;;  %vm2308_vm3 = vweird.f32 %v2285_v9 }
 0x6f8   : > { %v2294_v23 = vmul.f32 %v5187_v15, %v2293_v21 }
 0x6f9   : > { %v2273_v52 = vsel %vm562_vm0, %v2251_v19, 0.0 }
 0x6fa   : > { %v2295_v56 = vmul.f32 0.5, %v2294_v23  ;;  %2274 = vadd.xlane.f32.xlu2 %v2273_v52 }
 0x6fc   : > { %v2296_v28 = vsub.f32 1.5, %v2295_v56 }
 0x6fd   : > { %v5189_v36 = vpop.eup %5188 }
 0x6fe   : > { %v2297_v20 = vmul.f32 %v5187_v15, %v2296_v28  ;;  %v2303_v42 = vmul.f32 %v5189_v36, %v2285_v9  ;;  %vm2309_vm2 = vweird.f32 %v5189_v36 }
 0x6ff   : > { %vm2310_vm4 = vmor %vm2308_vm3, %vm2309_vm2 }
 0x700   : > { %v2304_v59 = vmul.f32 %v5189_v36, %v2303_v42  ;;  %v2301_v44 = vsel %vm2300_vm15, %v5187_v15, %v2297_v20 }
 0x701   : > { %v2372_v46 = vmul.f32 %v2301_v44, %v6320_v8 }
 0x702   : > { %v2305_v0 = vmul.f32 0.5, %v2304_v59 }
 0x703   : > { %v2381_v1 = vmul.f32 %v6432_v31, %v2372_v46 }
 0x704   : > { %v2306_v6 = vsub.f32 1.5, %v2305_v0 }
 0x705   : > { %v6441_v7 = vadd.f32 %v6435_v58, %v2381_v1 }
 0x706   : > { %v2307_v11 = vmul.f32 %v5189_v36, %v2306_v6 }
 0x708   : > { %v2311_v35 = vsel %vm2310_vm4, %v5189_v36, %v2307_v11 }
 0x709   : > { %v2373_v26 = vmul.f32 %v2311_v35, %v6331_v39 }
 0x70b   : > { %v2382_v47 = vmul.f32 %v6432_v31, %v2373_v26 }
 0x70d   : > { %v6444_v53 = vadd.f32 %v6435_v58, %v2382_v47 }
 0x70f   : > { %v2464_v8 = vpack.c.bf16 %v6444_v53, %v6441_v7 }
 0x711   : > { %4750 = vmatmul.msk.bf16.vlgmr.msra.gmra.mxu0 %vm562_vm0, %v2464_v8  ;;  %4754 = vmatmul.msk.bf16.vlgmr.msra.gmra.mxu1 %vm562_vm0, %v2464_v8 }
 0x71b   : > { %v2260_v37 = vpop.xlane.xlu0 %2259 }
 0x71c   : > { %v2278_v3 = vmul.f32 %v2260_v37, %v6073_v12  ;;  %v4784_v37 = vld [vmem:[%s7446_s4 + $0x70] sm:$0xf] }
 0x71e   : > { %v2286_v60 = vadd.f32 1e-05, %v2278_v3  ;;  %v4993_v3 = vld [vmem:[%s7446_s4 + $0x74] sm:$0xf0] }
 0x720   : > { %5190 = vrsqrt.f32 %v2286_v60  ;;  %vm2318_vm6 = vweird.f32 %v2286_v60 }
 0x723   : > { %v2263_v39 = vpop.xlane.xlu1 %2262 }
 0x724   : > { %v2279_v55 = vmul.f32 %v2263_v39, %v6073_v12  ;;  %v4785_v39 = vor.u32 %v4993_v3, %v4784_v37 }
 0x726   : > { %v5191_v61 = vpop.eup %5190  ;;  %v2287_v4 = vadd.f32 1e-05, %v2279_v55  ;;  %v4786_v55 = vld [vmem:[%s7446_s4 + $0x78] sm:$0xf0]  ;;  %2651 = vmatpush.bf16.msra.mxu2 %v4785_v39 }
 0x727   : > { %v2313_v30 = vmul.f32 %v5191_v61, %v2286_v60  ;;  %vm2319_vm5 = vweird.f32 %v5191_v61  ;;  %v4992_v60 = vld [vmem:[%s7446_s4 + $0x74] sm:$0xf] }
 0x728   : > { %5192 = vrsqrt.f32 %v2287_v4  ;;  %vm2320_vm7 = vmor %vm2318_vm6, %vm2319_vm5  ;;  %vm2328_vm9 = vweird.f32 %v2287_v4 }
 0x729   : > { %v2314_v10 = vmul.f32 %v5191_v61, %v2313_v30 }
 0x72b   : > { %v2315_v51 = vmul.f32 0.5, %v2314_v10  ;;  %v2266_v34 = vpop.xlane.xlu2 %2265  ;;  %v4776_v10 = vld [vmem:[%s7446_s4 + $0x60] sm:$0xf] }
 0x72c   : > { %v2280_v40 = vmul.f32 %v2266_v34, %v6073_v12 }
 0x72d   : > { %v2316_v25 = vsub.f32 1.5, %v2315_v51  ;;  %v4991_v51 = vld [vmem:[%s7446_s4 + $0x64] sm:$0xf0] }
 0x72e   : > { %v5193_v24 = vpop.eup %5192  ;;  %v2288_v62 = vadd.f32 1e-05, %v2280_v40 }
 0x72f   : > { %v2317_v33 = vmul.f32 %v5191_v61, %v2316_v25  ;;  %v2323_v18 = vmul.f32 %v5193_v24, %v2287_v4  ;;  %vm2329_vm8 = vweird.f32 %v5193_v24  ;;  %v4789_v4 = vor.u32 %v4992_v60, %v4786_v55 }
 0x730   : > { %5194 = vrsqrt.f32 %v2288_v62  ;;  %vm2330_vm10 = vmor %vm2328_vm9, %vm2329_vm8  ;;  %vm2338_vm12 = vweird.f32 %v2288_v62  ;;  %v4777_v25 = vor.u32 %v4991_v51, %v4776_v10 }
 0x731   : > { %v2324_v48 = vmul.f32 %v5193_v24, %v2323_v18  ;;  %v2321_v29 = vsel %vm2320_vm7, %v5191_v61, %v2317_v33  ;;  %2680 = vmatpush.bf16.msra.mxu3 %v4789_v4 }
 0x732   : > { %v2374_v57 = vmul.f32 %v2321_v29, %v6342_v54  ;;  %2652 = vmatpush.bf16.msra.mxu2 %v4777_v25  ;;  %v4768_v29 = vld [vmem:[%s7446_s4 + $0x50] sm:$0xf] }
 0x733   : > { %v2325_v50 = vmul.f32 0.5, %v2324_v48  ;;  %v2269_v38 = vpop.xlane.xlu0 %2268 }
 0x734   : > { %v2281_v63 = vmul.f32 %v2269_v38, %v6073_v12  ;;  %v2383_v9 = vmul.f32 %v6432_v31, %v2374_v57  ;;  %v4988_v38 = vld [vmem:[%s7446_s4 + $0x54] sm:$0xf] }
 0x735   : > { %v2326_v14 = vsub.f32 1.5, %v2325_v50  ;;  %v4989_v50 = vld [vmem:[%s7446_s4 + $0x54] sm:$0xf0] }
 0x736   : > { %v5195_v13 = vpop.eup %5194  ;;  %v2289_v16 = vadd.f32 1e-05, %v2281_v63  ;;  %v6459_v56 = vadd.f32 %v6435_v58, %v2383_v9  ;;  %v4769_v63 = vor.u32 %v4989_v50, %v4768_v29  ;;  %v4762_v9 = vld [vmem:[%s7446_s4 + $0x48] sm:$0xf0] }
 0x737   : > { %v2327_v32 = vmul.f32 %v5193_v24, %v2326_v14  ;;  %v2333_v49 = vmul.f32 %v5195_v13, %v2288_v62  ;;  %vm2339_vm11 = vweird.f32 %v5195_v13  ;;  %v4778_v62 = vld [vmem:[%s7446_s4 + $0x68] sm:$0xf0]  ;;  %v4770_v14 = vld [vmem:[%s7446_s4 + $0x58] sm:$0xf0] }
 0x738   : > { %5196 = vrsqrt.f32 %v2289_v16  ;;  %vm2340_vm13 = vmor %vm2338_vm12, %vm2339_vm11  ;;  %vm2348_vm15 = vweird.f32 %v2289_v16  ;;  %v4773_v57 = vor.u32 %v4988_v38, %v4770_v14  ;;  %2653 = vmatpush.bf16.msra.mxu2 %v4769_v63 }
 0x739   : > { %v2331_v2 = vsel %vm2330_vm10, %v5193_v24, %v2327_v32  ;;  %v2334_v45 = vmul.f32 %v5195_v13, %v2333_v49  ;;  %v4990_v24 = vld [vmem:[%s7446_s4 + $0x64] sm:$0xf]  ;;  %v4760_v32 = vld [vmem:[%s7446_s4 + $0x40] sm:$0xf]  ;;  %v4987_v49 = vld [vmem:[%s7446_s4 + $0x44] sm:$0xf0] }
 0x73a   : > { %v2375_v15 = vmul.f32 %v2331_v2, %v6348_v5  ;;  %v4781_v18 = vor.u32 %v4990_v24, %v4778_v62 }
 0x73b   : > { %v2335_v21 = vmul.f32 0.5, %v2334_v45  ;;  %v4761_v45 = vor.u32 %v4987_v49, %v4760_v32 }
 0x73c   : > { %v2384_v19 = vmul.f32 %v6432_v31, %v2375_v15  ;;  %2681 = vmatpush.bf16.msra.mxu3 %v4781_v18  ;;  %v4986_v15 = vld [vmem:[%s7446_s4 + $0x44] sm:$0xf] }
 0x73d   : > { %v2336_v23 = vsub.f32 1.5, %v2335_v21  ;;  %2654 = vmatpush.bf16.msra.mxu2 %v4761_v45 }
 0x73e   : > { %v5197_v52 = vpop.eup %5196  ;;  %v6462_v54 = vadd.f32 %v6435_v58, %v2384_v19 }
 0x73f   : > { %v2337_v28 = vmul.f32 %v5195_v13, %v2336_v23  ;;  %v2343_v36 = vmul.f32 %v5197_v52, %v2289_v16  ;;  %vm2349_vm14 = vweird.f32 %v5197_v52  ;;  %v4765_v23 = vor.u32 %v4986_v15, %v4762_v9 }
 0x740   : > { %v2465_v20 = vpack.c.bf16 %v6462_v54, %v6459_v56  ;;  %vm2350_vm2 = vmor %vm2348_vm15, %vm2349_vm14  ;;  %2682 = vmatpush.bf16.msra.mxu3 %v4773_v57 }
 0x741   : > { %v2344_v5 = vmul.f32 %v5197_v52, %v2343_v36  ;;  %v2341_v42 = vsel %vm2340_vm13, %v5195_v13, %v2337_v28 }
 0x742   : > { %4751 = vmatmul.msk.bf16.gmra.mxu0 %vm562_vm0, %v2465_v20  ;;  %4755 = vmatmul.msk.bf16.gmra.mxu1 %vm562_vm0, %v2465_v20  ;;  %v2376_v0 = vmul.f32 %v2341_v42, %v6354_v22 }
 0x743   : > { %v2345_v59 = vmul.f32 0.5, %v2344_v5 }
 0x744   : > { %v2385_v11 = vmul.f32 %v6432_v31, %v2376_v0  ;;  %2683 = vmatpush.bf16.msra.mxu3 %v4765_v23 }
 0x745   : > { %v2346_v44 = vsub.f32 1.5, %v2345_v59 }
 0x746   : > { %v6473_v1 = vadd.f32 %v6435_v58, %v2385_v11 }
 0x747   : > { %v2347_v6 = vmul.f32 %v5197_v52, %v2346_v44 }
 0x749   : > { %v2351_v17 = vsel %vm2350_vm2, %v5197_v52, %v2347_v6 }
 0x74a   : > { %v2377_v46 = vmul.f32 %v2351_v17, %v6360_v41 }
 0x74c   : > { %v2386_v35 = vmul.f32 %v6432_v31, %v2377_v46 }
 0x74e   : > { %v6476_v26 = vadd.f32 %v6435_v58, %v2386_v35 }
 0x750   : > { %v2466_v47 = vpack.c.bf16 %v6476_v26, %v6473_v1 }
 0x752   : > { %4752 = vmatmul.msk.bf16.gmra.mxu0 %vm562_vm0, %v2466_v47  ;;  %4756 = vmatmul.msk.bf16.gmra.mxu1 %vm562_vm0, %v2466_v47 }
 0x765   : > { %v2272_v22 = vpop.xlane.xlu1 %2271 }
 0x766   : > { %v2282_v41 = vmul.f32 %v2272_v22, %v6073_v12 }
 0x768   : > { %v2290_v8 = vadd.f32 1e-05, %v2282_v41 }
 0x76a   : > { %5198 = vrsqrt.f32 %v2290_v8  ;;  %vm2358_vm4 = vweird.f32 %v2290_v8 }
 0x76d   : > { %v2275_v61 = vpop.xlane.xlu2 %2274 }
 0x76e   : > { %v2283_v30 = vmul.f32 %v2275_v61, %v6073_v12 }
 0x770   : > { %v5199_v34 = vpop.eup %5198  ;;  %v2291_v40 = vadd.f32 1e-05, %v2283_v30 }
 0x771   : > { %v2353_v33 = vmul.f32 %v5199_v34, %v2290_v8  ;;  %vm2359_vm3 = vweird.f32 %v5199_v34 }
 0x772   : > { %5200 = vrsqrt.f32 %v2291_v40  ;;  %vm2360_vm5 = vmor %vm2358_vm4, %vm2359_vm3  ;;  %vm2368_vm7 = vweird.f32 %v2291_v40 }
 0x773   : > { %v2354_v48 = vmul.f32 %v5199_v34, %v2353_v33 }
 0x775   : > { %v2355_v13 = vmul.f32 0.5, %v2354_v48 }
 0x777   : > { %v2356_v16 = vsub.f32 1.5, %v2355_v13 }
 0x778   : > { %v5201_v2 = vpop.eup %5200 }
 0x779   : > { %v2357_v21 = vmul.f32 %v5199_v34, %v2356_v16  ;;  %v2363_v19 = vmul.f32 %v5201_v2, %v2291_v40  ;;  %vm2369_vm6 = vweird.f32 %v5201_v2 }
 0x77a   : > { %vm2370_vm8 = vmor %vm2368_vm7, %vm2369_vm6 }
 0x77b   : > { %v2364_v52 = vmul.f32 %v5201_v2, %v2363_v19  ;;  %v2361_v28 = vsel %vm2360_vm5, %v5199_v34, %v2357_v21 }
 0x77c   : > { %v2378_v5 = vmul.f32 %v2361_v28, %v6404_v27 }
 0x77d   : > { %v2365_v36 = vmul.f32 0.5, %v2364_v52 }
 0x77e   : > { %v2387_v0 = vmul.f32 %v6432_v31, %v2378_v5 }
 0x77f   : > { %v2366_v20 = vsub.f32 1.5, %v2365_v36 }
 0x780   : > { %v6537_v17 = vadd.f32 %v6435_v58, %v2387_v0 }
 0x781   : > { %v2367_v42 = vmul.f32 %v5201_v2, %v2366_v20 }
 0x783   : > { %v2371_v59 = vsel %vm2370_vm8, %v5201_v2, %v2367_v42 }
 0x784   : > { %v2379_v44 = vmul.f32 %v2371_v59, %v6424_v43  ;;  %v4667_v43 = vld [vmem:[%s7445_s3 + $0x1] ss:$2 sm:$0x3] }
 0x785   : > { %v2470_v35 = vperm.slane %v4667_v43, 1  ;;  %v2469_v51 = vperm.slane %v4667_v43, 0 }
 0x786   : > { %v2388_v6 = vmul.f32 %v6432_v31, %v2379_v44 }
 0x788   : > { %v6540_v46 = vadd.f32 %v6435_v58, %v2388_v6 }
 0x78a   : > { %v2467_v11 = vpack.c.bf16 %v6540_v46, %v6537_v17 }
 0x78c   : > { %4753 = vmatmul.msk.bf16.gmra.mxu0 %vm562_vm0, %v2467_v11  ;;  %4757 = vmatmul.msk.bf16.gmra.mxu1 %vm562_vm0, %v2467_v11 }
 0x78e   : > { %v2563_v27 = vpop.f32.mrf.mxu1  ;;  %v2534_v58 = vpop.f32.mrf.mxu0 }
 0x78f   : > { %v2564_v47 = vadd.f32 %v2563_v27, %v2470_v35  ;;  %v2535_v13 = vadd.f32 %v2534_v58, %v2469_v51 }
 0x791   : > { %v2583_v16 = vpack.c.bf16 %v2535_v13, %v2535_v13 }
 0x793   : > { %v2721_v49 = vunpack.c.l.b16 %v2583_v16 }
 0x796   : > { %v2565_v31 = vpop.f32.mrf.mxu1  ;;  %v2536_v8 = vpop.f32.mrf.mxu0 }
 0x797   : > { %v2566_v22 = vadd.f32 %v2565_v31, %v2470_v35  ;;  %v2537_v14 = vadd.f32 %v2536_v8, %v2469_v51 }
 0x799   : > { %v2591_v41 = vpack.c.bf16 %v2566_v22, %v2564_v47  ;;  %v2584_v57 = vpack.c.bf16 %v2537_v14, %v2537_v14 }
 0x79b   : > { %4790 = vmatmul.msk.bf16.vlgmr.msra.gmra.mxu2 %vm562_vm0, %v2591_v41  ;;  %4794 = vmatmul.msk.bf16.vlgmr.msra.gmra.mxu3 %vm562_vm0, %v2591_v41  ;;  %v2722_v32 = vunpack.c.l.b16 %v2584_v57 }
 0x79d   : > { %v6561_v2 = vpack.c.b16 %v2722_v32, %v2721_v49 }
 0x7bf   : > { %v2539_v37 = vpop.f32.mrf.mxu0  ;;  %v2568_v3 = vpop.f32.mrf.mxu1 }
 0x7c0   : > { %v2569_v55 = vadd.f32 %v2568_v3, %v2470_v35  ;;  %v2540_v59 = vadd.f32 %v2539_v37, %v2469_v51 }
 0x7c2   : > { %v2585_v27 = vpack.c.bf16 %v2540_v59, %v2540_v59 }
 0x7c7   : > { %v2541_v60 = vpop.f32.mrf.mxu0  ;;  %v2570_v39 = vpop.f32.mrf.mxu1 }
 0x7c8   : > { %v2571_v61 = vadd.f32 %v2570_v39, %v2470_v35  ;;  %v2542_v20 = vadd.f32 %v2541_v60, %v2469_v51 }
 0x7ca   : > { %v2592_v4 = vpack.c.bf16 %v2571_v61, %v2569_v55  ;;  %v2586_v6 = vpack.c.bf16 %v2542_v20, %v2542_v20 }
 0x7cc   : > { %4791 = vmatmul.msk.bf16.gmra.mxu2 %vm562_vm0, %v2592_v4  ;;  %4795 = vmatmul.msk.bf16.gmra.mxu3 %vm562_vm0, %v2592_v4  ;;  %v2724_v43 = vunpack.c.l.b16 %v2586_v6 }
 0x7cf   : > { %v2544_v30 = vpop.f32.mrf.mxu0  ;;  %v2573_v10 = vpop.f32.mrf.mxu1 }
 0x7d0   : > { %v2545_v34 = vadd.f32 %v2544_v30, %v2469_v51  ;;  %v2574_v62 = vadd.f32 %v2573_v10, %v2470_v35 }
 0x7d2   : > { %v2587_v24 = vpack.c.bf16 %v2545_v34, %v2545_v34 }
 0x7d4   : > { %v2725_v50 = vunpack.c.l.b16 %v2587_v24 }
 0x7d7   : > { %v2546_v40 = vpop.f32.mrf.mxu0  ;;  %v2575_v25 = vpop.f32.mrf.mxu1 }
 0x7d8   : > { %v2547_v33 = vadd.f32 %v2546_v40, %v2469_v51  ;;  %v2576_v18 = vadd.f32 %v2575_v25, %v2470_v35 }
 0x7da   : > { %v2588_v48 = vpack.c.bf16 %v2547_v33, %v2547_v33  ;;  %v2593_v29 = vpack.c.bf16 %v2576_v18, %v2574_v62 }
 0x7dc   : > { %v2726_v38 = vunpack.c.l.b16 %v2588_v48  ;;  %4792 = vmatmul.msk.bf16.gmra.mxu2 %vm562_vm0, %v2593_v29  ;;  %4796 = vmatmul.msk.bf16.gmra.mxu3 %vm562_vm0, %v2593_v29 }
 0x7de   : > { %v6555_v63 = vpack.c.b16 %v2726_v38, %v2725_v50 }
 0x7e0   : > { %2971 = vrot.lane.b32.xlu1 %v6555_v63, %s5373_s25 }
 0x7e8   : > { %2737 = vrot.lane.b32.xlu1 %v6555_v63, %s5374_s26 }
 0x7f0   : > { %2959 = vrot.lane.b32.xlu1 %v6561_v2, %s5375_s27 }
 0x7f8   : > { %2963 = vrot.lane.b32.xlu1 %v6555_v63, %s5375_s27 }
 0x809   : > { %v2549_v45 = vpop.f32.mrf.mxu0  ;;  %v2578_v15 = vpop.f32.mrf.mxu1 }
 0x80a   : > { %v2550_v9 = vadd.f32 %v2549_v45, %v2469_v51  ;;  %v2579_v52 = vadd.f32 %v2578_v15, %v2470_v35 }
 0x80c   : > { %v2589_v23 = vpack.c.bf16 %v2550_v9, %v2550_v9 }
 0x80e   : > { %v2727_v44 = vunpack.c.l.b16 %v2589_v23 }
 0x811   : > { %v2551_v21 = vpop.f32.mrf.mxu0  ;;  %v2580_v19 = vpop.f32.mrf.mxu1 }
 0x812   : > { %v2552_v28 = vadd.f32 %v2551_v21, %v2469_v51  ;;  %v2581_v36 = vadd.f32 %v2580_v19, %v2470_v35  ;;  %v2723_v35 = vunpack.c.l.b16 %v2585_v27 }
 0x814   : > { %v2590_v5 = vpack.c.bf16 %v2552_v28, %v2552_v28  ;;  %v2594_v42 = vpack.c.bf16 %v2581_v36, %v2579_v52  ;;  %v6577_v22 = vpack.c.b16 %v2724_v43, %v2723_v35 }
 0x816   : > { %v2728_v0 = vunpack.c.l.b16 %v2590_v5  ;;  %4793 = vmatmul.msk.bf16.gmra.mxu2 %vm562_vm0, %v2594_v42  ;;  %4797 = vmatmul.msk.bf16.gmra.mxu3 %vm562_vm0, %v2594_v42 }
 0x818   : > { %v6569_v11 = vpack.c.b16 %v2728_v0, %v2727_v44 }
 0x81a   : > { %2739 = vrot.lane.b32.xlu2 %v6569_v11, %s5374_s26  ;;  %2973 = vrot.lane.b32.xlu0 %v6569_v11, %s5373_s25 }
 0x81b   : > { %3195 = vrot.lane.b32.xlu1 %v6569_v11, %s5376_s28 }
 0x81e   : > { %v2656_v31 = vpop.f32.mrf.mxu2  ;;  %v2685_v47 = vpop.f32.mrf.mxu3 }
 0x81f   : > { %v2705_v41 = vpack.c.bf16 %v2685_v47, %v2656_v31 }
 0x821   : > { %v3326_v3 = vunpack.c.h.b16 %v2705_v41  ;;  %v2878_v62 = vunpack.c.l.b16 %v2705_v41 }
 0x822   : > { %2967 = vrot.lane.b32.xlu2 %v6561_v2, %s5373_s25  ;;  %2969 = vrot.lane.b32.xlu0 %v6577_v22, %s5373_s25 }
 0x823   : > { %3193 = vrot.lane.b32.xlu1 %v6555_v63, %s5376_s28 }
 0x826   : > { %v2658_v58 = vpop.f32.mrf.mxu2  ;;  %v2687_v8 = vpop.f32.mrf.mxu3 }
 0x827   : > { %v2706_v37 = vpack.c.bf16 %v2687_v8, %v2658_v58 }
 0x829   : > { %v3327_v60 = vunpack.c.h.b16 %v2706_v37  ;;  %v2879_v25 = vunpack.c.l.b16 %v2706_v37 }
 0x82a   : > { %2733 = vrot.lane.b32.xlu2 %v6561_v2, %s5374_s26  ;;  %2735 = vrot.lane.b32.xlu0 %v6577_v22, %s5374_s26 }
 0x82b   : > { %3407 = vrot.lane.b32.xlu1 %v6561_v2, %s5378_s30  ;;  %v6591_v39 = vpack.c.b16 %v3327_v60, %v3326_v3  ;;  %v6623_v48 = vpack.c.b16 %v2879_v25, %v2878_v62 }
 0x832   : > { %3421 = vrot.lane.b32.xlu2 %v6569_v11, %s5377_s29  ;;  %2961 = vrot.lane.b32.xlu0 %v6577_v22, %s5375_s27 }
 0x833   : > { %3409 = vrot.lane.b32.xlu1 %v6577_v22, %s5378_s30 }
 0x83a   : > { %2965 = vrot.lane.b32.xlu2 %v6569_v11, %s5375_s27  ;;  %3419 = vrot.lane.b32.xlu0 %v6555_v63, %s5377_s29 }
 0x83b   : > { %3185 = vrot.lane.b32.xlu1 %v6555_v63, %s5379_s12 }
 0x842   : > { %3415 = vrot.lane.b32.xlu2 %v6561_v2, %s5377_s29  ;;  %3417 = vrot.lane.b32.xlu0 %v6577_v22, %s5377_s29 }
 0x84a   : > { %3189 = vrot.lane.b32.xlu2 %v6561_v2, %s5376_s28  ;;  %3191 = vrot.lane.b32.xlu0 %v6577_v22, %s5376_s28 }
 0x84f   : > { %v2661_v55 = vpop.f32.mrf.mxu2  ;;  %v2690_v61 = vpop.f32.mrf.mxu3 }
 0x850   : > { %v2707_v4 = vpack.c.bf16 %v2690_v61, %v2661_v55 }
 0x852   : > { %3183 = vrot.lane.b32.xlu2 %v6577_v22, %s5379_s12  ;;  %3181 = vrot.lane.b32.xlu0 %v6561_v2, %s5379_s12  ;;  %v3328_v34 = vunpack.c.h.b16 %v2707_v4  ;;  %v2880_v50 = vunpack.c.l.b16 %v2707_v4  ;;  %v2972_v19 = vpop.permute.xlu1 %2971 }
 0x853   : > { %v2994_v0 = vsel %vm791_vm1, %v2972_v19, 0 }
 0x857   : > { %v2663_v30 = vpop.f32.mrf.mxu2  ;;  %v2692_v10 = vpop.f32.mrf.mxu3 }
 0x858   : > { %v2708_v51 = vpack.c.bf16 %v2692_v10, %v2663_v30 }
 0x85a   : > { %v3329_v40 = vunpack.c.h.b16 %v2708_v51  ;;  %3413 = vrot.lane.b32.xlu2 %v6569_v11, %s5378_s30  ;;  %3411 = vrot.lane.b32.xlu0 %v6555_v63, %s5378_s30  ;;  %v2881_v29 = vunpack.c.l.b16 %v2708_v51  ;;  %v2738_v28 = vpop.permute.xlu1 %2737 }
 0x85b   : > { %v2760_v36 = vsel %vm791_vm1, %v2738_v28, 0 }
 0x85c   : > { %v6621_v24 = vpack.c.b16 %v3329_v40, %v3328_v34  ;;  %v6629_v57 = vpack.c.b16 %v2881_v29, %v2880_v50 }
 0x85f   : > { %v2666_v33 = vpop.f32.mrf.mxu2  ;;  %v2695_v18 = vpop.f32.mrf.mxu3 }
 0x860   : > { %v2709_v38 = vpack.c.bf16 %v2695_v18, %v2666_v33 }
 0x862   : > { %3104 = vrot.lane.b32.xlu2 %v6623_v48, %s5374_s26  ;;  %3187 = vrot.lane.b32.xlu0 %v6569_v11, %s5379_s12  ;;  %v2882_v32 = vunpack.c.l.b16 %v2709_v38  ;;  %v3330_v49 = vunpack.c.h.b16 %v2709_v38  ;;  %v2960_v42 = vpop.permute.xlu1 %2959  ;;  %s4442_s12 = sshll.u32 %s7459_s18, 2 }
 0x863   : > { %s384_s23 = scalar_lea.vmem %s7453_s11, %s4442_s12 }
 0x867   : > { %v2668_v14 = vpop.f32.mrf.mxu2  ;;  %v2697_v13 = vpop.f32.mrf.mxu3 }
 0x868   : > { %v2710_v16 = vpack.c.bf16 %v2697_v13, %v2668_v14 }
 0x86a   : > { %v2883_v45 = vunpack.c.l.b16 %v2710_v16  ;;  %v3331_v15 = vunpack.c.h.b16 %v2710_v16  ;;  %3106 = vrot.lane.b32.xlu0 %v6629_v57, %s5374_s26  ;;  %v6640_v6 = vpop.permute.xlu1 %2963 }
 0x86c   : > { %v2888_v9 = vpack.c.b16 %v2883_v45, %v2882_v32  ;;  %v6633_v21 = vpack.c.b16 %v3331_v15, %v3330_v49 }
 0x86e   : > { %3108 = vrot.lane.b32.xlu1 %v2888_v9, %s5374_s26 }
 0x874   : > { %v2740_v23 = vpop.permute.xlu2 %2739 }
 0x875   : > { %v2763_v52 = vsel %vm791_vm1, %v2740_v23, 0 }
 0x876   : > { %2769 = vmatpush.bf16.xpose.msrb.mxu0 %v2763_v52 }
 0x87c   : > { %v2968_v59 = vpop.permute.xlu2 %2967 }
 0x87d   : > { %v2988_v34 = vsel %vm791_vm1, %v2968_v59, 0 }
 0x87e   : > { %2770 = vmatpush.bf16.xpose.msrb.mxu0 %v2760_v36 }
 0x884   : > { %v2734_v27 = vpop.permute.xlu2 %2733 }
 0x885   : > { %v2754_v40 = vsel %vm791_vm1, %v2734_v27, 0 }
 0x88c   : > { %v2974_v20 = vpop.permute.xlu0 %2973  ;;  %v3422_v55 = vpop.permute.xlu2 %3421 }
 0x88d   : > { %v2997_v5 = vsel %vm791_vm1, %v2974_v20, 0  ;;  %v3196_v58 = vpop.permute.xlu1 %3195  ;;  %v3445_v25 = vsel %vm791_vm1, %v3422_v55, 0 }
 0x88e   : > { %3003 = vmatpush.bf16.xpose.msrb.mxu2 %v2997_v5  ;;  %v3219_v62 = vsel %vm791_vm1, %v3196_v58, 0 }
 0x894   : > { %v2970_v44 = vpop.permute.xlu0 %2969  ;;  %v2966_v14 = vpop.permute.xlu2 %2965 }
 0x895   : > { %v2991_v47 = vsel %vm791_vm1, %v2970_v44, 0  ;;  %v3194_v29 = vpop.permute.xlu1 %3193 }
 0x896   : > { %3004 = vmatpush.bf16.xpose.msrb.mxu2 %v2994_v0  ;;  %v3216_v13 = vsel %vm791_vm1, %v3194_v29, 0 }
 0x899   : > { %v2671_v43 = vpop.f32.mrf.mxu2  ;;  %v2700_v35 = vpop.f32.mrf.mxu3 }
 0x89a   : > { %v2711_v8 = vpack.c.bf16 %v2700_v35, %v2671_v43 }
 0x89c   : > { %v2736_v31 = vpop.permute.xlu0 %2735  ;;  %v2884_v61 = vunpack.c.l.b16 %v2711_v8  ;;  %v3332_v4 = vunpack.c.h.b16 %v2711_v8  ;;  %v3416_v49 = vpop.permute.xlu2 %3415 }
 0x89d   : > { %v2757_v41 = vsel %vm791_vm1, %v2736_v31, 0 }
 0x89e   : > { %2771 = vmatpush.bf16.xpose.msrb.mxu0 %v2757_v41  ;;  %3005 = vmatpush.bf16.xpose.msrb.mxu2 %v2991_v47 }
 0x8a1   : > { %v2673_v37 = vpop.f32.mrf.mxu2  ;;  %v2702_v3 = vpop.f32.mrf.mxu3 }
 0x8a2   : > { %v2712_v60 = vpack.c.bf16 %v2702_v3, %v2673_v37 }
 0x8a4   : > { %v2885_v30 = vunpack.c.l.b16 %v2712_v60  ;;  %v3333_v10 = vunpack.c.h.b16 %v2712_v60  ;;  %v2962_v51 = vpop.permute.xlu0 %2961 }
 0x8a6   : > { %v2889_v33 = vpack.c.b16 %v2885_v30, %v2884_v61  ;;  %v3337_v18 = vpack.c.b16 %v3333_v10, %v3332_v4  ;;  %2772 = vmatpush.bf16.xpose.msrb.mxu0 %v2754_v40  ;;  %3006 = vmatpush.bf16.xpose.msrb.mxu2 %v2988_v34 }
 0x8a8   : > { %2910 = vmatpush.bf16.msrb.mxu1 %v2889_v33  ;;  %3558 = vrot.lane.b32.xlu2 %v3337_v18, %s5374_s26 }
 0x8a9   : > { %3110 = vrot.lane.b32.xlu1 %v2889_v33, %s5374_s26 }
 0x8ac   : > { %2911 = vmatpush.bf16.msrb.mxu1 %v2888_v9  ;;  %v3420_v50 = vpop.permute.xlu0 %3419 }
 0x8ad   : > { %v3442_v38 = vsel %vm791_vm1, %v3420_v50, 0  ;;  %4798 = vmatmul.msk.bf16.vlgmr.msrb.gmra.mxu0 %vm791_vm1, %v6561_v2  ;;  %4806 = vmatmul.msk.bf16.vlgmr.msrb.gmra.mxu2 %vm791_vm1, %v2960_v42 }
 0x8ae   : > { %3225 = vmatpush.bf16.xpose.msra.mxu0 %v3219_v62  ;;  %3451 = vmatpush.bf16.xpose.msra.mxu2 %v3445_v25 }
 0x8b0   : > { %2912 = vmatpush.bf16.msrb.mxu1 %v6629_v57  ;;  %v3436_v57 = vsel %vm791_vm1, %v3416_v49, 0 }
 0x8b4   : > { %2913 = vmatpush.bf16.msrb.mxu1 %v6623_v48  ;;  %v3418_v16 = vpop.permute.xlu0 %3417  ;;  %v3190_v48 = vpop.permute.xlu2 %3189 }
 0x8b5   : > { %v3439_v32 = vsel %vm791_vm1, %v3418_v16, 0  ;;  %v3210_v15 = vsel %vm791_vm1, %v3190_v48, 0 }
 0x8b6   : > { %3226 = vmatpush.bf16.xpose.msra.mxu0 %v3216_v13  ;;  %3452 = vmatpush.bf16.xpose.msra.mxu2 %v3442_v38 }
 0x8b8   : > { %3358 = vmatpush.bf16.msra.mxu1 %v3337_v18 }
 0x8bc   : > { %3359 = vmatpush.bf16.msra.mxu1 %v6633_v21  ;;  %v3192_v2 = vpop.permute.xlu0 %3191  ;;  %v3184_v23 = vpop.permute.xlu2 %3183 }
 0x8bd   : > { %v3213_v45 = vsel %vm791_vm1, %v3192_v2, 0  ;;  %4799 = vmatmul.msk.bf16.gmra.mxu0 %vm791_vm1, %v6577_v22  ;;  %4807 = vmatmul.msk.bf16.gmra.mxu2 %vm791_vm1, %v2962_v51  ;;  %v3408_v22 = vpop.permute.xlu1 %3407 }
 0x8be   : > { %3453 = vmatpush.bf16.xpose.msra.mxu2 %v3439_v32  ;;  %3227 = vmatpush.bf16.xpose.msra.mxu0 %v3213_v45 }
 0x8c0   : > { %3360 = vmatpush.bf16.msra.mxu1 %v6621_v24 }
 0x8c4   : > { %3361 = vmatpush.bf16.msra.mxu1 %v6591_v39  ;;  %v3182_v9 = vpop.permute.xlu0 %3181  ;;  %v3414_v28 = vpop.permute.xlu2 %3413 }
 0x8c5   : > { %v3410_v19 = vpop.permute.xlu1 %3409 }
 0x8c6   : > { %3454 = vmatpush.bf16.xpose.msra.mxu2 %v3436_v57  ;;  %3228 = vmatpush.bf16.xpose.msra.mxu0 %v3210_v15 }
 0x8cc   : > { %v3412_v52 = vpop.permute.xlu0 %3411  ;;  %v3105_v5 = vpop.permute.xlu2 %3104 }
 0x8cd   : > { %4800 = vmatmul.msk.bf16.gmra.mxu0 %vm791_vm1, %v6555_v63  ;;  %4808 = vmatmul.msk.bf16.gmra.mxu2 %vm791_vm1, %v6640_v6  ;;  %v3186_v63 = vpop.permute.xlu1 %3185 }
 0x8d4   : > { %v3188_v36 = vpop.permute.xlu0 %3187 }
 0x8dc   : > { %v3107_v42 = vpop.permute.xlu0 %3106 }
 0x8dd   : > { %4801 = vmatmul.msk.bf16.gmra.mxu0 %vm791_vm1, %v6569_v11  ;;  %4809 = vmatmul.msk.bf16.gmra.mxu2 %vm791_vm1, %v2966_v14 }
 0x8e0   : > { %v3109_v11 = vpop.permute.xlu1 %3108 }
 0x8ed   : > { %4814 = vmatmul.msk.bf16.vlgmr.msra.gmra.mxu0 %vm791_vm1, %v3182_v9  ;;  %4822 = vmatmul.msk.bf16.vlgmr.msra.gmra.mxu2 %vm791_vm1, %v3408_v22 }
 0x8fd   : > { %4815 = vmatmul.msk.bf16.gmra.mxu0 %vm791_vm1, %v3184_v23  ;;  %4823 = vmatmul.msk.bf16.gmra.mxu2 %vm791_vm1, %v3410_v19 }
 0x902   : > { %v3559_v59 = vpop.permute.xlu2 %3558 }
 0x90d   : > { %4816 = vmatmul.msk.bf16.gmra.mxu0 %vm791_vm1, %v3186_v63  ;;  %4824 = vmatmul.msk.bf16.gmra.mxu2 %vm791_vm1, %v3412_v52 }
 0x91b   : > { %v3111_v20 = vpop.permute.xlu1 %3110 }
 0x91c   : > { %3132 = vmatpush.bf16.msrb.mxu3 %v3111_v20 }
 0x91d   : > { %4817 = vmatmul.msk.bf16.gmra.mxu0 %vm791_vm1, %v3188_v36  ;;  %4825 = vmatmul.msk.bf16.gmra.mxu2 %vm791_vm1, %v3414_v28 }
 0x920   : > { %3133 = vmatpush.bf16.msrb.mxu3 %v3109_v11 }
 0x924   : > { %3134 = vmatpush.bf16.msrb.mxu3 %v3107_v42 }
 0x928   : > { %3135 = vmatpush.bf16.msrb.mxu3 %v3105_v5 }
 0x92a   : > { %v6682_v44 = vpop.f32.mrf.mxu0 }
 0x92b   : > { %v2794_v0 = vsel %vm562_vm0, %v6682_v44, -inf }
 0x92c   : > { %3580 = vmatpush.bf16.msra.mxu3 %v3559_v59  ;;  %2795 = vmax.xlane.f32.xlu1 %v2794_v0 }
 0x930   : > { %v6686_v6 = vpop.f32.mrf.mxu2 }
 0x931   : > { %v3028_v27 = vsel %vm562_vm0, %v6686_v6, -inf }
 0x932   : > { %v6690_v43 = vpop.f32.mrf.mxu0  ;;  %3029 = vmax.xlane.f32.xlu2 %v3028_v27 }
 0x933   : > { %v2797_v31 = vsel %vm562_vm0, %v6690_v43, -inf }
 0x938   : > { %v6692_v35 = vpop.f32.mrf.mxu2 }
 0x939   : > { %v3031_v47 = vsel %vm562_vm0, %v6692_v35, -inf }
 0x93a   : > { %v6698_v41 = vpop.f32.mrf.mxu0  ;;  %2798 = vmax.xlane.f32.xlu2 %v2797_v31  ;;  %3032 = vmax.xlane.f32.xlu0 %v3031_v47 }
 0x93b   : > { %v2800_v58 = vsel %vm562_vm0, %v6698_v41, -inf }
 0x93c   : > { %2801 = vmax.xlane.f32.xlu1 %v2800_v58 }
 0x940   : > { %v6702_v8 = vpop.f32.mrf.mxu2 }
 0x941   : > { %v3034_v3 = vsel %vm562_vm0, %v6702_v8, -inf }
 0x942   : > { %v6704_v37 = vpop.f32.mrf.mxu0 }
 0x943   : > { %v2803_v4 = vsel %vm562_vm0, %v6704_v37, -inf }
 0x944   : > { %3035 = vmax.xlane.f32.xlu1 %v3034_v3 }
 0x948   : > { %v6708_v60 = vpop.f32.mrf.mxu2 }
 0x949   : > { %v3037_v55 = vsel %vm562_vm0, %v6708_v60, -inf }
 0x94a   : > { %v6712_v61 = vpop.f32.mrf.mxu0  ;;  %3038 = vmax.xlane.f32.xlu0 %v3037_v55 }
 0x94b   : > { %v2806_v34 = vsel %vm562_vm0, %v6712_v61, -inf }
 0x94c   : > { %2804 = vmax.xlane.f32.xlu1 %v2803_v4 }
 0x950   : > { %v6716_v30 = vpop.f32.mrf.mxu2 }
 0x951   : > { %v3040_v10 = vsel %vm562_vm0, %v6716_v30, -inf }
 0x952   : > { %v6720_v51 = vpop.f32.mrf.mxu0  ;;  %3041 = vmax.xlane.f32.xlu2 %v3040_v10 }
 0x953   : > { %v2809_v62 = vsel %vm562_vm0, %v6720_v51, -inf }
 0x954   : > { %2807 = vmax.xlane.f32.xlu1 %v2806_v34 }
 0x958   : > { %v6724_v40 = vpop.f32.mrf.mxu2 }
 0x959   : > { %v3043_v50 = vsel %vm562_vm0, %v6724_v40, -inf }
 0x95a   : > { %v6726_v25 = vpop.f32.mrf.mxu0 }
 0x95b   : > { %v2812_v14 = vsel %vm562_vm0, %v6726_v25, -inf }
 0x95c   : > { %2810 = vmax.xlane.f32.xlu1 %v2809_v62 }
 0x960   : > { %v6730_v33 = vpop.f32.mrf.mxu2 }
 0x961   : > { %v3046_v49 = vsel %vm562_vm0, %v6730_v33, -inf }
 0x962   : > { %v6732_v18 = vpop.f32.mrf.mxu0 }
 0x963   : > { %v2815_v29 = vsel %vm562_vm0, %v6732_v18, -inf }
 0x964   : > { %2816 = vmax.xlane.f32.xlu0 %v2815_v29  ;;  %3044 = vmax.xlane.f32.xlu1 %v3043_v50 }
 0x968   : > { %v6738_v38 = vpop.f32.mrf.mxu2 }
 0x969   : > { %v3049_v13 = vsel %vm562_vm0, %v6738_v38, -inf }
 0x96a   : > { %3554 = vrot.lane.b32.xlu2 %v6621_v24, %s5374_s26  ;;  %v6746_v16 = vpop.f32.mrf.mxu0 }
 0x96b   : > { %v3250_v2 = vsel %vm562_vm0, %v6746_v16, -inf }
 0x96c   : > { %2813 = vmax.xlane.f32.xlu1 %v2812_v14  ;;  %3050 = vmax.xlane.f32.xlu0 %v3049_v13 }
 0x970   : > { %v6748_v32 = vpop.f32.mrf.mxu2 }
 0x971   : > { %v3476_v48 = vsel %vm562_vm0, %v6748_v32, -inf }
 0x972   : > { %v6754_v24 = vpop.f32.mrf.mxu0 }
 0x973   : > { %v3253_v57 = vsel %vm562_vm0, %v6754_v24, -inf }
 0x974   : > { %3047 = vmax.xlane.f32.xlu1 %v3046_v49  ;;  %3251 = vmax.xlane.f32.xlu0 %v3250_v2 }
 0x978   : > { %v6756_v45 = vpop.f32.mrf.mxu2 }
 0x979   : > { %v3479_v22 = vsel %vm562_vm0, %v6756_v45, -inf }
 0x97a   : > { %v6766_v9 = vpop.f32.mrf.mxu0 }
 0x97c   : > { %3254 = vmax.xlane.f32.xlu0 %v3253_v57  ;;  %3477 = vmax.xlane.f32.xlu1 %v3476_v48 }
 0x980   : > { %v6762_v15 = vpop.f32.mrf.mxu2 }
 0x981   : > { %v3482_v63 = vsel %vm562_vm0, %v6762_v15, -inf }
 0x982   : > { %v6770_v23 = vpop.f32.mrf.mxu0 }
 0x983   : > { %v3259_v28 = vsel %vm562_vm0, %v6770_v23, -inf }
 0x984   : > { %3480 = vmax.xlane.f32.xlu0 %v3479_v22 }
 0x988   : > { %v6768_v19 = vpop.f32.mrf.mxu2 }
 0x98a   : > { %v6780_v11 = vpop.f32.mrf.mxu0 }
 0x990   : > { %v6774_v52 = vpop.f32.mrf.mxu2 }
 0x992   : > { %v6788_v5 = vpop.f32.mrf.mxu0 }
 0x993   : > { %3483 = vmax.xlane.f32.xlu2 %v3482_v63  ;;  %v3265_v0 = vsel %vm562_vm0, %v6788_v5, -inf  ;;  %v3485_v63 = vsel %vm562_vm0, %v6768_v19, -inf }
 0x995   : > { %3556 = vrot.lane.b32.xlu1 %v6633_v21, %s5374_s26 }
 0x998   : > { %3552 = vrot.lane.b32.xlu0 %v6591_v39, %s5374_s26  ;;  %v6784_v36 = vpop.f32.mrf.mxu2 }
 0x999   : > { %v3491_v20 = vsel %vm562_vm0, %v6784_v36, -inf }
 0x99a   : > { %v6796_v4 = vpop.f32.mrf.mxu0 }
 0x99b   : > { %3260 = vmax.xlane.f32.xlu2 %v3259_v28 }
 0x99f   : > { %v2796_v42 = vpop.xlane.xlu1 %2795 }
 0x9a0   : > { %v2818_v21 = vsub.f32 %v6682_v44, %v2796_v42 }
 0x9a2   : > { %v2826_v27 = vmul.f32 1.442695, %v2818_v21 }
 0x9a3   : > { %3492 = vmax.xlane.f32.xlu2 %v3491_v20 }
 0x9a4   : > { %5202 = vpow2.f32 %v2826_v27  ;;  %v3488_v27 = vsel %vm562_vm0, %v6774_v52, -inf }
 0x9a5   : > { %v3030_v59 = vpop.xlane.xlu2 %3029 }
 0x9a6   : > { %v3052_v39 = vsub.f32 %v6686_v6, %v3030_v59  ;;  %v3268_v6 = vsel %vm562_vm0, %v6796_v4, -inf }
 0x9a8   : > { %v3060_v31 = vmul.f32 1.442695, %v3052_v39 }
 0x9aa   : > { %5204 = vpow2.f32 %v3060_v31  ;;  %v6800_v62 = vpop.eup %5202 }
 0x9ab   : > { %3266 = vmax.xlane.f32.xlu2 %v3265_v0 }
 0x9ad   : > { %v2799_v47 = vpop.xlane.xlu2 %2798  ;;  %v3033_v58 = vpop.xlane.xlu0 %3032 }
 0x9ae   : > { %v2819_v3 = vsub.f32 %v6690_v43, %v2799_v47  ;;  %v3053_v55 = vsub.f32 %v6692_v35, %v3033_v58 }
 0x9af   : > { %v2802_v10 = vpop.xlane.xlu1 %2801 }
 0x9b0   : > { %v2828_v34 = vmul.f32 1.442695, %v2819_v3  ;;  %v3062_v44 = vmul.f32 1.442695, %v3053_v55  ;;  %v6802_v29 = vpop.eup %5204  ;;  %v2820_v48 = vsub.f32 %v6698_v41, %v2802_v10  ;;  %v3256_v41 = vsel %vm562_vm0, %v6766_v9, -inf }
 0x9b2   : > { %5206 = vpow2.f32 %v2828_v34  ;;  %v2830_v28 = vmul.f32 1.442695, %v2820_v48 }
 0x9b3   : > { %5208 = vpow2.f32 %v3062_v44  ;;  %3269 = vmax.xlane.f32.xlu2 %v3268_v6  ;;  %v6836_v6 = vpop.f32.mrf.mxu0 }
 0x9b7   : > { %v3036_v43 = vpop.xlane.xlu1 %3035 }
 0x9b8   : > { %v5207_v50 = vpop.eup %5206  ;;  %v3054_v35 = vsub.f32 %v6702_v8, %v3036_v43 }
 0x9b9   : > { %v6805_v14 = vpop.eup %5208  ;;  %v2866_v13 = vpack.c.bf16 %v5207_v50, %v6800_v62  ;;  %v2845_v49 = vsel %vm562_vm0, %v5207_v50, 0.0 }
 0x9ba   : > { %v3100_v2 = vpack.c.bf16 %v6805_v14, %v6802_v29  ;;  %v3064_v57 = vmul.f32 1.442695, %v3054_v35 }
 0x9bb   : > { %2846 = vadd.xlane.f32.xlu2 %v2845_v49  ;;  %4802 = vmatmul.msk.bf16.vlgmr.msrb.gmra.mxu1 %vm562_vm0, %v2866_v13  ;;  %v3271_v13 = vsel %vm562_vm0, %v6836_v6, -inf }
 0x9bc   : > { %5210 = vpow2.f32 %v3064_v57  ;;  %4810 = vmatmul.msk.bf16.vlgmr.msrb.gmra.mxu3 %vm562_vm0, %v3100_v2 }
 0x9bd   : > { %v3039_v22 = vpop.xlane.xlu0 %3038 }
 0x9be   : > { %v3055_v8 = vsub.f32 %v6708_v60, %v3039_v22  ;;  %v6821_v60 = vpop.f32.mrf.mxu2 }
 0x9bf   : > { %3486 = vmax.xlane.f32.xlu1 %v3485_v63  ;;  %v2805_v20 = vpop.xlane.xlu1 %2804  ;;  %v3494_v3 = vsel %vm562_vm0, %v6821_v60, -inf }
 0x9c0   : > { %v3066_v42 = vmul.f32 1.442695, %v3055_v8  ;;  %v2821_v59 = vsub.f32 %v6704_v37, %v2805_v20 }
 0x9c2   : > { %v5211_v21 = vpop.eup %5210  ;;  %5212 = vpow2.f32 %v3066_v42  ;;  %v2832_v39 = vmul.f32 1.442695, %v2821_v59  ;;  %3257 = vmax.xlane.f32.xlu0 %v3256_v41  ;;  %v3076_v42 = vsel %vm562_vm0, %v6802_v29, 0.0 }
 0x9c3   : > { %5214 = vpow2.f32 %v2830_v28  ;;  %v3082_v0 = vsel %vm562_vm0, %v5211_v21, 0.0 }
 0x9c4   : > { %5216 = vpow2.f32 %v2832_v39  ;;  %3083 = vadd.xlane.f32.xlu2 %v3082_v0  ;;  %v2842_v39 = vsel %vm562_vm0, %v6800_v62, 0.0  ;;  %v3079_v62 = vsel %vm562_vm0, %v6805_v14, 0.0 }
 0x9c5   : > { %v3042_v35 = vpop.xlane.xlu2 %3041 }
 0x9c6   : > { %v6843_v57 = vpop.f32.mrf.mxu2  ;;  %v3056_v22 = vsub.f32 %v6716_v30, %v3042_v35 }
 0x9c7   : > { %3489 = vmax.xlane.f32.xlu1 %v3488_v27  ;;  %v2808_v31 = vpop.xlane.xlu1 %2807  ;;  %v3497_v8 = vsel %vm562_vm0, %v6843_v57, -inf }
 0x9c8   : > { %v6825_v37 = vpop.eup %5212  ;;  %v2822_v47 = vsub.f32 %v6712_v61, %v2808_v31  ;;  %v3262_v61 = vsel %vm562_vm0, %v6780_v11, -inf  ;;  %v3068_v28 = vmul.f32 1.442695, %v3056_v22 }
 0x9c9   : > { %v5215_v58 = vpop.eup %5214  ;;  %v3101_v55 = vpack.c.bf16 %v6825_v37, %v5211_v21 }
 0x9ca   : > { %v6831_v10 = vpop.eup %5216  ;;  %v2834_v34 = vmul.f32 1.442695, %v2822_v47  ;;  %3495 = vmax.xlane.f32.xlu0 %v3494_v3  ;;  %v2848_v31 = vsel %vm562_vm0, %v5215_v58, 0.0 }
 0x9cb   : > { %v2867_v44 = vpack.c.bf16 %v6831_v10, %v5215_v58 }
 0x9cc   : > { %5218 = vpow2.f32 %v2834_v34  ;;  %4811 = vmatmul.msk.bf16.gmra.mxu3 %vm562_vm0, %v3101_v55 }
 0x9cd   : > { %4803 = vmatmul.msk.bf16.gmra.mxu1 %vm562_vm0, %v2867_v44 }
 0x9cf   : > { %3263 = vmax.xlane.f32.xlu1 %v3262_v61  ;;  %v2811_v43 = vpop.xlane.xlu1 %2810 }
 0x9d0   : > { %v2823_v50 = vsub.f32 %v6720_v51, %v2811_v43 }
 0x9d2   : > { %v5219_v49 = vpop.eup %5218  ;;  %v2836_v2 = vmul.f32 1.442695, %v2823_v50  ;;  %3272 = vmax.xlane.f32.xlu0 %v3271_v13 }
 0x9d3   : > { %v2854_v48 = vsel %vm562_vm0, %v5219_v49, 0.0 }
 0x9d4   : > { %5220 = vpow2.f32 %v2836_v2  ;;  %2855 = vadd.xlane.f32.xlu2 %v2854_v48 }
 0x9d5   : > { %5222 = vpow2.f32 %v3068_v28 }
 0x9d7   : > { %v2817_v63 = vpop.xlane.xlu0 %2816  ;;  %3498 = vmax.xlane.f32.xlu1 %v3497_v8  ;;  %v3045_v51 = vpop.xlane.xlu1 %3044 }
 0x9d8   : > { %v3057_v20 = vsub.f32 %v6724_v40, %v3045_v51  ;;  %v2825_v21 = vsub.f32 %v6732_v18, %v2817_v63 }
 0x9da   : > { %v6852_v59 = vpop.eup %5220  ;;  %v3070_v41 = vmul.f32 1.442695, %v3057_v20  ;;  %3077 = vadd.xlane.f32.xlu0 %v3076_v42  ;;  %v2840_v27 = vmul.f32 1.442695, %v2825_v21 }
 0x9db   : > { %v2868_v30 = vpack.c.bf16 %v6852_v59, %v5219_v49  ;;  %v5223_v47 = vpop.eup %5222 }
 0x9dc   : > { %5224 = vpow2.f32 %v3070_v41 }
 0x9dd   : > { %4804 = vmatmul.msk.bf16.gmra.mxu1 %vm562_vm0, %v2868_v30  ;;  %5226 = vpow2.f32 %v2840_v27 }
 0x9df   : > { %v3051_v0 = vpop.xlane.xlu0 %3050  ;;  %2843 = vadd.xlane.f32.xlu1 %v2842_v39  ;;  %v2814_v40 = vpop.xlane.xlu1 %2813 }
 0x9e0   : > { %v2824_v29 = vsub.f32 %v6726_v25, %v2814_v40  ;;  %v3059_v18 = vsub.f32 %v6738_v38, %v3051_v0  ;;  %v3085_v38 = vsel %vm562_vm0, %v6825_v37, 0.0  ;;  %v3555_v40 = vpop.permute.xlu2 %3554 }
 0x9e2   : > { %v2838_v3 = vmul.f32 1.442695, %v2824_v29  ;;  %2849 = vadd.xlane.f32.xlu0 %v2848_v31  ;;  %v6861_v55 = vpop.eup %5224  ;;  %v3074_v44 = vmul.f32 1.442695, %v3059_v18  ;;  %v3088_v31 = vsel %vm562_vm0, %v5223_v47, 0.0 }
 0x9e3   : > { %v3102_v34 = vpack.c.bf16 %v6861_v55, %v5223_v47  ;;  %v6872_v50 = vpop.eup %5226 }
 0x9e4   : > { %5228 = vpow2.f32 %v2838_v3 }
 0x9e5   : > { %4812 = vmatmul.msk.bf16.gmra.mxu3 %vm562_vm0, %v3102_v34  ;;  %5230 = vpow2.f32 %v3074_v44 }
 0x9e7   : > { %v3252_v25 = vpop.xlane.xlu0 %3251  ;;  %3080 = vadd.xlane.f32.xlu1 %v3079_v62  ;;  %v3048_v58 = vpop.xlane.xlu1 %3047 }
 0x9e8   : > { %v3274_v61 = vsub.f32 %v6746_v16, %v3252_v25  ;;  %v3058_v43 = vsub.f32 %v6730_v33, %v3048_v58  ;;  %v2851_v33 = vsel %vm562_vm0, %v6831_v10, 0.0 }
 0x9ea   : > { %v3282_v35 = vmul.f32 1.442695, %v3274_v61  ;;  %v3072_v13 = vmul.f32 1.442695, %v3058_v43  ;;  %3086 = vadd.xlane.f32.xlu0 %v3085_v38  ;;  %v6874_v49 = vpop.eup %5228 }
 0x9eb   : > { %v2869_v14 = vpack.c.bf16 %v6872_v50, %v6874_v49  ;;  %v6883_v22 = vpop.eup %5230 }
 0x9ec   : > { %5232 = vpow2.f32 %v3282_v35 }
 0x9ed   : > { %5234 = vpow2.f32 %v3072_v13  ;;  %4805 = vmatmul.msk.bf16.gmra.mxu1 %vm562_vm0, %v2869_v14  ;;  %v3091_v13 = vsel %vm562_vm0, %v6861_v55, 0.0 }
 0x9ef   : > { %v3255_v16 = vpop.xlane.xlu0 %3254  ;;  %2852 = vadd.xlane.f32.xlu1 %v2851_v33  ;;  %v3478_v37 = vpop.xlane.xlu1 %3477 }
 0x9f0   : > { %v3275_v2 = vsub.f32 %v6754_v24, %v3255_v16  ;;  %v3500_v48 = vsub.f32 %v6748_v32, %v3478_v37 }
 0x9f2   : > { %v5233_v8 = vpop.eup %5232  ;;  %v3284_v63 = vmul.f32 1.442695, %v3275_v2  ;;  %v3508_v51 = vmul.f32 1.442695, %v3500_v48 }
 0x9f3   : > { %v6885_v28 = vpop.eup %5234  ;;  %v3298_v20 = vsel %vm562_vm0, %v5233_v8, 0.0 }
 0x9f4   : > { %5236 = vpow2.f32 %v3284_v63  ;;  %3299 = vadd.xlane.f32.xlu2 %v3298_v20  ;;  %v3103_v10 = vpack.c.bf16 %v6883_v22, %v6885_v28 }
 0x9f5   : > { %5238 = vpow2.f32 %v3508_v51 }
 0x9f6   : > { %4813 = vmatmul.msk.bf16.gmra.mxu3 %vm562_vm0, %v3103_v10 }
 0x9f7   : > { %v3481_v24 = vpop.xlane.xlu0 %3480 }
 0x9f8   : > { %v3501_v32 = vsub.f32 %v6756_v45, %v3481_v24  ;;  %v2857_v45 = vsel %vm562_vm0, %v6852_v59, 0.0 }
 0x9fa   : > { %v5237_v42 = vpop.eup %5236  ;;  %v3510_v41 = vmul.f32 1.442695, %v3501_v32 }
 0x9fb   : > { %v5239_v30 = vpop.eup %5238  ;;  %v3322_v21 = vpack.c.bf16 %v5237_v42, %v5233_v8  ;;  %v3301_v39 = vsel %vm562_vm0, %v5237_v42, 0.0 }
 0x9fc   : > { %5240 = vpow2.f32 %v3510_v41  ;;  %3302 = vadd.xlane.f32.xlu0 %v3301_v39  ;;  %v3524_v0 = vsel %vm562_vm0, %v5239_v30, 0.0 }
 0x9fd   : > { %3525 = vadd.xlane.f32.xlu1 %v3524_v0  ;;  %4818 = vmatmul.msk.bf16.vlgmr.msra.gmra.mxu1 %vm562_vm0, %v3322_v21 }
 0xa02   : > { %v5241_v27 = vpop.eup %5240 }
 0xa03   : > { %v3527_v29 = vsel %vm562_vm0, %v5241_v27, 0.0  ;;  %v3548_v59 = vpack.c.bf16 %v5241_v27, %v5239_v30 }
 0xa04   : > { %3528 = vadd.xlane.f32.xlu2 %v3527_v29  ;;  %2858 = vadd.xlane.f32.xlu0 %v2857_v45 }
 0xa05   : > { %3089 = vadd.xlane.f32.xlu1 %v3088_v31 }
 0xa06   : > { %v3484_v3 = vpop.xlane.xlu2 %3483 }
 0xa07   : > { %v3502_v18 = vsub.f32 %v6762_v15, %v3484_v3  ;;  %v3557_v34 = vpop.permute.xlu1 %3556 }
 0xa08   : > { %3581 = vmatpush.bf16.msra.mxu3 %v3557_v34 }
 0xa09   : > { %v3512_v62 = vmul.f32 1.442695, %v3502_v18 }
 0xa0a   : > { %v3553_v25 = vpop.permute.xlu0 %3552 }
 0xa0b   : > { %5242 = vpow2.f32 %v3512_v62 }
 0xa0c   : > { %3582 = vmatpush.bf16.msra.mxu3 %v3555_v40 }
 0xa0e   : > { %v3261_v44 = vpop.xlane.xlu2 %3260 }
 0xa0f   : > { %v3277_v58 = vsub.f32 %v6770_v23, %v3261_v44 }
 0xa10   : > { %3583 = vmatpush.bf16.msra.mxu3 %v3553_v25 }
 0xa11   : > { %v5243_v61 = vpop.eup %5242  ;;  %v3288_v43 = vmul.f32 1.442695, %v3277_v58 }
 0xa12   : > { %v3530_v38 = vsel %vm562_vm0, %v5243_v61, 0.0 }
 0xa13   : > { %5244 = vpow2.f32 %v3288_v43  ;;  %3531 = vadd.xlane.f32.xlu0 %v3530_v38  ;;  %4826 = vmatmul.msk.bf16.vlgmr.msra.gmra.mxu3 %vm562_vm0, %v3548_v59  ;;  %v2863_v43 = vsel %vm562_vm0, %v6872_v50, 0.0 }
 0xa16   : > { %v3493_v35 = vpop.xlane.xlu2 %3492 }
 0xa17   : > { %v3505_v32 = vsub.f32 %v6784_v36, %v3493_v35 }
 0xa19   : > { %v5245_v15 = vpop.eup %5244  ;;  %v3518_v39 = vmul.f32 1.442695, %v3505_v32 }
 0xa1a   : > { %v3307_v47 = vsel %vm562_vm0, %v5245_v15, 0.0 }
 0xa1b   : > { %3308 = vadd.xlane.f32.xlu2 %v3307_v47 }
 0xa1e   : > { %v3267_v23 = vpop.xlane.xlu2 %3266 }
 0xa23   : > { %3092 = vadd.xlane.f32.xlu2 %v3091_v13 }
 0xa26   : > { %v3270_v16 = vpop.xlane.xlu2 %3269 }
 0xa27   : > { %v3280_v29 = vsub.f32 %v6796_v4, %v3270_v16 }
 0xa29   : > { %v3294_v18 = vmul.f32 1.442695, %v3280_v29 }
 0xa32   : > { %v3487_v14 = vpop.xlane.xlu1 %3486 }
 0xa33   : > { %v3503_v33 = vsub.f32 %v6768_v19, %v3487_v14  ;;  %v6912_v19 = vpop.xlane.xlu2 %2846 }
 0xa35   : > { %v3514_v37 = vmul.f32 1.442695, %v3503_v33  ;;  %v3258_v2 = vpop.xlane.xlu0 %3257 }
 0xa36   : > { %v3276_v48 = vsub.f32 %v6766_v9, %v3258_v2  ;;  %v3279_v9 = vsub.f32 %v6788_v5, %v3267_v23 }
 0xa37   : > { %5246 = vpow2.f32 %v3514_v37 }
 0xa38   : > { %v3286_v8 = vmul.f32 1.442695, %v3276_v48  ;;  %v6908_v63 = vpop.f32.mrf.mxu1  ;;  %v3292_v36 = vmul.f32 1.442695, %v3279_v9 }
 0xa3a   : > { %5248 = vpow2.f32 %v3286_v8  ;;  %v3490_v51 = vpop.xlane.xlu1 %3489 }
 0xa3b   : > { %v3504_v20 = vsub.f32 %v6774_v52, %v3490_v51  ;;  %v3084_v34 = vpop.xlane.xlu2 %3083 }
 0xa3d   : > { %v5247_v10 = vpop.eup %5246  ;;  %v3516_v55 = vmul.f32 1.442695, %v3504_v20  ;;  %v3496_v24 = vpop.xlane.xlu0 %3495 }
 0xa3e   : > { %v3549_v42 = vpack.c.bf16 %v5247_v10, %v5243_v61  ;;  %v3506_v47 = vsub.f32 %v6821_v60, %v3496_v24 }
 0xa3f   : > { %5250 = vpow2.f32 %v3516_v55  ;;  %v6922_v45 = vpop.f32.mrf.mxu3 }
 0xa40   : > { %v5249_v41 = vpop.eup %5248  ;;  %4827 = vmatmul.msk.bf16.gmra.mxu3 %vm562_vm0, %v3549_v42  ;;  %v6917_v0 = vpop.f32.mrf.mxu1  ;;  %5252 = vpow2.f32 %v3518_v39  ;;  %v3520_v60 = vmul.f32 1.442695, %v3506_v47 }
 0xa41   : > { %v3304_v30 = vsel %vm562_vm0, %v5249_v41, 0.0  ;;  %v3323_v21 = vpack.c.bf16 %v5245_v15, %v5249_v41 }
 0xa42   : > { %3305 = vadd.xlane.f32.xlu1 %v3304_v30  ;;  %v3264_v52 = vpop.xlane.xlu1 %3263 }
 0xa43   : > { %v3278_v40 = vsub.f32 %v6780_v11, %v3264_v52  ;;  %4819 = vmatmul.msk.bf16.gmra.mxu1 %vm562_vm0, %v3323_v21  ;;  %v3533_v11 = vsel %vm562_vm0, %v5247_v10, 0.0  ;;  %v2860_v10 = vsel %vm562_vm0, %v6874_v49, 0.0 }
 0xa45   : > { %v5251_v27 = vpop.eup %5250  ;;  %v3290_v5 = vmul.f32 1.442695, %v3278_v40  ;;  %v3273_v31 = vpop.xlane.xlu0 %3272 }
 0xa46   : > { %v3536_v3 = vsel %vm562_vm0, %v5251_v27, 0.0  ;;  %v5253_v25 = vpop.eup %5252  ;;  %v3281_v13 = vsub.f32 %v6836_v6, %v3273_v31 }
 0xa47   : > { %5254 = vpow2.f32 %v3290_v5  ;;  %3537 = vadd.xlane.f32.xlu2 %v3536_v3  ;;  %v3550_v15 = vpack.c.bf16 %v5253_v25, %v5251_v27  ;;  %v6933_v35 = vpop.f32.mrf.mxu3  ;;  %v3539_v8 = vsel %vm562_vm0, %v5253_v25, 0.0  ;;  %v3097_v5 = vsel %vm562_vm0, %v6883_v22, 0.0 }
 0xa48   : > { %5256 = vpow2.f32 %v3292_v36  ;;  %v3296_v2 = vmul.f32 1.442695, %v3281_v13  ;;  %v3094_v36 = vsel %vm562_vm0, %v6885_v28, 0.0 }
 0xa49   : > { %5258 = vpow2.f32 %v3294_v18 }
 0xa4a   : > { %v2920_v62 = vpop.f32.mrf.mxu1  ;;  %3534 = vadd.xlane.f32.xlu1 %v3533_v11  ;;  %v3499_v44 = vpop.xlane.xlu1 %3498  ;;  %5260 = vrcp.f32 %v3084_v34 }
 0xa4b   : > { %v3507_v4 = vsub.f32 %v6843_v57, %v3499_v44  ;;  %v2856_v57 = vpop.xlane.xlu2 %2855 }
 0xa4c   : > { %5262 = vrcp.f32 %v2856_v57 }
 0xa4d   : > { %v5255_v58 = vpop.eup %5254  ;;  %v6927_v61 = vpop.xlane.xlu0 %3077  ;;  %v3522_v23 = vmul.f32 1.442695, %v3507_v4 }
 0xa4e   : > { %v5257_v59 = vpop.eup %5256  ;;  %v3310_v38 = vsel %vm562_vm0, %v5255_v58, 0.0 }
 0xa4f   : > { %2864 = vadd.xlane.f32.xlu2 %v2863_v43  ;;  %3311 = vadd.xlane.f32.xlu0 %v3310_v38  ;;  %v3313_v14 = vsel %vm562_vm0, %v5257_v59, 0.0  ;;  %v3324_v33 = vpack.c.bf16 %v5257_v59, %v5255_v58  ;;  %v5259_v37 = vpop.eup %5258  ;;  %5264 = vpow2.f32 %v3522_v23  ;;  %v3142_v20 = vpop.f32.mrf.mxu3 }
 0xa50   : > { %4828 = vmatmul.msk.bf16.gmra.mxu3 %vm562_vm0, %v3550_v15  ;;  %v3316_v48 = vsel %vm562_vm0, %v5259_v37, 0.0  ;;  %v5261_v51 = vpop.eup %5260 }
 0xa51   : > { %v3167_v21 = vmul.f32 %v5261_v51, %v3142_v20 }
 0xa52   : > { %v2922_v16 = vpop.f32.mrf.mxu1  ;;  %3314 = vadd.xlane.f32.xlu1 %v3313_v14  ;;  %v6938_v50 = vpop.xlane.xlu1 %2843 }
 0xa53   : > { %4820 = vmatmul.msk.bf16.gmra.mxu1 %vm562_vm0, %v3324_v33  ;;  %v5263_v55 = vpop.eup %5262 }
 0xa55   : > { %v2850_v6 = vpop.xlane.xlu0 %2849  ;;  %v5265_v42 = vpop.eup %5264 }
 0xa56   : > { %5266 = vrcp.f32 %v2850_v6  ;;  %v3545_v27 = vsel %vm562_vm0, %v5265_v42, 0.0 }
 0xa57   : > { %5268 = vpow2.f32 %v3520_v60  ;;  %3317 = vadd.xlane.f32.xlu2 %v3316_v48  ;;  %3540 = vadd.xlane.f32.xlu0 %v3539_v8  ;;  %v3144_v34 = vpop.f32.mrf.mxu3 }
 0xa58   : > { %5270 = vpow2.f32 %v3296_v2 }
 0xa5a   : > { %v2925_v24 = vpop.f32.mrf.mxu1  ;;  %2861 = vadd.xlane.f32.xlu1 %v2860_v10  ;;  %v3081_v32 = vpop.xlane.xlu1 %3080 }
 0xa5b   : > { %v2947_v41 = vmul.f32 %v5263_v55, %v2925_v24 }
 0xa5c   : > { %v5267_v9 = vpop.eup %5266 }
 0xa5d   : > { %v5269_v30 = vpop.eup %5268  ;;  %v2945_v39 = vmul.f32 %v5267_v9, %v2920_v62  ;;  %v3087_v40 = vpop.xlane.xlu0 %3086 }
 0xa5e   : > { %v5271_v52 = vpop.eup %5270  ;;  %v3551_v29 = vpack.c.bf16 %v5265_v42, %v5269_v30  ;;  %5272 = vrcp.f32 %v3087_v40  ;;  %v3542_v62 = vsel %vm562_vm0, %v5269_v30, 0.0 }
 0xa5f   : > { %3095 = vadd.xlane.f32.xlu0 %v3094_v36  ;;  %3546 = vadd.xlane.f32.xlu2 %v3545_v27  ;;  %v6948_v49 = vadd.f32 %v3167_v21, %v2945_v39  ;;  %v3325_v31 = vpack.c.bf16 %v5271_v52, %v5259_v37  ;;  %v3319_v28 = vsel %vm562_vm0, %v5271_v52, 0.0 }
 0xa60   : > { %4829 = vmatmul.msk.bf16.gmra.mxu3 %vm562_vm0, %v3551_v29 }
 0xa62   : > { %3098 = vadd.xlane.f32.xlu1 %v3097_v5  ;;  %v2853_v3 = vpop.xlane.xlu1 %2852  ;;  %v2927_v22 = vpop.f32.mrf.mxu1 }
 0xa63   : > { %5274 = vrcp.f32 %v2853_v3  ;;  %4821 = vmatmul.msk.bf16.gmra.mxu1 %vm562_vm0, %v3325_v31 }
 0xa64   : > { %v5273_v18 = vpop.eup %5272 }
 0xa65   : > { %v3168_v25 = vmul.f32 %v5273_v18, %v3144_v34 }
 0xa67   : > { %3320 = vadd.xlane.f32.xlu0 %v3319_v28  ;;  %v3300_v47 = vpop.xlane.xlu2 %3299 }
 0xa68   : > { %v3147_v4 = vpop.f32.mrf.mxu3 }
 0xa69   : > { %v5275_v11 = vpop.eup %5274 }
 0xa6a   : > { %3543 = vadd.xlane.f32.xlu1 %v3542_v62  ;;  %v2946_v44 = vmul.f32 %v5275_v11, %v2922_v16  ;;  %v6958_v38 = vpop.f32.mrf.mxu1 }
 0xa6c   : > { %v6956_v58 = vadd.f32 %v3168_v25, %v2946_v44 }
 0xa6f   : > { %v3303_v37 = vpop.xlane.xlu0 %3302 }
 0xa70   : > { %v3526_v59 = vpop.xlane.xlu1 %3525  ;;  %v3149_v15 = vpop.f32.mrf.mxu3 }
 0xa72   : > { %v6960_v23 = vpop.f32.mrf.mxu1 }
 0xa77   : > { %v3529_v16 = vpop.xlane.xlu2 %3528  ;;  %v2859_v10 = vpop.xlane.xlu0 %2858 }
 0xa78   : > { %v3090_v43 = vpop.xlane.xlu1 %3089 }
 0xa79   : > { %5276 = vrcp.f32 %v3090_v43  ;;  %v6964_v33 = vpop.f32.mrf.mxu3 }
 0xa7a   : > { %5278 = vrcp.f32 %v6938_v50  ;;  %v3363_v60 = vpop.f32.mrf.mxu1 }
 0xa7b   : > { %5280 = vrcp.f32 %v6927_v61  ;;  %v6976_v61 = vld [vmem:[%s7447_s5 + $0x8] sm:$0x3f] }
 0xa7c   : > { %5282 = vrcp.f32 %v3300_v47 }
 0xa7d   : > { %5284 = vrcp.f32 %v3081_v32 }
 0xa7e   : > { %5286 = vrcp.f32 %v3526_v59 }
 0xa7f   : > { %v5277_v13 = vpop.eup %5276  ;;  %5288 = vrcp.f32 %v6912_v19  ;;  %v6979_v19 = vperm.slane %v6976_v61, 0 }
 0xa80   : > { %v3169_v57 = vmul.f32 %v5277_v13, %v3147_v4  ;;  %v5279_v2 = vpop.eup %5278  ;;  %5290 = vrcp.f32 %v3303_v37 }
 0xa81   : > { %v6968_v6 = vpop.f32.mrf.mxu3  ;;  %v5281_v8 = vpop.eup %5280  ;;  %v2943_v51 = vmul.f32 %v5279_v2, %v6908_v63  ;;  %5292 = vrcp.f32 %v2859_v10 }
 0xa82   : > { %v6962_v14 = vadd.f32 %v3169_v57, %v2947_v41  ;;  %v5283_v20 = vpop.eup %5282  ;;  %v3165_v50 = vmul.f32 %v5281_v8, %v6922_v45  ;;  %v3365_v45 = vpop.f32.mrf.mxu1 }
 0xa83   : > { %v3391_v55 = vmul.f32 %v5283_v20, %v3363_v60  ;;  %v5285_v24 = vpop.eup %5284 }
 0xa84   : > { %v3173_v32 = vadd.f32 %v3165_v50, %v2943_v51  ;;  %v5287_v42 = vpop.eup %5286  ;;  %v3166_v39 = vmul.f32 %v5285_v24, %v6933_v35 }
 0xa85   : > { %v5289_v21 = vpop.eup %5288 }
 0xa86   : > { %v3399_v63 = vadd.f32 %v3391_v55, %v3173_v32  ;;  %v5291_v40 = vpop.eup %5290  ;;  %v2944_v27 = vmul.f32 %v5289_v21, %v6917_v0 }
 0xa87   : > { %v5293_v36 = vpop.eup %5292  ;;  %v3392_v29 = vmul.f32 %v5291_v40, %v3365_v45 }
 0xa88   : > { %v3174_v3 = vadd.f32 %v3166_v39, %v2944_v27  ;;  %v2948_v11 = vmul.f32 %v5293_v36, %v2927_v22 }
 0xa8a   : > { %v3400_v44 = vadd.f32 %v3392_v29, %v3174_v3 }
 0xa8e   : > { %v3309_v48 = vpop.xlane.xlu2 %3308 }
 0xa96   : > { %v3093_v41 = vpop.xlane.xlu2 %3092  ;;  %v3585_v9 = vpop.f32.mrf.mxu3 }
 0xa97   : > { %5294 = vrcp.f32 %v3093_v41  ;;  %v3613_v30 = vmul.f32 %v5287_v42, %v3585_v9 }
 0xa98   : > { %5296 = vrcp.f32 %v3529_v16 }
 0xa99   : > { %v3621_v52 = vadd.f32 %v3613_v30, %v3399_v63 }
 0xa9b   : > { %v3630_v5 = vadd.f32 %v6979_v19, %v3621_v52 }
 0xa9d   : > { %v5295_v31 = vpop.eup %5294  ;;  %v6985_v28 = vadd.f32 %v3630_v5, %v6441_v7 }
 0xa9e   : > { %v5297_v18 = vpop.eup %5296  ;;  %v3587_v34 = vpop.f32.mrf.mxu3  ;;  %v3170_v62 = vmul.f32 %v5295_v31, %v3149_v15 }
 0xa9f   : > { %v3614_v25 = vmul.f32 %v5297_v18, %v3587_v34  ;;  %v3646_v35 = vsel %vm562_vm0, %v6985_v28, 0.0  ;;  %v3532_v15 = vpop.xlane.xlu0 %3531 }
 0xaa0   : > { %3647 = vadd.xlane.f32.xlu0 %v3646_v35  ;;  %v6989_v4 = vadd.f32 %v3170_v62, %v2948_v11 }
 0xaa1   : > { %v3622_v0 = vadd.f32 %v3614_v25, %v3400_v44 }
 0xaa3   : > { %v3631_v59 = vadd.f32 %v6979_v19, %v3622_v0 }
 0xaa5   : > { %v6993_v43 = vadd.f32 %v3631_v59, %v6444_v53 }
 0xaa7   : > { %v3649_v7 = vsel %vm562_vm0, %v6993_v43, 0.0 }
 0xaa8   : > { %3650 = vadd.xlane.f32.xlu1 %v3649_v7 }
 0xab5   : > { %v3306_v22 = vpop.xlane.xlu1 %3305 }
 0xab6   : > { %5298 = vrcp.f32 %v3306_v22 }
 0xab7   : > { %5300 = vrcp.f32 %v3532_v15 }
 0xab8   : > { %5302 = vrcp.f32 %v3309_v48 }
 0xaba   : > { %v3538_v2 = vpop.xlane.xlu2 %3537 }
 0xabc   : > { %v5299_v13 = vpop.eup %5298 }
 0xabd   : > { %v3535_v47 = vpop.xlane.xlu1 %3534  ;;  %v5301_v60 = vpop.eup %5300 }
 0xabe   : > { %5304 = vrcp.f32 %v3535_v47  ;;  %v5303_v50 = vpop.eup %5302 }
 0xac0   : > { %v3368_v57 = vpop.f32.mrf.mxu1 }
 0xac1   : > { %v3393_v16 = vmul.f32 %v5299_v13, %v3368_v57 }
 0xac2   : > { %v3312_v37 = vpop.xlane.xlu0 %3311  ;;  %v2865_v45 = vpop.xlane.xlu2 %2864 }
 0xac3   : > { %v3401_v8 = vadd.f32 %v3393_v16, %v6948_v49  ;;  %v3590_v53 = vpop.f32.mrf.mxu3  ;;  %5306 = vrcp.f32 %v3312_v37 }
 0xac4   : > { %v3615_v51 = vmul.f32 %v5301_v60, %v3590_v53  ;;  %v5305_v48 = vpop.eup %5304  ;;  %5308 = vrcp.f32 %v3538_v2 }
 0xac5   : > { %v3315_v20 = vpop.xlane.xlu1 %3314 }
 0xac6   : > { %v3623_v10 = vadd.f32 %v3615_v51, %v3401_v8  ;;  %5310 = vrcp.f32 %v3315_v20 }
 0xac8   : > { %v3632_v55 = vadd.f32 %v6979_v19, %v3623_v10  ;;  %v3370_v24 = vpop.f32.mrf.mxu1 }
 0xac9   : > { %v3394_v32 = vmul.f32 %v5303_v50, %v3370_v24  ;;  %v5307_v52 = vpop.eup %5306 }
 0xaca   : > { %v3541_v42 = vpop.xlane.xlu0 %3540  ;;  %v7000_v41 = vadd.f32 %v3632_v55, %v6459_v56  ;;  %v3318_v62 = vpop.xlane.xlu2 %3317 }
 0xacb   : > { %v3402_v9 = vadd.f32 %v3394_v32, %v6956_v58  ;;  %v3592_v63 = vpop.f32.mrf.mxu3  ;;  %v5309_v58 = vpop.eup %5308  ;;  %5312 = vrcp.f32 %v3541_v42 }
 0xacc   : > { %v3616_v49 = vmul.f32 %v5305_v48, %v3592_v63  ;;  %v3652_v30 = vsel %vm562_vm0, %v7000_v41, 0.0  ;;  %v5311_v44 = vpop.eup %5310 }
 0xacd   : > { %3653 = vadd.xlane.f32.xlu2 %v3652_v30  ;;  %v2862_v21 = vpop.xlane.xlu1 %2861 }
 0xace   : > { %v3624_v39 = vadd.f32 %v3616_v49, %v3402_v9 }
 0xad0   : > { %v3633_v40 = vadd.f32 %v6979_v19, %v3624_v39  ;;  %v3373_v36 = vpop.f32.mrf.mxu1 }
 0xad1   : > { %v3395_v27 = vmul.f32 %v5307_v52, %v3373_v36  ;;  %v5313_v0 = vpop.eup %5312 }
 0xad2   : > { %v7007_v56 = vadd.f32 %v3633_v40, %v6462_v54  ;;  %v3096_v5 = vpop.xlane.xlu0 %3095  ;;  %v3547_v48 = vpop.xlane.xlu2 %3546 }
 0xad3   : > { %v3403_v29 = vadd.f32 %v3395_v27, %v6962_v14  ;;  %v3595_v31 = vpop.f32.mrf.mxu3  ;;  %5314 = vrcp.f32 %v3096_v5 }
 0xad4   : > { %v3617_v3 = vmul.f32 %v5309_v58, %v3595_v31  ;;  %v3655_v18 = vsel %vm562_vm0, %v7007_v56, 0.0  ;;  %5316 = vrcp.f32 %v2862_v21 }
 0xad5   : > { %3656 = vadd.xlane.f32.xlu0 %v3655_v18  ;;  %v3099_v34 = vpop.xlane.xlu1 %3098  ;;  %5318 = vrcp.f32 %v3318_v62 }
 0xad6   : > { %v3625_v11 = vadd.f32 %v3617_v3, %v3403_v29 }
 0xad8   : > { %v3634_v54 = vadd.f32 %v6979_v19, %v3625_v11  ;;  %v3375_v25 = vpop.f32.mrf.mxu1 }
 0xad9   : > { %v3396_v35 = vmul.f32 %v5311_v44, %v3375_v25  ;;  %v5315_v22 = vpop.eup %5314 }
 0xada   : > { %v7014_v14 = vadd.f32 %v3634_v54, %v6473_v1  ;;  %v5317_v57 = vpop.eup %5316  ;;  %v3171_v37 = vmul.f32 %v5315_v22, %v6964_v33 }
 0xadb   : > { %v3404_v59 = vadd.f32 %v3396_v35, %v6989_v4  ;;  %v3597_v7 = vpop.f32.mrf.mxu3  ;;  %v5319_v60 = vpop.eup %5318  ;;  %v2949_v8 = vmul.f32 %v5317_v57, %v6958_v38 }
 0xadc   : > { %v3618_v15 = vmul.f32 %v5313_v0, %v3597_v7  ;;  %v3658_v47 = vsel %vm562_vm0, %v7014_v14, 0.0 }
 0xadd   : > { %3659 = vadd.xlane.f32.xlu1 %v3658_v47  ;;  %v3544_v13 = vpop.xlane.xlu1 %3543  ;;  %v3179_v51 = vadd.f32 %v3171_v37, %v2949_v8 }
 0xade   : > { %v3626_v16 = vadd.f32 %v3618_v15, %v3404_v59  ;;  %5320 = vrcp.f32 %v3544_v13 }
 0xadf   : > { %5322 = vrcp.f32 %v3099_v34 }
 0xae0   : > { %v3635_v1 = vadd.f32 %v6979_v19, %v3626_v16  ;;  %v3378_v2 = vpop.f32.mrf.mxu1  ;;  %5324 = vrcp.f32 %v2865_v45 }
 0xae1   : > { %v3397_v4 = vmul.f32 %v5319_v60, %v3378_v2 }
 0xae2   : > { %v7023_v53 = vadd.f32 %v3635_v1, %v6476_v26  ;;  %v3321_v26 = vpop.xlane.xlu0 %3320 }
 0xae3   : > { %v3600_v20 = vpop.f32.mrf.mxu3  ;;  %v3405_v55 = vadd.f32 %v3397_v4, %v3179_v51  ;;  %5326 = vrcp.f32 %v3321_v26 }
 0xae4   : > { %v5321_v10 = vpop.eup %5320  ;;  %v3661_v50 = vsel %vm562_vm0, %v7023_v53, 0.0  ;;  %5328 = vrcp.f32 %v3547_v48  ;;  %v4850_v48 = vld [vmem:[%s7448_s6 + $0x68] sm:$0xf0] }
 0xae5   : > { %v3619_v24 = vmul.f32 %v5321_v10, %v3600_v20  ;;  %3662 = vadd.xlane.f32.xlu2 %v3661_v50  ;;  %v5323_v9 = vpop.eup %5322  ;;  %v5001_v10 = vld [vmem:[%s7448_s6 + $0x74] sm:$0xf0]  ;;  %v5000_v50 = vld [vmem:[%s7448_s6 + $0x74] sm:$0xf] }
 0xae6   : > { %v5325_v63 = vpop.eup %5324  ;;  %v3172_v30 = vmul.f32 %v5323_v9, %v6968_v6 }
 0xae7   : > { %v3627_v33 = vadd.f32 %v3619_v24, %v3405_v55  ;;  %v2950_v39 = vmul.f32 %v5325_v63, %v6960_v23  ;;  %v4858_v24 = vld [vmem:[%s7448_s6 + $0x78] sm:$0xf0]  ;;  %v4840_v63 = vld [vmem:[%s7448_s6 + $0x50] sm:$0xf] }
 0xae8   : > { %v3380_v49 = vpop.f32.mrf.mxu1 }
 0xae9   : > { %v3636_v32 = vadd.f32 %v6979_v19, %v3627_v33  ;;  %v5327_v21 = vpop.eup %5326  ;;  %v3180_v40 = vadd.f32 %v3172_v30, %v2950_v39  ;;  %v4861_v33 = vor.u32 %v5000_v50, %v4858_v24  ;;  %v4996_v30 = vld [vmem:[%s7448_s6 + $0x54] sm:$0xf] }
 0xaea   : > { %v5329_v36 = vpop.eup %5328 }
 0xaeb   : > { %v7029_v42 = vadd.f32 %v3636_v32, %v6537_v17  ;;  %v3398_v17 = vmul.f32 %v5327_v21, %v3380_v49  ;;  %v3602_v52 = vpop.f32.mrf.mxu3  ;;  %3934 = vmatpush.bf16.msrb.mxu1 %v4861_v33  ;;  %v4848_v32 = vld [vmem:[%s7448_s6 + $0x60] sm:$0xf]  ;;  %v4997_v49 = vld [vmem:[%s7448_s6 + $0x54] sm:$0xf0] }
 0xaec   : > { %v3620_v58 = vmul.f32 %v5329_v36, %v3602_v52  ;;  %v4841_v39 = vor.u32 %v4997_v49, %v4840_v63 }
 0xaed   : > { %v3664_v38 = vsel %vm562_vm0, %v7029_v42, 0.0  ;;  %v3406_v27 = vadd.f32 %v3398_v17, %v3180_v40  ;;  %v4842_v17 = vld [vmem:[%s7448_s6 + $0x58] sm:$0xf0] }
 0xaee   : > { %3665 = vadd.xlane.f32.xlu2 %v3664_v38  ;;  %v4998_v38 = vld [vmem:[%s7448_s6 + $0x64] sm:$0xf]  ;;  %v4845_v40 = vor.u32 %v4996_v30, %v4842_v17 }
 0xaef   : > { %v3628_v5 = vadd.f32 %v3620_v58, %v3406_v27  ;;  %v4853_v9 = vor.u32 %v4998_v38, %v4850_v48  ;;  %v4832_v27 = vld [vmem:[%s7448_s6 + $0x40] sm:$0xf]  ;;  %v4995_v58 = vld [vmem:[%s7448_s6 + $0x44] sm:$0xf0] }
 0xaf1   : > { %v3637_v6 = vadd.f32 %v6979_v19, %v3628_v5  ;;  %3935 = vmatpush.bf16.msrb.mxu1 %v4853_v9  ;;  %v4834_v5 = vld [vmem:[%s7448_s6 + $0x48] sm:$0xf0] }
 0xaf3   : > { %v7048_v62 = vadd.f32 %v3637_v6, %v6540_v46 }
 0xaf5   : > { %v3667_v44 = vsel %vm562_vm0, %v7048_v62, 0.0  ;;  %3936 = vmatpush.bf16.msrb.mxu1 %v4845_v40 }
 0xb13   : > { %v3648_v29 = vpop.xlane.xlu0 %3647 }
 0xb14   : > { %v3670_v45 = vmul.f32 %v3648_v29, %v6073_v12  ;;  %v4833_v29 = vor.u32 %v4995_v58, %v4832_v27 }
 0xb16   : > { %v7037_v31 = vsub.f32 %v6985_v28, %v3670_v45  ;;  %v4994_v45 = vld [vmem:[%s7448_s6 + $0x44] sm:$0xf] }
 0xb18   : > { %v3686_v3 = vmul.f32 %v7037_v31, %v7037_v31 }
 0xb1a   : > { %v3694_v23 = vsel %vm562_vm0, %v3686_v3, 0.0  ;;  %v4837_v3 = vor.u32 %v4994_v45, %v4834_v5 }
 0xb1b   : > { %3695 = vadd.xlane.f32.xlu0 %v3694_v23  ;;  %v3651_v18 = vpop.xlane.xlu1 %3650 }
 0xb1c   : > { %v3671_v34 = vmul.f32 %v3651_v18, %v6073_v12  ;;  %3937 = vmatpush.bf16.msrb.mxu1 %v4837_v3 }
 0xb1e   : > { %v7045_v11 = vsub.f32 %v6993_v43, %v3671_v34 }
 0xb20   : > { %v3687_v28 = vmul.f32 %v7045_v11, %v7045_v11 }
 0xb22   : > { %v3697_v19 = vsel %vm562_vm0, %v3687_v28, 0.0 }
 0xb23   : > { %3668 = vadd.xlane.f32.xlu0 %v3667_v44  ;;  %3698 = vadd.xlane.f32.xlu1 %v3697_v19 }
 0xb40   : > { %v3654_v54 = vpop.xlane.xlu2 %3653 }
 0xb41   : > { %v3672_v25 = vmul.f32 %v3654_v54, %v6073_v12 }
 0xb43   : > { %v7057_v35 = vsub.f32 %v7000_v41, %v3672_v25 }
 0xb45   : > { %v3688_v46 = vmul.f32 %v7057_v35, %v7057_v35 }
 0xb47   : > { %v3700_v43 = vsel %vm562_vm0, %v3688_v46, 0.0 }
 0xb48   : > { %v3657_v0 = vpop.xlane.xlu0 %3656  ;;  %3701 = vadd.xlane.f32.xlu1 %v3700_v43 }
 0xb49   : > { %v3673_v59 = vmul.f32 %v3657_v0, %v6073_v12 }
 0xb4b   : > { %v7064_v7 = vsub.f32 %v7007_v56, %v3673_v59 }
 0xb4d   : > { %v3689_v22 = vmul.f32 %v7064_v7, %v7064_v7 }
 0xb4f   : > { %v3703_v15 = vsel %vm562_vm0, %v3689_v22, 0.0 }
 0xb50   : > { %3704 = vadd.xlane.f32.xlu2 %v3703_v15  ;;  %v3660_v41 = vpop.xlane.xlu1 %3659 }
 0xb51   : > { %v3674_v47 = vmul.f32 %v3660_v41, %v6073_v12 }
 0xb53   : > { %v7071_v13 = vsub.f32 %v7014_v14, %v3674_v47 }
 0xb55   : > { %v3690_v57 = vmul.f32 %v7071_v13, %v7071_v13 }
 0xb57   : > { %v3706_v16 = vsel %vm562_vm0, %v3690_v57, 0.0 }
 0xb58   : > { %v3663_v37 = vpop.xlane.xlu2 %3662  ;;  %3707 = vadd.xlane.f32.xlu0 %v3706_v16 }
 0xb59   : > { %v3675_v56 = vmul.f32 %v3663_v37, %v6073_v12  ;;  %v7148_v37 = vperm.slane %v6976_v61, 1 }
 0xb5b   : > { %v7078_v60 = vsub.f32 %v7023_v53, %v3675_v56  ;;  %v4856_v53 = vld [vmem:[%s7448_s6 + $0x70] sm:$0xf] }
 0xb5c   : > { %v4857_v55 = vor.u32 %v5001_v10, %v4856_v53 }
 0xb5d   : > { %v3691_v1 = vmul.f32 %v7078_v60, %v7078_v60 }
 0xb5e   : > { %3905 = vmatpush.bf16.msrb.mxu0 %v4857_v55 }
 0xb5f   : > { %v3709_v2 = vsel %vm562_vm0, %v3691_v1, 0.0 }
 0xb60   : > { %3710 = vadd.xlane.f32.xlu1 %v3709_v2 }
 0xb61   : > { %v3666_v14 = vpop.xlane.xlu2 %3665 }
 0xb62   : > { %v3676_v8 = vmul.f32 %v3666_v14, %v6073_v12  ;;  %v7152_v14 = vperm.slane %v6976_v61, 2 }
 0xb64   : > { %v7085_v4 = vsub.f32 %v7029_v42, %v3676_v8  ;;  %v4999_v42 = vld [vmem:[%s7448_s6 + $0x64] sm:$0xf0] }
 0xb65   : > { %v4849_v26 = vor.u32 %v4999_v42, %v4848_v32 }
 0xb66   : > { %v3692_v51 = vmul.f32 %v7085_v4, %v7085_v4 }
 0xb67   : > { %3906 = vmatpush.bf16.msrb.mxu0 %v4849_v26 }
 0xb68   : > { %v3712_v20 = vsel %vm562_vm0, %v3692_v51, 0.0 }
 0xb69   : > { %3713 = vadd.xlane.f32.xlu2 %v3712_v20 }
 0xb6b   : > { %3907 = vmatpush.bf16.msrb.mxu0 %v4841_v39 }
 0xb6f   : > { %3908 = vmatpush.bf16.msrb.mxu0 %v4833_v29 }
 0xb8e   : > { %v3696_v21 = vpop.xlane.xlu0 %3695 }
 0xb8f   : > { %v3718_v52 = vmul.f32 %v3696_v21, %v6073_v12 }
 0xb91   : > { %v3726_v36 = vadd.f32 1e-05, %v3718_v52 }
 0xb93   : > { %5330 = vrsqrt.f32 %v3726_v36  ;;  %vm3740_vm9 = vweird.f32 %v3726_v36 }
 0xb96   : > { %v3669_v6 = vpop.xlane.xlu0 %3668  ;;  %v3699_v23 = vpop.xlane.xlu1 %3698 }
 0xb97   : > { %v3677_v18 = vmul.f32 %v3669_v6, %v6073_v12  ;;  %v3719_v34 = vmul.f32 %v3699_v23, %v6073_v12 }
 0xb99   : > { %v5331_v28 = vpop.eup %5330  ;;  %v7142_v44 = vsub.f32 %v7048_v62, %v3677_v18  ;;  %v3727_v19 = vadd.f32 1e-05, %v3719_v34 }
 0xb9a   : > { %v3735_v54 = vmul.f32 %v5331_v28, %v3726_v36  ;;  %vm3741_vm1 = vweird.f32 %v5331_v28 }
 0xb9b   : > { %5332 = vrsqrt.f32 %v3727_v19  ;;  %v3693_v25 = vmul.f32 %v7142_v44, %v7142_v44  ;;  %vm3742_vm10 = vmor %vm3740_vm9, %vm3741_vm1  ;;  %vm3750_vm12 = vweird.f32 %v3727_v19 }
 0xb9c   : > { %v3736_v46 = vmul.f32 %v5331_v28, %v3735_v54 }
 0xb9d   : > { %v3715_v43 = vsel %vm562_vm0, %v3693_v25, 0.0 }
 0xb9e   : > { %v3737_v0 = vmul.f32 0.5, %v3736_v46  ;;  %3716 = vadd.xlane.f32.xlu0 %v3715_v43 }
 0xba0   : > { %v3738_v59 = vsub.f32 1.5, %v3737_v0 }
 0xba1   : > { %v5333_v22 = vpop.eup %5332 }
 0xba2   : > { %v3739_v15 = vmul.f32 %v5331_v28, %v3738_v59  ;;  %v3745_v41 = vmul.f32 %v5333_v22, %v3727_v19  ;;  %vm3751_vm11 = vweird.f32 %v5333_v22 }
 0xba3   : > { %vm3752_vm13 = vmor %vm3750_vm12, %vm3751_vm11 }
 0xba4   : > { %v3746_v47 = vmul.f32 %v5333_v22, %v3745_v41  ;;  %v3743_v62 = vsel %vm3742_vm10, %v5331_v28, %v3739_v15 }
 0xba5   : > { %v3814_v56 = vmul.f32 %v3743_v62, %v7037_v31 }
 0xba6   : > { %v3747_v57 = vmul.f32 0.5, %v3746_v47 }
 0xba7   : > { %v3823_v8 = vmul.f32 %v7148_v37, %v3814_v56 }
 0xba8   : > { %v3748_v16 = vsub.f32 1.5, %v3747_v57 }
 0xba9   : > { %v7158_v53 = vadd.f32 %v7152_v14, %v3823_v8 }
 0xbaa   : > { %v3749_v1 = vmul.f32 %v5333_v22, %v3748_v16 }
 0xbac   : > { %v3753_v2 = vsel %vm3752_vm13, %v5333_v22, %v3749_v1 }
 0xbad   : > { %v3815_v51 = vmul.f32 %v3753_v2, %v7045_v11 }
 0xbaf   : > { %v3824_v20 = vmul.f32 %v7148_v37, %v3815_v51 }
 0xbb1   : > { %v7161_v10 = vadd.f32 %v7152_v14, %v3824_v20 }
 0xbb3   : > { %v3840_v31 = vpack.c.bf16 %v7161_v10, %v7158_v53 }
 0xbb5   : > { %4862 = vmatmul.msk.bf16.vlgmr.msrb.gmra.mxu0 %vm562_vm0, %v3840_v31  ;;  %4866 = vmatmul.msk.bf16.vlgmr.msrb.gmra.mxu1 %vm562_vm0, %v3840_v31 }
 0xbbb   : > { %v3702_v50 = vpop.xlane.xlu1 %3701 }
 0xbbc   : > { %v3720_v55 = vmul.f32 %v3702_v50, %v6073_v12 }
 0xbbe   : > { %v3728_v24 = vadd.f32 1e-05, %v3720_v55  ;;  %v5009_v55 = vld [vmem:[%s7450_s8 + $0xb8] sm:$0xff] }
 0xbbf   : > { %4080 = vmatpush.bf16.msrb.mxu2 %v5009_v55 }
 0xbc0   : > { %5334 = vrsqrt.f32 %v3728_v24  ;;  %vm3760_vm15 = vweird.f32 %v3728_v24 }
 0xbc3   : > { %v3705_v11 = vpop.xlane.xlu2 %3704 }
 0xbc4   : > { %v3721_v33 = vmul.f32 %v3705_v11, %v6073_v12  ;;  %v5008_v11 = vld [vmem:[%s7450_s8 + $0xb0] sm:$0xff] }
 0xbc5   : > { %4081 = vmatpush.bf16.msrb.mxu2 %v5008_v11 }
 0xbc6   : > { %v5335_v32 = vpop.eup %5334  ;;  %v3729_v42 = vadd.f32 1e-05, %v3721_v33  ;;  %v5016_v33 = vld [vmem:[%s7450_s8 + $0xf0] sm:$0xff] }
 0xbc7   : > { %v3755_v38 = vmul.f32 %v5335_v32, %v3728_v24  ;;  %vm3761_vm14 = vweird.f32 %v5335_v32  ;;  %v5017_v24 = vld [vmem:[%s7450_s8 + $0xf8] sm:$0xff] }
 0xbc8   : > { %5336 = vrsqrt.f32 %v3729_v42  ;;  %vm3762_vm2 = vmor %vm3760_vm15, %vm3761_vm14  ;;  %vm3770_vm4 = vweird.f32 %v3729_v42  ;;  %4109 = vmatpush.bf16.msrb.mxu3 %v5017_v24 }
 0xbc9   : > { %v3756_v26 = vmul.f32 %v5335_v32, %v3755_v38 }
 0xbcb   : > { %v3757_v48 = vmul.f32 0.5, %v3756_v26  ;;  %v3708_v9 = vpop.xlane.xlu0 %3707  ;;  %v5006_v26 = vld [vmem:[%s7450_s8 + $0xa0] sm:$0xff] }
 0xbcc   : > { %v3722_v63 = vmul.f32 %v3708_v9, %v6073_v12  ;;  %4110 = vmatpush.bf16.msrb.mxu3 %v5016_v33 }
 0xbcd   : > { %v3758_v49 = vsub.f32 1.5, %v3757_v48  ;;  %v5014_v48 = vld [vmem:[%s7450_s8 + $0xe0] sm:$0xff] }
 0xbce   : > { %v5337_v30 = vpop.eup %5336  ;;  %v3730_v21 = vadd.f32 1e-05, %v3722_v63 }
 0xbcf   : > { %v3759_v39 = vmul.f32 %v5335_v32, %v3758_v49  ;;  %v3765_v17 = vmul.f32 %v5337_v30, %v3729_v42  ;;  %vm3771_vm3 = vweird.f32 %v5337_v30  ;;  %v5015_v42 = vld [vmem:[%s7450_s8 + $0xe8] sm:$0xff] }
 0xbd0   : > { %5338 = vrsqrt.f32 %v3730_v21  ;;  %vm3772_vm5 = vmor %vm3770_vm4, %vm3771_vm3  ;;  %vm3780_vm7 = vweird.f32 %v3730_v21  ;;  %4111 = vmatpush.bf16.msrb.mxu3 %v5015_v42 }
 0xbd1   : > { %v3766_v52 = vmul.f32 %v5337_v30, %v3765_v17  ;;  %v3763_v40 = vsel %vm3762_vm2, %v5335_v32, %v3759_v39  ;;  %v5007_v32 = vld [vmem:[%s7450_s8 + $0xa8] sm:$0xff]  ;;  %v5013_v39 = vld [vmem:[%s7450_s8 + $0xd8] sm:$0xff] }
 0xbd2   : > { %v3816_v5 = vmul.f32 %v3763_v40, %v7057_v35  ;;  %4082 = vmatpush.bf16.msrb.mxu2 %v5007_v32  ;;  %v5004_v40 = vld [vmem:[%s7450_s8 + $0x90] sm:$0xff] }
 0xbd3   : > { %v3767_v36 = vmul.f32 0.5, %v3766_v52  ;;  %v3711_v27 = vpop.xlane.xlu1 %3710 }
 0xbd4   : > { %v3723_v58 = vmul.f32 %v3711_v27, %v6073_v12  ;;  %v3825_v19 = vmul.f32 %v7148_v37, %v3816_v5  ;;  %4112 = vmatpush.bf16.msrb.mxu3 %v5014_v48 }
 0xbd5   : > { %v3768_v29 = vsub.f32 1.5, %v3767_v36  ;;  %v5012_v36 = vld [vmem:[%s7450_s8 + $0xd0] sm:$0xff] }
 0xbd6   : > { %v5339_v45 = vpop.eup %5338  ;;  %v3731_v3 = vadd.f32 1e-05, %v3723_v58  ;;  %v7176_v0 = vadd.f32 %v7152_v14, %v3825_v19  ;;  %4083 = vmatpush.bf16.msrb.mxu2 %v5006_v26  ;;  %v5003_v58 = vld [vmem:[%s7450_s8 + $0x88] sm:$0xff] }
 0xbd7   : > { %v3769_v6 = vmul.f32 %v5337_v30, %v3768_v29  ;;  %v3775_v23 = vmul.f32 %v5339_v45, %v3730_v21  ;;  %vm3781_vm6 = vweird.f32 %v5339_v45  ;;  %v5005_v21 = vld [vmem:[%s7450_s8 + $0x98] sm:$0xff]  ;;  %v5011_v29 = vld [vmem:[%s7450_s8 + $0xc8] sm:$0xff] }
 0xbd8   : > { %5340 = vrsqrt.f32 %v3731_v3  ;;  %vm3782_vm8 = vmor %vm3780_vm7, %vm3781_vm6  ;;  %vm3790_vm9 = vweird.f32 %v3731_v3  ;;  %4113 = vmatpush.bf16.msrb.mxu3 %v5013_v39 }
 0xbd9   : > { %v3773_v18 = vsel %vm3772_vm5, %v5337_v30, %v3769_v6  ;;  %v3776_v34 = vmul.f32 %v5339_v45, %v3775_v23  ;;  %v5002_v6 = vld [vmem:[%s7450_s8 + $0x80] sm:$0xff] }
 0xbda   : > { %v3817_v28 = vmul.f32 %v3773_v18, %v7064_v7  ;;  %4084 = vmatpush.bf16.msrb.mxu2 %v5005_v21  ;;  %v5010_v23 = vld [vmem:[%s7450_s8 + $0xc0] sm:$0xff] }
 0xbdb   : > { %v3777_v54 = vmul.f32 0.5, %v3776_v34 }
 0xbdc   : > { %v3826_v25 = vmul.f32 %v7148_v37, %v3817_v28  ;;  %4114 = vmatpush.bf16.msrb.mxu3 %v5012_v36 }
 0xbdd   : > { %v3778_v46 = vsub.f32 1.5, %v3777_v54 }
 0xbde   : > { %v5341_v43 = vpop.eup %5340  ;;  %v7179_v35 = vadd.f32 %v7152_v14, %v3826_v25  ;;  %4085 = vmatpush.bf16.msrb.mxu2 %v5004_v40 }
 0xbdf   : > { %v3779_v59 = vmul.f32 %v5339_v45, %v3778_v46  ;;  %v3785_v22 = vmul.f32 %v5341_v43, %v3731_v3  ;;  %vm3791_vm1 = vweird.f32 %v5341_v43 }
 0xbe0   : > { %v3841_v15 = vpack.c.bf16 %v7179_v35, %v7176_v0  ;;  %vm3792_vm10 = vmor %vm3790_vm9, %vm3791_vm1  ;;  %4115 = vmatpush.bf16.msrb.mxu3 %v5011_v29 }
 0xbe1   : > { %v3786_v7 = vmul.f32 %v5341_v43, %v3785_v22  ;;  %v3783_v41 = vsel %vm3782_vm8, %v5339_v45, %v3779_v59 }
 0xbe2   : > { %4863 = vmatmul.msk.bf16.gmra.mxu0 %vm562_vm0, %v3841_v15  ;;  %4867 = vmatmul.msk.bf16.gmra.mxu1 %vm562_vm0, %v3841_v15  ;;  %v3818_v57 = vmul.f32 %v3783_v41, %v7071_v13  ;;  %v3714_v13 = vpop.xlane.xlu2 %3713 }
 0xbe3   : > { %v3787_v47 = vmul.f32 0.5, %v3786_v7  ;;  %4086 = vmatpush.bf16.msrb.mxu2 %v5003_v58 }
 0xbe4   : > { %v3827_v2 = vmul.f32 %v7148_v37, %v3818_v57  ;;  %4116 = vmatpush.bf16.msrb.mxu3 %v5010_v23 }
 0xbe5   : > { %v3788_v62 = vsub.f32 1.5, %v3787_v47 }
 0xbe6   : > { %v7190_v51 = vadd.f32 %v7152_v14, %v3827_v2 }
 0xbe7   : > { %v3789_v16 = vmul.f32 %v5341_v43, %v3788_v62  ;;  %4087 = vmatpush.bf16.msrb.mxu2 %v5002_v6 }
 0xbe9   : > { %v3793_v56 = vsel %vm3792_vm10, %v5341_v43, %v3789_v16 }
 0xbea   : > { %v3819_v1 = vmul.f32 %v3793_v56, %v7078_v60  ;;  %v3724_v60 = vmul.f32 %v3714_v13, %v6073_v12 }
 0xbec   : > { %v3828_v8 = vmul.f32 %v7148_v37, %v3819_v1  ;;  %v3732_v50 = vadd.f32 1e-05, %v3724_v60 }
 0xbee   : > { %v7193_v20 = vadd.f32 %v7152_v14, %v3828_v8  ;;  %5342 = vrsqrt.f32 %v3732_v50  ;;  %vm3800_vm12 = vweird.f32 %v3732_v50 }
 0xbf0   : > { %v3842_v31 = vpack.c.bf16 %v7193_v20, %v7190_v51 }
 0xbf2   : > { %4864 = vmatmul.msk.bf16.gmra.mxu0 %vm562_vm0, %v3842_v31  ;;  %4868 = vmatmul.msk.bf16.gmra.mxu1 %vm562_vm0, %v3842_v31 }
 0xbf4   : > { %v5343_v38 = vpop.eup %5342 }
 0xbf5   : > { %v3795_v9 = vmul.f32 %v5343_v38, %v3732_v50  ;;  %vm3801_vm11 = vweird.f32 %v5343_v38 }
 0xbf6   : > { %vm3802_vm13 = vmor %vm3800_vm12, %vm3801_vm11 }
 0xbf7   : > { %v3796_v63 = vmul.f32 %v5343_v38, %v3795_v9 }
 0xbf9   : > { %v3797_v52 = vmul.f32 0.5, %v3796_v63 }
 0xbfb   : > { %v3798_v27 = vsub.f32 1.5, %v3797_v52 }
 0xbfd   : > { %v3799_v5 = vmul.f32 %v5343_v38, %v3798_v27 }
 0xbff   : > { %v3803_v34 = vsel %vm3802_vm13, %v5343_v38, %v3799_v5 }
 0xc00   : > { %v3820_v54 = vmul.f32 %v3803_v34, %v7085_v4  ;;  %v4685_v4 = vld [vmem:[%s7449_s7 + $0x1] ss:$2 sm:$0x3] }
 0xc01   : > { %v3846_v62 = vperm.slane %v4685_v4, 1 }
 0xc02   : > { %v3829_v59 = vmul.f32 %v7148_v37, %v3820_v54 }
 0xc04   : > { %v7254_v15 = vadd.f32 %v7152_v14, %v3829_v59 }
 0xc11   : > { %v3717_v49 = vpop.xlane.xlu0 %3716 }
 0xc12   : > { %v3725_v30 = vmul.f32 %v3717_v49, %v6073_v12 }
 0xc14   : > { %v3733_v17 = vadd.f32 1e-05, %v3725_v30 }
 0xc16   : > { %5344 = vrsqrt.f32 %v3733_v17  ;;  %vm3810_vm15 = vweird.f32 %v3733_v17 }
 0xc1c   : > { %v5345_v45 = vpop.eup %5344 }
 0xc1d   : > { %v3805_v3 = vmul.f32 %v5345_v45, %v3733_v17  ;;  %vm3811_vm14 = vweird.f32 %v5345_v45 }
 0xc1e   : > { %vm3812_vm2 = vmor %vm3810_vm15, %vm3811_vm14 }
 0xc1f   : > { %v3806_v18 = vmul.f32 %v5345_v45, %v3805_v3 }
 0xc21   : > { %v3807_v28 = vmul.f32 0.5, %v3806_v18 }
 0xc23   : > { %v3808_v19 = vsub.f32 1.5, %v3807_v28 }
 0xc25   : > { %v3809_v25 = vmul.f32 %v5345_v45, %v3808_v19 }
 0xc27   : > { %v3813_v46 = vsel %vm3812_vm2, %v5345_v45, %v3809_v25 }
 0xc28   : > { %v3821_v43 = vmul.f32 %v3813_v46, %v7142_v44 }
 0xc2a   : > { %v3830_v22 = vmul.f32 %v7148_v37, %v3821_v43  ;;  %v3845_v37 = vperm.slane %v4685_v4, 0 }
 0xc2c   : > { %v7257_v7 = vadd.f32 %v7152_v14, %v3830_v22 }
 0xc2e   : > { %v3843_v41 = vpack.c.bf16 %v7257_v7, %v7254_v15 }
 0xc30   : > { %4865 = vmatmul.msk.bf16.gmra.mxu0 %vm562_vm0, %v3843_v41  ;;  %4869 = vmatmul.msk.bf16.gmra.mxu1 %vm562_vm0, %v3843_v41 }
 0xc32   : > { %v3910_v44 = vpop.f32.mrf.mxu0  ;;  %v3939_v47 = vpop.f32.mrf.mxu1 }
 0xc33   : > { %v3911_v57 = vadd.f32 %v3910_v44, %v3845_v37  ;;  %v3940_v16 = vadd.f32 %v3939_v47, %v3846_v62 }
 0xc35   : > { %v3959_v8 = vmax.f32 %v3911_v57, 0.0  ;;  %v3960_v31 = vmax.f32 %v3940_v16, 0.0 }
 0xc3a   : > { %v3912_v56 = vpop.f32.mrf.mxu0  ;;  %v3941_v14 = vpop.f32.mrf.mxu1 }
 0xc3b   : > { %v3913_v1 = vadd.f32 %v3912_v56, %v3845_v37  ;;  %v3942_v2 = vadd.f32 %v3941_v14, %v3846_v62  ;;  %v3983_v56 = vperm.slane %v6976_v61, 3 }
 0xc3d   : > { %v3961_v13 = vmax.f32 %v3913_v1, 0.0  ;;  %v3962_v60 = vmax.f32 %v3942_v2, 0.0 }
 0xc3f   : > { %v3975_v50 = vpack.c.bf16 %v3961_v13, %v3959_v8  ;;  %v3976_v55 = vpack.c.bf16 %v3962_v60, %v3960_v31 }
 0xc41   : > { %4088 = vmatmul.bf16.vlgmr.msrb.gmra.mxu2 %v3975_v50  ;;  %4117 = vmatmul.bf16.vlgmr.msrb.gmra.mxu3 %v3976_v55 }
 0xc5f   : > { %v3915_v24 = vpop.f32.mrf.mxu0  ;;  %v3944_v11 = vpop.f32.mrf.mxu1 }
 0xc60   : > { %v3916_v33 = vadd.f32 %v3915_v24, %v3845_v37  ;;  %v3945_v32 = vadd.f32 %v3944_v11, %v3846_v62 }
 0xc62   : > { %v3963_v9 = vmax.f32 %v3916_v33, 0.0  ;;  %v3964_v63 = vmax.f32 %v3945_v32, 0.0 }
 0xc67   : > { %v3917_v42 = vpop.f32.mrf.mxu0  ;;  %v3946_v38 = vpop.f32.mrf.mxu1 }
 0xc68   : > { %v3918_v26 = vadd.f32 %v3917_v42, %v3845_v37  ;;  %v3947_v48 = vadd.f32 %v3946_v38, %v3846_v62 }
 0xc6a   : > { %v3965_v49 = vmax.f32 %v3918_v26, 0.0  ;;  %v3966_v30 = vmax.f32 %v3947_v48, 0.0 }
 0xc6c   : > { %v3977_v21 = vpack.c.bf16 %v3965_v49, %v3963_v9  ;;  %v3978_v39 = vpack.c.bf16 %v3966_v30, %v3964_v63 }
 0xc6e   : > { %4093 = vmatmul.bf16.gmra.mxu2 %v3977_v21  ;;  %4122 = vmatmul.bf16.gmra.mxu3 %v3978_v39 }
 0xc6f   : > { %v3920_v17 = vpop.f32.mrf.mxu0  ;;  %v3949_v52 = vpop.f32.mrf.mxu1 }
 0xc70   : > { %v3921_v40 = vadd.f32 %v3920_v17, %v3845_v37  ;;  %v3950_v36 = vadd.f32 %v3949_v52, %v3846_v62 }
 0xc72   : > { %v3967_v5 = vmax.f32 %v3921_v40, 0.0  ;;  %v3968_v3 = vmax.f32 %v3950_v36, 0.0 }
 0xc77   : > { %v3922_v27 = vpop.f32.mrf.mxu0  ;;  %v3951_v58 = vpop.f32.mrf.mxu1 }
 0xc78   : > { %v3923_v29 = vadd.f32 %v3922_v27, %v3845_v37  ;;  %v3952_v45 = vadd.f32 %v3951_v58, %v3846_v62 }
 0xc7a   : > { %v3969_v6 = vmax.f32 %v3923_v29, 0.0  ;;  %v3970_v23 = vmax.f32 %v3952_v45, 0.0 }
 0xc7c   : > { %v3979_v18 = vpack.c.bf16 %v3969_v6, %v3967_v5  ;;  %v3980_v34 = vpack.c.bf16 %v3970_v23, %v3968_v3 }
 0xc7e   : > { %4098 = vmatmul.bf16.gmra.mxu2 %v3979_v18  ;;  %4127 = vmatmul.bf16.gmra.mxu3 %v3980_v34 }
 0xcad   : > { %v3925_v28 = vpop.f32.mrf.mxu0  ;;  %v3954_v19 = vpop.f32.mrf.mxu1 }
 0xcae   : > { %v3926_v54 = vadd.f32 %v3925_v28, %v3845_v37  ;;  %v3955_v25 = vadd.f32 %v3954_v19, %v3846_v62 }
 0xcb0   : > { %v3971_v41 = vmax.f32 %v3926_v54, 0.0  ;;  %v3972_v4 = vmax.f32 %v3955_v25, 0.0 }
 0xcb5   : > { %v3927_v46 = vpop.f32.mrf.mxu0  ;;  %v3956_v43 = vpop.f32.mrf.mxu1 }
 0xcb6   : > { %v3928_v59 = vadd.f32 %v3927_v46, %v3845_v37  ;;  %v3957_v22 = vadd.f32 %v3956_v43, %v3846_v62 }
 0xcb8   : > { %v3973_v44 = vmax.f32 %v3928_v59, 0.0  ;;  %v3974_v47 = vmax.f32 %v3957_v22, 0.0 }
 0xcba   : > { %v3981_v57 = vpack.c.bf16 %v3973_v44, %v3971_v41  ;;  %v3982_v16 = vpack.c.bf16 %v3974_v47, %v3972_v4  ;;  %v4345_v44 = vld [vmem:[%s7452_s10] sm:$0x7] }
 0xcbc   : > { %4103 = vmatmul.bf16.gmra.mxu2 %v3981_v57  ;;  %4132 = vmatmul.bf16.gmra.mxu3 %v3982_v16 }
 0xcc4   : > { %v4089_v14 = vpop.f32.mrf.mxu2  ;;  %v4118_v1 = vpop.f32.mrf.mxu3 }
 0xcc5   : > { %v4090_v2 = vadd.f32 %v4089_v14, %v3983_v56 }
 0xcc7   : > { %v4119_v8 = vadd.f32 %v4118_v1, %v4090_v2 }
 0xccc   : > { %v4091_v31 = vpop.f32.mrf.mxu2  ;;  %v4120_v60 = vpop.f32.mrf.mxu3 }
 0xccd   : > { %v4092_v13 = vadd.f32 %v4091_v31, %v3983_v56 }
 0xccf   : > { %v4121_v50 = vadd.f32 %v4120_v60, %v4092_v13 }
 0xcf1   : > { %v4094_v37 = vpop.f32.mrf.mxu2  ;;  %v4123_v62 = vpop.f32.mrf.mxu3 }
 0xcf2   : > { %v4095_v55 = vadd.f32 %v4094_v37, %v3983_v56 }
 0xcf4   : > { %v4124_v24 = vadd.f32 %v4123_v62, %v4095_v55 }
 0xcf6   : > { %v4140_v28 = vadd.f32 %v4124_v24, %v7176_v0 }
 0xcf8   : > { %v4152_v19 = vsel %vm562_vm0, %v4140_v28, 0.0 }
 0xcf9   : > { %v4096_v11 = vpop.f32.mrf.mxu2  ;;  %v4125_v33 = vpop.f32.mrf.mxu3 }
 0xcfa   : > { %v4097_v26 = vadd.f32 %v4096_v11, %v3983_v56 }
 0xcfc   : > { %v4126_v9 = vadd.f32 %v4125_v33, %v4097_v26 }
 0xcfe   : > { %v4141_v49 = vadd.f32 %v4126_v9, %v7179_v35 }
 0xd00   : > { %v4155_v30 = vsel %vm562_vm0, %v4141_v49, 0.0 }
 0xd01   : > { %v4099_v32 = vpop.f32.mrf.mxu2  ;;  %v4128_v38 = vpop.f32.mrf.mxu3 }
 0xd02   : > { %v4100_v42 = vadd.f32 %v4099_v32, %v3983_v56 }
 0xd04   : > { %v4129_v48 = vadd.f32 %v4128_v38, %v4100_v42 }
 0xd06   : > { %v4142_v61 = vadd.f32 %v4129_v48, %v7190_v51 }
 0xd08   : > { %v4158_v63 = vsel %vm562_vm0, %v4142_v61, 0.0 }
 0xd09   : > { %4159 = vadd.xlane.f32.xlu0 %v4158_v63  ;;  %v4101_v21 = vpop.f32.mrf.mxu2  ;;  %v4130_v39 = vpop.f32.mrf.mxu3 }
 0xd0a   : > { %v4102_v36 = vadd.f32 %v4101_v21, %v3983_v56 }
 0xd0c   : > { %v4131_v29 = vadd.f32 %v4130_v39, %v4102_v36 }
 0xd0e   : > { %v4143_v35 = vadd.f32 %v4131_v29, %v7193_v20  ;;  %v4139_v20 = vadd.f32 %v4121_v50, %v7161_v10 }
 0xd10   : > { %v4161_v34 = vsel %vm562_vm0, %v4143_v35, 0.0 }
 0xd11   : > { %4156 = vadd.xlane.f32.xlu0 %v4155_v30 }
 0xd3f   : > { %v4104_v17 = vpop.f32.mrf.mxu2  ;;  %v4133_v52 = vpop.f32.mrf.mxu3 }
 0xd40   : > { %v4105_v40 = vadd.f32 %v4104_v17, %v3983_v56 }
 0xd42   : > { %v4134_v27 = vadd.f32 %v4133_v52, %v4105_v40 }
 0xd44   : > { %v4144_v58 = vadd.f32 %v4134_v27, %v7254_v15  ;;  %v4138_v15 = vadd.f32 %v4119_v8, %v7158_v53 }
 0xd46   : > { %v4164_v51 = vsel %vm562_vm0, %v4144_v58, 0.0  ;;  %v4146_v54 = vsel %vm562_vm0, %v4138_v15, 0.0 }
 0xd47   : > { %v4106_v45 = vpop.f32.mrf.mxu2  ;;  %4165 = vadd.xlane.f32.xlu1 %v4164_v51  ;;  %v4135_v3 = vpop.f32.mrf.mxu3 }
 0xd48   : > { %v4107_v5 = vadd.f32 %v4106_v45, %v3983_v56 }
 0xd4a   : > { %v4136_v6 = vadd.f32 %v4135_v3, %v4107_v5 }
 0xd4c   : > { %v4145_v23 = vadd.f32 %v4136_v6, %v7257_v7  ;;  %v4149_v7 = vsel %vm562_vm0, %v4139_v20, 0.0 }
 0xd4e   : > { %v4167_v18 = vsel %vm562_vm0, %v4145_v23, 0.0 }
 0xd4f   : > { %4168 = vadd.xlane.f32.xlu2 %v4167_v18  ;;  %4162 = vadd.xlane.f32.xlu1 %v4161_v34 }
 0xd57   : > { %4153 = vadd.xlane.f32.xlu2 %v4152_v19  ;;  %4147 = vadd.xlane.f32.xlu1 %v4146_v54 }
 0xd5f   : > { %4150 = vadd.xlane.f32.xlu2 %v4149_v7 }
 0xd7c   : > { %v4160_v25 = vpop.xlane.xlu0 %4159 }
 0xd7d   : > { %v4174_v46 = vmul.f32 %v4160_v25, %v6073_v12 }
 0xd7f   : > { %v7284_v43 = vsub.f32 %v4142_v61, %v4174_v46 }
 0xd81   : > { %v4190_v53 = vmul.f32 %v7284_v43, %v7284_v43 }
 0xd83   : > { %v4206_v0 = vsel %vm562_vm0, %v4190_v53, 0.0 }
 0xd84   : > { %4207 = vadd.xlane.f32.xlu2 %v4206_v0  ;;  %v4157_v59 = vpop.xlane.xlu0 %4156 }
 0xd85   : > { %v4173_v22 = vmul.f32 %v4157_v59, %v6073_v12 }
 0xd87   : > { %v7290_v41 = vsub.f32 %v4141_v49, %v4173_v22 }
 0xd89   : > { %v4189_v10 = vmul.f32 %v7290_v41, %v7290_v41 }
 0xd8b   : > { %v4203_v4 = vsel %vm562_vm0, %v4189_v10, 0.0 }
 0xd8c   : > { %4204 = vadd.xlane.f32.xlu2 %v4203_v4 }
 0xda4   : > { %4348 = vperm.xlu2 %5037, %v4345_v44  }
 0xdba   : > { %v4166_v47 = vpop.xlane.xlu1 %4165 }
 0xdbb   : > { %v4176_v57 = vmul.f32 %v4166_v47, %v6073_v12 }
 0xdbd   : > { %v7299_v16 = vsub.f32 %v4144_v58, %v4176_v57 }
 0xdbf   : > { %v4192_v56 = vmul.f32 %v7299_v16, %v7299_v16 }
 0xdc1   : > { %v4212_v14 = vsel %vm562_vm0, %v4192_v56, 0.0 }
 0xdc2   : > { %v4169_v1 = vpop.xlane.xlu2 %4168  ;;  %v4163_v2 = vpop.xlane.xlu1 %4162  ;;  %4213 = vadd.xlane.f32.xlu0 %v4212_v14 }
 0xdc3   : > { %v4177_v8 = vmul.f32 %v4169_v1, %v6073_v12  ;;  %v4175_v31 = vmul.f32 %v4163_v2, %v6073_v12 }
 0xdc5   : > { %v7306_v13 = vsub.f32 %v4145_v23, %v4177_v8  ;;  %v7308_v60 = vsub.f32 %v4143_v35, %v4175_v31 }
 0xdc7   : > { %v4193_v50 = vmul.f32 %v7306_v13, %v7306_v13  ;;  %v4191_v37 = vmul.f32 %v7308_v60, %v7308_v60 }
 0xdc9   : > { %v4215_v62 = vsel %vm562_vm0, %v4193_v50, 0.0  ;;  %v4209_v55 = vsel %vm562_vm0, %v4191_v37, 0.0 }
 0xdca   : > { %v4154_v24 = vpop.xlane.xlu2 %4153  ;;  %4216 = vadd.xlane.f32.xlu1 %v4215_v62  ;;  %v4148_v11 = vpop.xlane.xlu1 %4147  ;;  %4210 = vadd.xlane.f32.xlu0 %v4209_v55 }
 0xdcb   : > { %v4172_v33 = vmul.f32 %v4154_v24, %v6073_v12  ;;  %v4170_v32 = vmul.f32 %v4148_v11, %v6073_v12 }
 0xdcd   : > { %v7318_v42 = vsub.f32 %v4140_v28, %v4172_v33  ;;  %v7320_v38 = vsub.f32 %v4138_v15, %v4170_v32 }
 0xdcf   : > { %v4188_v26 = vmul.f32 %v7318_v42, %v7318_v42  ;;  %v4186_v48 = vmul.f32 %v7320_v38, %v7320_v38 }
 0xdd1   : > { %v4200_v61 = vsel %vm562_vm0, %v4188_v26, 0.0  ;;  %v4194_v9 = vsel %vm562_vm0, %v4186_v48, 0.0 }
 0xdd2   : > { %v4151_v63 = vpop.xlane.xlu2 %4150  ;;  %4201 = vadd.xlane.f32.xlu1 %v4200_v61  ;;  %4195 = vadd.xlane.f32.xlu0 %v4194_v9 }
 0xdd3   : > { %v4171_v49 = vmul.f32 %v4151_v63, %v6073_v12 }
 0xdd5   : > { %v7329_v30 = vsub.f32 %v4139_v20, %v4171_v49 }
 0xdd7   : > { %v4187_v21 = vmul.f32 %v7329_v30, %v7329_v30 }
 0xdd9   : > { %v4197_v39 = vsel %vm562_vm0, %v4187_v21, 0.0 }
 0xdda   : > { %4198 = vadd.xlane.f32.xlu1 %v4197_v39 }
 0xdf7   : > { %v4208_v17 = vpop.xlane.xlu2 %4207 }
 0xdf8   : > { %v4222_v52 = vmul.f32 %v4208_v17, %v6073_v12 }
 0xdfa   : > { %v7335_v40 = vadd.f32 1e-05, %v4222_v52  ;;  %v5363_v52 = vld [vmem:[%s7447_s5 + $0x8] sm:$0x3f] }
 0xdfc   : > { %5346 = vrsqrt.f32 %v7335_v40  ;;  %vm4280_vm6 = vweird.f32 %v7335_v40 }
 0xdff   : > { %v4205_v36 = vpop.xlane.xlu2 %4204 }
 0xe00   : > { %v4221_v58 = vmul.f32 %v4205_v36, %v6073_v12 }
 0xe02   : > { %v7340_v45 = vadd.f32 1e-05, %v4221_v58  ;;  %v7342_v5 = vpop.eup %5346 }
 0xe03   : > { %v4275_v6 = vmul.f32 %v7342_v5, %v7335_v40  ;;  %vm4281_vm7 = vweird.f32 %v7342_v5  ;;  %v7384_v40 = vperm.slane %v5363_v52, 4 }
 0xe04   : > { %vm7376_vm9 = vmor %vm4280_vm6, %vm4281_vm7  ;;  %vm4270_vm2 = vweird.f32 %v7340_v45 }
 0xe05   : > { %v4276_v54 = vmul.f32 %v7342_v5, %v4275_v6 }
 0xe07   : > { %v4277_v0 = vmul.f32 0.5, %v4276_v54 }
 0xe09   : > { %v4278_v2 = vsub.f32 1.5, %v4277_v0 }
 0xe0b   : > { %v4279_v32 = vmul.f32 %v7342_v5, %v4278_v2 }
 0xe35   : > { %v4214_v27 = vpop.xlane.xlu0 %4213 }
 0xe36   : > { %v4224_v29 = vmul.f32 %v4214_v27, %v6073_v12  ;;  %v4283_v27 = vsel %vm7376_vm9, %v7342_v5, %v4279_v32  ;;  %v4331_v5 = vperm.slane %v5363_v52, 5 }
 0xe38   : > { %v4232_v51 = vadd.f32 1e-05, %v4224_v29 }
 0xe3a   : > { %5348 = vrsqrt.f32 %v4232_v51  ;;  %vm4300_vm4 = vweird.f32 %v4232_v51 }
 0xe3b   : > { %5350 = vrsqrt.f32 %v7340_v45 }
 0xe3d   : > { %v4217_v3 = vpop.xlane.xlu1 %4216  ;;  %v4211_v35 = vpop.xlane.xlu0 %4210 }
 0xe3e   : > { %v4225_v23 = vmul.f32 %v4217_v3, %v6073_v12  ;;  %v4223_v18 = vmul.f32 %v4211_v35, %v6073_v12 }
 0xe40   : > { %v5349_v34 = vpop.eup %5348  ;;  %v4233_v15 = vadd.f32 1e-05, %v4225_v23  ;;  %v7349_v28 = vadd.f32 1e-05, %v4223_v18 }
 0xe41   : > { %v4295_v19 = vmul.f32 %v5349_v34, %v4232_v51  ;;  %v7353_v7 = vpop.eup %5350  ;;  %vm4301_vm3 = vweird.f32 %v5349_v34 }
 0xe42   : > { %5352 = vrsqrt.f32 %v4233_v15  ;;  %v4265_v10 = vmul.f32 %v7353_v7, %v7340_v45  ;;  %vm4302_vm5 = vmor %vm4300_vm4, %vm4301_vm3  ;;  %vm4310_vm10 = vweird.f32 %v4233_v15  ;;  %vm4290_vm12 = vweird.f32 %v7349_v28 }
 0xe43   : > { %v4296_v20 = vmul.f32 %v5349_v34, %v4295_v19  ;;  %5354 = vrsqrt.f32 %v7349_v28  ;;  %vm4271_vm14 = vweird.f32 %v7353_v7 }
 0xe44   : > { %v4266_v31 = vmul.f32 %v7353_v7, %v4265_v10  ;;  %vm7404_vm3 = vmor %vm4270_vm2, %vm4271_vm14 }
 0xe45   : > { %v4297_v25 = vmul.f32 0.5, %v4296_v20  ;;  %v4202_v46 = vpop.xlane.xlu1 %4201  ;;  %v4196_v53 = vpop.xlane.xlu0 %4195 }
 0xe46   : > { %v4220_v59 = vmul.f32 %v4202_v46, %v6073_v12  ;;  %v4218_v22 = vmul.f32 %v4196_v53, %v6073_v12  ;;  %v4267_v26 = vmul.f32 0.5, %v4266_v31 }
 0xe47   : > { %v4298_v4 = vsub.f32 1.5, %v4297_v25 }
 0xe48   : > { %v5353_v44 = vpop.eup %5352  ;;  %v7359_v47 = vadd.f32 1e-05, %v4220_v59  ;;  %v7361_v57 = vadd.f32 1e-05, %v4218_v22  ;;  %v4268_v58 = vsub.f32 1.5, %v4267_v26 }
 0xe49   : > { %v5355_v56 = vpop.eup %5354  ;;  %v4299_v14 = vmul.f32 %v5349_v34, %v4298_v4  ;;  %v4305_v1 = vmul.f32 %v5353_v44, %v4233_v15  ;;  %vm4311_vm8 = vweird.f32 %v5353_v44 }
 0xe4a   : > { %v4285_v8 = vmul.f32 %v5355_v56, %v7349_v28  ;;  %5356 = vrsqrt.f32 %v7359_v47  ;;  %vm4291_vm1 = vweird.f32 %v5355_v56  ;;  %vm4312_vm11 = vmor %vm4310_vm10, %vm4311_vm8  ;;  %v4318_v28 = vmul.f32 %v4283_v27, %v7284_v43 }
 0xe4b   : > { %v4306_v50 = vmul.f32 %v5353_v44, %v4305_v1  ;;  %5358 = vrsqrt.f32 %v7361_v57  ;;  %v4303_v62 = vsel %vm4302_vm5, %v5349_v34, %v4299_v14  ;;  %vm4292_vm13 = vmor %vm4290_vm12, %vm4291_vm1  ;;  %v4269_v19 = vmul.f32 %v7353_v7, %v4268_v58 }
 0xe4c   : > { %v4286_v37 = vmul.f32 %v5355_v56, %v4285_v8  ;;  %v4320_v9 = vmul.f32 %v4303_v62, %v7299_v16  ;;  %vm4260_vm4 = vweird.f32 %v7359_v47  ;;  %v4327_v22 = vmul.f32 %v7384_v40, %v4318_v28 }
 0xe4d   : > { %v4307_v55 = vmul.f32 0.5, %v4306_v50  ;;  %v4199_v24 = vpop.xlane.xlu1 %4198  ;;  %v4273_v45 = vsel %vm7404_vm3, %v7353_v7, %v4269_v19  ;;  %vm4240_vm8 = vweird.f32 %v7361_v57 }
 0xe4e   : > { %v4287_v11 = vmul.f32 0.5, %v4286_v37  ;;  %v4219_v33 = vmul.f32 %v4199_v24, %v6073_v12  ;;  %v4329_v23 = vmul.f32 %v7384_v40, %v4320_v9  ;;  %v4317_v8 = vmul.f32 %v4273_v45, %v7290_v41 }
 0xe4f   : > { %v4308_v48 = vsub.f32 1.5, %v4307_v55 }
 0xe50   : > { %v5357_v61 = vpop.eup %5356  ;;  %v4288_v63 = vsub.f32 1.5, %v4287_v11  ;;  %v7372_v49 = vadd.f32 1e-05, %v4219_v33  ;;  %v4338_v25 = vadd.f32 %v4331_v5, %v4329_v23 }
 0xe51   : > { %v7374_v21 = vpop.eup %5358  ;;  %v4309_v17 = vmul.f32 %v5353_v44, %v4308_v48  ;;  %v4255_v12 = vmul.f32 %v5357_v61, %v7359_v47  ;;  %vm4261_vm15 = vweird.f32 %v5357_v61  ;;  %v4336_v47 = vadd.f32 %v4331_v5, %v4327_v22 }
 0xe52   : > { %v4289_v16 = vmul.f32 %v5355_v56, %v4288_v63  ;;  %v4235_v36 = vmul.f32 %v7374_v21, %v7361_v57  ;;  %5360 = vrsqrt.f32 %v7372_v49  ;;  %vm4262_vm5 = vmor %vm4260_vm4, %vm4261_vm15  ;;  %vm4241_vm6 = vweird.f32 %v7374_v21 }
 0xe53   : > { %v4313_v29 = vsel %vm4312_vm11, %v5353_v44, %v4309_v17  ;;  %v4256_v51 = vmul.f32 %v5357_v61, %v4255_v12  ;;  %vm4242_vm1 = vmor %vm4240_vm8, %vm4241_vm6  ;;  %vm4250_vm9 = vweird.f32 %v7372_v49  ;;  %vm4380_vm11 = vcmask 518144  }
 0xe54   : > { %v4321_v3 = vmul.f32 %v4313_v29, %v7306_v13  ;;  %v4293_v35 = vsel %vm4292_vm13, %v5355_v56, %v4289_v16  ;;  %v4236_v6 = vmul.f32 %v7374_v21, %v4235_v36 }
 0xe55   : > { %v4257_v18 = vmul.f32 0.5, %v4256_v51  ;;  %v4319_v34 = vmul.f32 %v4293_v35, %v7308_v60 }
 0xe56   : > { %v4330_v15 = vmul.f32 %v7384_v40, %v4321_v3  ;;  %v4237_v13 = vmul.f32 0.5, %v4236_v6 }
 0xe57   : > { %v4258_v54 = vsub.f32 1.5, %v4257_v18  ;;  %v4328_v53 = vmul.f32 %v7384_v40, %v4319_v34 }
 0xe58   : > { %v5361_v20 = vpop.eup %5360  ;;  %v4339_v46 = vadd.f32 %v4331_v5, %v4330_v15  ;;  %v4238_v4 = vsub.f32 1.5, %v4237_v13 }
 0xe59   : > { %v4259_v0 = vmul.f32 %v5357_v61, %v4258_v54  ;;  %v4245_v43 = vmul.f32 %v5361_v20, %v7372_v49  ;;  %v4337_v14 = vadd.f32 %v4331_v5, %v4328_v53  ;;  %vm4251_vm7 = vweird.f32 %v5361_v20 }
 0xe5a   : > { %v4343_v59 = vpack.c.bf16 %v4339_v46, %v4338_v25  ;;  %v4239_v31 = vmul.f32 %v7374_v21, %v4238_v4  ;;  %vm4252_vm10 = vmor %vm4250_vm9, %vm4251_vm7 }
 0xe5b   : > { %v4263_v10 = vsel %vm4262_vm5, %v5357_v61, %v4259_v0  ;;  %v4246_v44 = vmul.f32 %v5361_v20, %v4245_v43  ;;  %v4342_v7 = vpack.c.bf16 %v4337_v14, %v4336_v47 }
 0xe5c   : > { %v4364_v56 = vsel %vm562_vm0, %v4343_v59, 0  ;;  %v4316_v1 = vmul.f32 %v4263_v10, %v7318_v42  ;;  %v4326_v42 = vmul.f32 %v7384_v40, %v4317_v8  ;;  %v4243_v55 = vsel %vm4242_vm1, %v7374_v21, %v4239_v31 }
 0xe5d   : > { %v4247_v2 = vmul.f32 0.5, %v4246_v44  ;;  %4370 = vmatpush.bf16.xpose.msra.mxu0 %v4364_v56  ;;  %v4361_v41 = vsel %vm562_vm0, %v4342_v7, 0  ;;  %v4314_v32 = vmul.f32 %v4243_v55, %v7320_v38  ;;  %v4349_v38 = vpop.permute.xlu2 %4348 }
 0xe5e   : > { %v4325_v37 = vmul.f32 %v7384_v40, %v4316_v1  ;;  %v4335_v57 = vadd.f32 %v4331_v5, %v4326_v42 }
 0xe5f   : > { %v4248_v50 = vsub.f32 1.5, %v4247_v2  ;;  %v4323_v61 = vmul.f32 %v7384_v40, %v4314_v32 }
 0xe60   : > { %v4334_v11 = vadd.f32 %v4331_v5, %v4325_v37 }
 0xe61   : > { %v4249_v62 = vmul.f32 %v5361_v20, %v4248_v50  ;;  %v4332_v49 = vadd.f32 %v4331_v5, %v4323_v61 }
 0xe62   : > { %v4341_v26 = vpack.c.bf16 %v4335_v57, %v4334_v11 }
 0xe63   : > { %v4253_v24 = vsel %vm4252_vm10, %v5361_v20, %v4249_v62 }
 0xe64   : > { %v4315_v33 = vmul.f32 %v4253_v24, %v7329_v30  ;;  %v4358_v9 = vsel %vm562_vm0, %v4341_v26, 0  ;;  %v4344_v30 = vld [vmem:[%s7451_s9] sm:$0x3] }
 0xe65   : > { %4371 = vmatpush.bf16.xpose.msra.mxu0 %v4361_v41 }
 0xe66   : > { %v4324_v48 = vmul.f32 %v7384_v40, %v4315_v33 }
 0xe68   : > { %v4333_v63 = vadd.f32 %v4331_v5, %v4324_v48 }
 0xe6a   : > { %v4340_v21 = vpack.c.bf16 %v4333_v63, %v4332_v49 }
 0xe6c   : > { %v4355_v39 = vsel %vm562_vm0, %v4340_v21, 0 }
 0xe6d   : > { %4372 = vmatpush.bf16.xpose.msra.mxu0 %v4358_v9 }
 0xe75   : > { %4373 = vmatpush.bf16.xpose.msra.mxu0 %v4355_v39 }
 0xe7c   : > { %4934 = vmatmul.msk.bf16.vlgmr.msra.gmra.mxu0 %vm562_vm0, %v4344_v30 }
 0xef9   : > { %v4375_v17 = vpop.f32.mrf.mxu0 }
 0xefa   : > { %v4376_v12 = vadd.f32 %v4375_v17, %v4349_v38 }
 0xefc   : > { %v4379_v52 = vmax.f32 %v4376_v12, 0.0 }
 0xefe   : > { %4381 = vst.msk [vmem:[%s384_s23] sm:$0x7] %vm4380_vm11, %v4379_v52 }
 0xf01   : > { %v4377_v40 = vpop.f32.mrf.mxu0 }
 0xf02 PF: > { %s21_s17 = sadd.s32 1, %s5370_s17  }
 0xf03   : > { %p18_p4 = scmp.ge.s32.totalorder %s21_s17, 4  }
 0xf05   :  { %20 = sbr.rel (!%p18_p4) target bundleno = 1 (0x1), region = 101 }

</bundles_post_ra>
